<compile_context>
chip_gen: v6e
topology: v6e:2x2x1
jax: 0.10.0
libtpu: 0.0.40
codegen_flags: <defaults>
</compile_context>

<pallas_src>
import jax
import jax.numpy as jnp
from jax import lax
from jax.experimental import pallas as pl
from jax.experimental.pallas import tpu as pltpu

NEG_SLOPE = 0.2
EPS = 1e-5


def _make_kernel(N, H, W, C, Ch, MP):
    WP = W + 2
    inv_cnt = 1.0 / float(N * H * W)

    def mix(w, inp):
        # w: (Cout, Cin) value; inp: (Cin, MP). Pure-VPU channel mix via
        # broadcast FMAs (outer-product accumulate) — MXU stays out of the path.
        cin = inp.shape[0]
        acc = w[:, 0:1] * inp[0:1, :]
        for i in range(1, cin):
            acc = acc + w[:, i:i + 1] * inp[i:i + 1, :]
        return acc

    def kernel(xp_ref, mask_ref, w1_ref, w2_ref, w3_ref, w4_ref, p_ref, out_ref):
        xp = xp_ref[...]          # (C, MP)  zero-halo, padded-flat input
        mask = mask_ref[...]      # (1, MP)  1.0 on interior pixels, else 0.0
        p = p_ref[...]            # (C, 8)   packed per-channel params
        b1, b2, b3 = p[:Ch, 0:1], p[:Ch, 1:2], p[:Ch, 2:3]
        b4 = p[:, 3:4]
        g1, be1 = p[:Ch, 4:5], p[:Ch, 5:6]
        g2, be2 = p[:, 6:7], p[:, 7:8]

        def bn_lrelu(a, gamma, beta):
            # training-mode BatchNorm (biased batch stats over interior pixels)
            # fused with LeakyReLU(0.2); halo re-zeroed for the next 3x3 conv.
            am = a * mask
            mean = jnp.sum(am, axis=1, keepdims=True) * inv_cnt
            var = jnp.sum(am * am, axis=1, keepdims=True) * inv_cnt - mean * mean
            y = (a - mean) * lax.rsqrt(var + EPS) * gamma + beta
            y = jnp.maximum(y, NEG_SLOPE * y)
            return y * mask

        def conv3x3(inp, w_ref, bias):
            # inp: (Cin, MP) with zero halo; w_ref: (9, Cout, Cin) (tap-major).
            # Each tap is a constant lane shift on the padded-flat grid; only
            # interior output lanes are ever consumed, so no per-tap masks.
            acc = None
            t = 0
            for dy in (-1, 0, 1):
                for dx in (-1, 0, 1):
                    s = dy * WP + dx
                    tap = inp if s == 0 else pltpu.roll(inp, shift=(-s) % MP, axis=1)
                    c = mix(w_ref[t], tap)
                    acc = c if acc is None else acc + c
                    t += 1
            return acc + bias

        out1 = bn_lrelu(conv3x3(xp, w1_ref, b1), g1, be1)
        out2 = bn_lrelu(mix(w2_ref[...], out1) + b2, g1, be1)
        out3 = bn_lrelu(mix(w3_ref[...], out2) + b3, g1, be1)
        res1 = out1 + out3
        out4 = bn_lrelu(conv3x3(res1, w4_ref, b4), g2, be2)
        out_ref[...] = xp + out4          # residual add reuses the single x copy

    return kernel


def rirb_forward(x, params):
    """x: (N, C, H, W) float32, NCHW like PyTorch. Returns NCHW."""
    w1, b1, w2, b2, w3, b3, w4, b4, g1, be1, g2, be2 = params
    N, C, H, W = x.shape
    Ch = C // 2
    PP = (H + 2) * (W + 2)
    Mp = N * PP
    MP = ((Mp + 127) // 128) * 128        # lane-dense flat length (multiple of 128)

    # zero-halo padded, channel-major, flattened, lane-padded input: (C, MP)
    xp = jnp.pad(jnp.transpose(x, (1, 0, 2, 3)), ((0, 0), (0, 0), (1, 1), (1, 1)))
    xp = jnp.pad(xp.reshape(C, Mp), ((0, 0), (0, MP - Mp)))

    # interior-pixel mask (1, MP): 1.0 on real pixels, 0.0 on halo / tail pad
    mask = jnp.pad(jnp.ones((N, H, W), jnp.float32), ((0, 0), (1, 1), (1, 1)))
    mask = jnp.pad(mask.reshape(1, Mp), ((0, 0), (0, MP - Mp)))

    # torch conv weights (O, I, kh, kw) -> per-tap (O, I) matrices, tap-major
    w1p = jnp.transpose(w1, (2, 3, 0, 1)).reshape(9, Ch, C)
    w4p = jnp.transpose(w4, (2, 3, 0, 1)).reshape(9, C, Ch)
    w2p = w2[:, :, 0, 0]                  # (Ch, Ch)
    w3p = w3[:, :, 0, 0]

    def padc(v):
        return jnp.pad(v, (0, C - v.shape[0]))
    pparams = jnp.stack(
        [padc(b1), padc(b2), padc(b3), b4, padc(g1), padc(be1), g2, be2], axis=1
    ).astype(jnp.float32)                 # (C, 8)

    kernel = _make_kernel(N, H, W, C, Ch, MP)
    vmem = pl.BlockSpec(memory_space=pltpu.MemorySpace.VMEM)
    out_flat = pl.pallas_call(
        kernel,
        out_shape=jax.ShapeDtypeStruct((C, MP), jnp.float32),
        in_specs=[vmem] * 7,
        out_specs=vmem,
    )(xp, mask, w1p, w2p, w3p, w4p, pparams)

    out = out_flat[:, :Mp].reshape(C, N, H + 2, W + 2)[:, :, 1:H + 1, 1:W + 1]
    return jnp.transpose(out, (1, 0, 2, 3))


# ---------------- pure-JAX reference (for correctness check) ----------------
def ref_forward(x, params):
    w1, b1, w2, b2, w3, b3, w4, b4, g1, be1, g2, be2 = params

    def conv(inp, w, b, pad):
        y = lax.conv_general_dilated(
            inp, w, (1, 1), [(pad, pad), (pad, pad)],
            dimension_numbers=('NCHW', 'OIHW', 'NCHW'),
            precision=lax.Precision.HIGHEST)
        return y + b[None, :, None, None]

    def bn_lrelu(y, g, be):
        mean = jnp.mean(y, axis=(0, 2, 3), keepdims=True)
        var = jnp.mean((y - mean) ** 2, axis=(0, 2, 3), keepdims=True)
        yn = (y - mean) * lax.rsqrt(var + EPS) * g[None, :, None, None] + be[None, :, None, None]
        return jnp.where(yn > 0, yn, NEG_SLOPE * yn)

    out1 = bn_lrelu(conv(x, w1, b1, 1), g1, be1)
    out2 = bn_lrelu(conv(out1, w2, b2, 0), g1, be1)
    out3 = bn_lrelu(conv(out2, w3, b3, 0), g1, be1)
    res1 = out1 + out3
    out4 = bn_lrelu(conv(res1, w4, b4, 1), g2, be2)
    return x + out4


if __name__ == "__main__":
    ndf, N, H, W = 4, 2, 16, 16
    nh = ndf // 2
    keys = jax.random.split(jax.random.PRNGKey(0), 16)

    x = jax.random.normal(keys[0], (N, ndf, H, W), jnp.float32)
    w1 = 0.1 * jax.random.normal(keys[1], (nh, ndf, 3, 3), jnp.float32)
    b1 = 0.1 * jax.random.normal(keys[2], (nh,), jnp.float32)
    w2 = 0.1 * jax.random.normal(keys[3], (nh, nh, 1, 1), jnp.float32)
    b2 = 0.1 * jax.random.normal(keys[4], (nh,), jnp.float32)
    w3 = 0.1 * jax.random.normal(keys[5], (nh, nh, 1, 1), jnp.float32)
    b3 = 0.1 * jax.random.normal(keys[6], (nh,), jnp.float32)
    w4 = 0.1 * jax.random.normal(keys[7], (ndf, nh, 3, 3), jnp.float32)
    b4 = 0.1 * jax.random.normal(keys[8], (ndf,), jnp.float32)
    g1 = 1.0 + 0.1 * jax.random.normal(keys[9], (nh,), jnp.float32)
    be1 = 0.1 * jax.random.normal(keys[10], (nh,), jnp.float32)
    g2 = 1.0 + 0.1 * jax.random.normal(keys[11], (ndf,), jnp.float32)
    be2 = 0.1 * jax.random.normal(keys[12], (ndf,), jnp.float32)
    params = (w1, b1, w2, b2, w3, b3, w4, b4, g1, be1, g2, be2)

    out = jax.jit(rirb_forward)(x, params)
    out = jax.block_until_ready(out)

    ref = ref_forward(x, params)
    assert out.shape == x.shape == (N, ndf, H, W)
    max_err = float(jnp.max(jnp.abs(out - ref)))
    assert max_err < 2e-2, f"mismatch vs reference: max abs err = {max_err}"
    print("KERNEL_OK")
</pallas_src>

<mosaic_0001>
module attributes {stable_mosaic.version = 11 : i64} {
  func.func @kernel(%arg0: memref<4x768xf32, #tpu.memory_space<vmem>>, %arg1: memref<1x768xf32, #tpu.memory_space<vmem>>, %arg2: memref<9x2x4xf32, #tpu.memory_space<vmem>>, %arg3: memref<2x2xf32, #tpu.memory_space<vmem>>, %arg4: memref<2x2xf32, #tpu.memory_space<vmem>>, %arg5: memref<9x4x2xf32, #tpu.memory_space<vmem>>, %arg6: memref<4x8xf32, #tpu.memory_space<vmem>>, %arg7: memref<4x768xf32, #tpu.memory_space<vmem>>) attributes {dimension_semantics = [], scalar_prefetch = 0 : i64, scratch_operands = 0 : i64, tpu.core_type = #tpu.core_type<tc>} {
    %c0 = arith.constant 0 : index
    %c0_0 = arith.constant 0 : index
    %0 = vector.load %arg0[%c0, %c0_0] : memref<4x768xf32, #tpu.memory_space<vmem>>, vector<4x768xf32>
    %c0_1 = arith.constant 0 : index
    %c0_2 = arith.constant 0 : index
    %1 = vector.load %arg1[%c0_1, %c0_2] : memref<1x768xf32, #tpu.memory_space<vmem>>, vector<1x768xf32>
    %c0_3 = arith.constant 0 : index
    %c0_4 = arith.constant 0 : index
    %2 = vector.load %arg6[%c0_3, %c0_4] : memref<4x8xf32, #tpu.memory_space<vmem>>, vector<4x8xf32>
    %3 = vector.extract_strided_slice %2 {offsets = [0, 0], sizes = [2, 1], strides = [1, 1]} : vector<4x8xf32> to vector<2x1xf32>
    %4 = vector.extract_strided_slice %2 {offsets = [0, 1], sizes = [2, 1], strides = [1, 1]} : vector<4x8xf32> to vector<2x1xf32>
    %5 = vector.extract_strided_slice %2 {offsets = [0, 2], sizes = [2, 1], strides = [1, 1]} : vector<4x8xf32> to vector<2x1xf32>
    %6 = vector.extract_strided_slice %2 {offsets = [0, 3], sizes = [4, 1], strides = [1, 1]} : vector<4x8xf32> to vector<4x1xf32>
    %7 = vector.extract_strided_slice %2 {offsets = [0, 4], sizes = [2, 1], strides = [1, 1]} : vector<4x8xf32> to vector<2x1xf32>
    %8 = vector.extract_strided_slice %2 {offsets = [0, 5], sizes = [2, 1], strides = [1, 1]} : vector<4x8xf32> to vector<2x1xf32>
    %9 = vector.extract_strided_slice %2 {offsets = [0, 6], sizes = [4, 1], strides = [1, 1]} : vector<4x8xf32> to vector<4x1xf32>
    %10 = vector.extract_strided_slice %2 {offsets = [0, 7], sizes = [4, 1], strides = [1, 1]} : vector<4x8xf32> to vector<4x1xf32>
    %c19_i32 = arith.constant 19 : i32
    %11 = tpu.dynamic_rotate %0 by %c19_i32 dim 1 : vector<4x768xf32>, i32 -> vector<4x768xf32>
    %c0_5 = arith.constant 0 : index
    %c0_6 = arith.constant 0 : index
    %c0_7 = arith.constant 0 : index
    %12 = vector.load %arg2[%c0_5, %c0_6, %c0_7] : memref<9x2x4xf32, #tpu.memory_space<vmem>>, vector<1x2x4xf32>
    %13 = vector.shape_cast %12 : vector<1x2x4xf32> to vector<2x4xf32>
    %14 = vector.extract_strided_slice %13 {offsets = [0, 0], sizes = [2, 1], strides = [1, 1]} : vector<2x4xf32> to vector<2x1xf32>
    %15 = vector.extract_strided_slice %11 {offsets = [0, 0], sizes = [1, 768], strides = [1, 1]} : vector<4x768xf32> to vector<1x768xf32>
    %16 = vector.broadcast %14 : vector<2x1xf32> to vector<2x768xf32>
    %17 = vector.broadcast %15 : vector<1x768xf32> to vector<2x768xf32>
    %18 = arith.mulf %16, %17 : vector<2x768xf32>
    %19 = vector.extract_strided_slice %13 {offsets = [0, 1], sizes = [2, 1], strides = [1, 1]} : vector<2x4xf32> to vector<2x1xf32>
    %20 = vector.extract_strided_slice %11 {offsets = [1, 0], sizes = [1, 768], strides = [1, 1]} : vector<4x768xf32> to vector<1x768xf32>
    %21 = vector.broadcast %19 : vector<2x1xf32> to vector<2x768xf32>
    %22 = vector.broadcast %20 : vector<1x768xf32> to vector<2x768xf32>
    %23 = arith.mulf %21, %22 : vector<2x768xf32>
    %24 = arith.addf %18, %23 : vector<2x768xf32>
    %25 = vector.extract_strided_slice %13 {offsets = [0, 2], sizes = [2, 1], strides = [1, 1]} : vector<2x4xf32> to vector<2x1xf32>
    %26 = vector.extract_strided_slice %11 {offsets = [2, 0], sizes = [1, 768], strides = [1, 1]} : vector<4x768xf32> to vector<1x768xf32>
    %27 = vector.broadcast %25 : vector<2x1xf32> to vector<2x768xf32>
    %28 = vector.broadcast %26 : vector<1x768xf32> to vector<2x768xf32>
    %29 = arith.mulf %27, %28 : vector<2x768xf32>
    %30 = arith.addf %24, %29 : vector<2x768xf32>
    %31 = vector.extract_strided_slice %13 {offsets = [0, 3], sizes = [2, 1], strides = [1, 1]} : vector<2x4xf32> to vector<2x1xf32>
    %32 = vector.extract_strided_slice %11 {offsets = [3, 0], sizes = [1, 768], strides = [1, 1]} : vector<4x768xf32> to vector<1x768xf32>
    %33 = vector.broadcast %31 : vector<2x1xf32> to vector<2x768xf32>
    %34 = vector.broadcast %32 : vector<1x768xf32> to vector<2x768xf32>
    %35 = arith.mulf %33, %34 : vector<2x768xf32>
    %36 = arith.addf %30, %35 : vector<2x768xf32>
    %c18_i32 = arith.constant 18 : i32
    %37 = tpu.dynamic_rotate %0 by %c18_i32 dim 1 : vector<4x768xf32>, i32 -> vector<4x768xf32>
    %c1 = arith.constant 1 : index
    %c0_8 = arith.constant 0 : index
    %c0_9 = arith.constant 0 : index
    %38 = vector.load %arg2[%c1, %c0_8, %c0_9] : memref<9x2x4xf32, #tpu.memory_space<vmem>>, vector<1x2x4xf32>
    %39 = vector.shape_cast %38 : vector<1x2x4xf32> to vector<2x4xf32>
    %40 = vector.extract_strided_slice %39 {offsets = [0, 0], sizes = [2, 1], strides = [1, 1]} : vector<2x4xf32> to vector<2x1xf32>
    %41 = vector.extract_strided_slice %37 {offsets = [0, 0], sizes = [1, 768], strides = [1, 1]} : vector<4x768xf32> to vector<1x768xf32>
    %42 = vector.broadcast %40 : vector<2x1xf32> to vector<2x768xf32>
    %43 = vector.broadcast %41 : vector<1x768xf32> to vector<2x768xf32>
    %44 = arith.mulf %42, %43 : vector<2x768xf32>
    %45 = vector.extract_strided_slice %39 {offsets = [0, 1], sizes = [2, 1], strides = [1, 1]} : vector<2x4xf32> to vector<2x1xf32>
    %46 = vector.extract_strided_slice %37 {offsets = [1, 0], sizes = [1, 768], strides = [1, 1]} : vector<4x768xf32> to vector<1x768xf32>
    %47 = vector.broadcast %45 : vector<2x1xf32> to vector<2x768xf32>
    %48 = vector.broadcast %46 : vector<1x768xf32> to vector<2x768xf32>
    %49 = arith.mulf %47, %48 : vector<2x768xf32>
    %50 = arith.addf %44, %49 : vector<2x768xf32>
    %51 = vector.extract_strided_slice %39 {offsets = [0, 2], sizes = [2, 1], strides = [1, 1]} : vector<2x4xf32> to vector<2x1xf32>
    %52 = vector.extract_strided_slice %37 {offsets = [2, 0], sizes = [1, 768], strides = [1, 1]} : vector<4x768xf32> to vector<1x768xf32>
    %53 = vector.broadcast %51 : vector<2x1xf32> to vector<2x768xf32>
    %54 = vector.broadcast %52 : vector<1x768xf32> to vector<2x768xf32>
    %55 = arith.mulf %53, %54 : vector<2x768xf32>
    %56 = arith.addf %50, %55 : vector<2x768xf32>
    %57 = vector.extract_strided_slice %39 {offsets = [0, 3], sizes = [2, 1], strides = [1, 1]} : vector<2x4xf32> to vector<2x1xf32>
    %58 = vector.extract_strided_slice %37 {offsets = [3, 0], sizes = [1, 768], strides = [1, 1]} : vector<4x768xf32> to vector<1x768xf32>
    %59 = vector.broadcast %57 : vector<2x1xf32> to vector<2x768xf32>
    %60 = vector.broadcast %58 : vector<1x768xf32> to vector<2x768xf32>
    %61 = arith.mulf %59, %60 : vector<2x768xf32>
    %62 = arith.addf %56, %61 : vector<2x768xf32>
    %63 = arith.addf %36, %62 : vector<2x768xf32>
    %c17_i32 = arith.constant 17 : i32
    %64 = tpu.dynamic_rotate %0 by %c17_i32 dim 1 : vector<4x768xf32>, i32 -> vector<4x768xf32>
    %c2 = arith.constant 2 : index
    %c0_10 = arith.constant 0 : index
    %c0_11 = arith.constant 0 : index
    %65 = vector.load %arg2[%c2, %c0_10, %c0_11] : memref<9x2x4xf32, #tpu.memory_space<vmem>>, vector<1x2x4xf32>
    %66 = vector.shape_cast %65 : vector<1x2x4xf32> to vector<2x4xf32>
    %67 = vector.extract_strided_slice %66 {offsets = [0, 0], sizes = [2, 1], strides = [1, 1]} : vector<2x4xf32> to vector<2x1xf32>
    %68 = vector.extract_strided_slice %64 {offsets = [0, 0], sizes = [1, 768], strides = [1, 1]} : vector<4x768xf32> to vector<1x768xf32>
    %69 = vector.broadcast %67 : vector<2x1xf32> to vector<2x768xf32>
    %70 = vector.broadcast %68 : vector<1x768xf32> to vector<2x768xf32>
    %71 = arith.mulf %69, %70 : vector<2x768xf32>
    %72 = vector.extract_strided_slice %66 {offsets = [0, 1], sizes = [2, 1], strides = [1, 1]} : vector<2x4xf32> to vector<2x1xf32>
    %73 = vector.extract_strided_slice %64 {offsets = [1, 0], sizes = [1, 768], strides = [1, 1]} : vector<4x768xf32> to vector<1x768xf32>
    %74 = vector.broadcast %72 : vector<2x1xf32> to vector<2x768xf32>
    %75 = vector.broadcast %73 : vector<1x768xf32> to vector<2x768xf32>
    %76 = arith.mulf %74, %75 : vector<2x768xf32>
    %77 = arith.addf %71, %76 : vector<2x768xf32>
    %78 = vector.extract_strided_slice %66 {offsets = [0, 2], sizes = [2, 1], strides = [1, 1]} : vector<2x4xf32> to vector<2x1xf32>
    %79 = vector.extract_strided_slice %64 {offsets = [2, 0], sizes = [1, 768], strides = [1, 1]} : vector<4x768xf32> to vector<1x768xf32>
    %80 = vector.broadcast %78 : vector<2x1xf32> to vector<2x768xf32>
    %81 = vector.broadcast %79 : vector<1x768xf32> to vector<2x768xf32>
    %82 = arith.mulf %80, %81 : vector<2x768xf32>
    %83 = arith.addf %77, %82 : vector<2x768xf32>
    %84 = vector.extract_strided_slice %66 {offsets = [0, 3], sizes = [2, 1], strides = [1, 1]} : vector<2x4xf32> to vector<2x1xf32>
    %85 = vector.extract_strided_slice %64 {offsets = [3, 0], sizes = [1, 768], strides = [1, 1]} : vector<4x768xf32> to vector<1x768xf32>
    %86 = vector.broadcast %84 : vector<2x1xf32> to vector<2x768xf32>
    %87 = vector.broadcast %85 : vector<1x768xf32> to vector<2x768xf32>
    %88 = arith.mulf %86, %87 : vector<2x768xf32>
    %89 = arith.addf %83, %88 : vector<2x768xf32>
    %90 = arith.addf %63, %89 : vector<2x768xf32>
    %c1_i32 = arith.constant 1 : i32
    %91 = tpu.dynamic_rotate %0 by %c1_i32 dim 1 : vector<4x768xf32>, i32 -> vector<4x768xf32>
    %c3 = arith.constant 3 : index
    %c0_12 = arith.constant 0 : index
    %c0_13 = arith.constant 0 : index
    %92 = vector.load %arg2[%c3, %c0_12, %c0_13] : memref<9x2x4xf32, #tpu.memory_space<vmem>>, vector<1x2x4xf32>
    %93 = vector.shape_cast %92 : vector<1x2x4xf32> to vector<2x4xf32>
    %94 = vector.extract_strided_slice %93 {offsets = [0, 0], sizes = [2, 1], strides = [1, 1]} : vector<2x4xf32> to vector<2x1xf32>
    %95 = vector.extract_strided_slice %91 {offsets = [0, 0], sizes = [1, 768], strides = [1, 1]} : vector<4x768xf32> to vector<1x768xf32>
    %96 = vector.broadcast %94 : vector<2x1xf32> to vector<2x768xf32>
    %97 = vector.broadcast %95 : vector<1x768xf32> to vector<2x768xf32>
    %98 = arith.mulf %96, %97 : vector<2x768xf32>
    %99 = vector.extract_strided_slice %93 {offsets = [0, 1], sizes = [2, 1], strides = [1, 1]} : vector<2x4xf32> to vector<2x1xf32>
    %100 = vector.extract_strided_slice %91 {offsets = [1, 0], sizes = [1, 768], strides = [1, 1]} : vector<4x768xf32> to vector<1x768xf32>
    %101 = vector.broadcast %99 : vector<2x1xf32> to vector<2x768xf32>
    %102 = vector.broadcast %100 : vector<1x768xf32> to vector<2x768xf32>
    %103 = arith.mulf %101, %102 : vector<2x768xf32>
    %104 = arith.addf %98, %103 : vector<2x768xf32>
    %105 = vector.extract_strided_slice %93 {offsets = [0, 2], sizes = [2, 1], strides = [1, 1]} : vector<2x4xf32> to vector<2x1xf32>
    %106 = vector.extract_strided_slice %91 {offsets = [2, 0], sizes = [1, 768], strides = [1, 1]} : vector<4x768xf32> to vector<1x768xf32>
    %107 = vector.broadcast %105 : vector<2x1xf32> to vector<2x768xf32>
    %108 = vector.broadcast %106 : vector<1x768xf32> to vector<2x768xf32>
    %109 = arith.mulf %107, %108 : vector<2x768xf32>
    %110 = arith.addf %104, %109 : vector<2x768xf32>
    %111 = vector.extract_strided_slice %93 {offsets = [0, 3], sizes = [2, 1], strides = [1, 1]} : vector<2x4xf32> to vector<2x1xf32>
    %112 = vector.extract_strided_slice %91 {offsets = [3, 0], sizes = [1, 768], strides = [1, 1]} : vector<4x768xf32> to vector<1x768xf32>
    %113 = vector.broadcast %111 : vector<2x1xf32> to vector<2x768xf32>
    %114 = vector.broadcast %112 : vector<1x768xf32> to vector<2x768xf32>
    %115 = arith.mulf %113, %114 : vector<2x768xf32>
    %116 = arith.addf %110, %115 : vector<2x768xf32>
    %117 = arith.addf %90, %116 : vector<2x768xf32>
    %c4 = arith.constant 4 : index
    %c0_14 = arith.constant 0 : index
    %c0_15 = arith.constant 0 : index
    %118 = vector.load %arg2[%c4, %c0_14, %c0_15] : memref<9x2x4xf32, #tpu.memory_space<vmem>>, vector<1x2x4xf32>
    %119 = vector.shape_cast %118 : vector<1x2x4xf32> to vector<2x4xf32>
    %120 = vector.extract_strided_slice %119 {offsets = [0, 0], sizes = [2, 1], strides = [1, 1]} : vector<2x4xf32> to vector<2x1xf32>
    %121 = vector.extract_strided_slice %0 {offsets = [0, 0], sizes = [1, 768], strides = [1, 1]} : vector<4x768xf32> to vector<1x768xf32>
    %122 = vector.broadcast %120 : vector<2x1xf32> to vector<2x768xf32>
    %123 = vector.broadcast %121 : vector<1x768xf32> to vector<2x768xf32>
    %124 = arith.mulf %122, %123 : vector<2x768xf32>
    %125 = vector.extract_strided_slice %119 {offsets = [0, 1], sizes = [2, 1], strides = [1, 1]} : vector<2x4xf32> to vector<2x1xf32>
    %126 = vector.extract_strided_slice %0 {offsets = [1, 0], sizes = [1, 768], strides = [1, 1]} : vector<4x768xf32> to vector<1x768xf32>
    %127 = vector.broadcast %125 : vector<2x1xf32> to vector<2x768xf32>
    %128 = vector.broadcast %126 : vector<1x768xf32> to vector<2x768xf32>
    %129 = arith.mulf %127, %128 : vector<2x768xf32>
    %130 = arith.addf %124, %129 : vector<2x768xf32>
    %131 = vector.extract_strided_slice %119 {offsets = [0, 2], sizes = [2, 1], strides = [1, 1]} : vector<2x4xf32> to vector<2x1xf32>
    %132 = vector.extract_strided_slice %0 {offsets = [2, 0], sizes = [1, 768], strides = [1, 1]} : vector<4x768xf32> to vector<1x768xf32>
    %133 = vector.broadcast %131 : vector<2x1xf32> to vector<2x768xf32>
    %134 = vector.broadcast %132 : vector<1x768xf32> to vector<2x768xf32>
    %135 = arith.mulf %133, %134 : vector<2x768xf32>
    %136 = arith.addf %130, %135 : vector<2x768xf32>
    %137 = vector.extract_strided_slice %119 {offsets = [0, 3], sizes = [2, 1], strides = [1, 1]} : vector<2x4xf32> to vector<2x1xf32>
    %138 = vector.extract_strided_slice %0 {offsets = [3, 0], sizes = [1, 768], strides = [1, 1]} : vector<4x768xf32> to vector<1x768xf32>
    %139 = vector.broadcast %137 : vector<2x1xf32> to vector<2x768xf32>
    %140 = vector.broadcast %138 : vector<1x768xf32> to vector<2x768xf32>
    %141 = arith.mulf %139, %140 : vector<2x768xf32>
    %142 = arith.addf %136, %141 : vector<2x768xf32>
    %143 = arith.addf %117, %142 : vector<2x768xf32>
    %c767_i32 = arith.constant 767 : i32
    %144 = tpu.dynamic_rotate %0 by %c767_i32 dim 1 : vector<4x768xf32>, i32 -> vector<4x768xf32>
    %c5 = arith.constant 5 : index
    %c0_16 = arith.constant 0 : index
    %c0_17 = arith.constant 0 : index
    %145 = vector.load %arg2[%c5, %c0_16, %c0_17] : memref<9x2x4xf32, #tpu.memory_space<vmem>>, vector<1x2x4xf32>
    %146 = vector.shape_cast %145 : vector<1x2x4xf32> to vector<2x4xf32>
    %147 = vector.extract_strided_slice %146 {offsets = [0, 0], sizes = [2, 1], strides = [1, 1]} : vector<2x4xf32> to vector<2x1xf32>
    %148 = vector.extract_strided_slice %144 {offsets = [0, 0], sizes = [1, 768], strides = [1, 1]} : vector<4x768xf32> to vector<1x768xf32>
    %149 = vector.broadcast %147 : vector<2x1xf32> to vector<2x768xf32>
    %150 = vector.broadcast %148 : vector<1x768xf32> to vector<2x768xf32>
    %151 = arith.mulf %149, %150 : vector<2x768xf32>
    %152 = vector.extract_strided_slice %146 {offsets = [0, 1], sizes = [2, 1], strides = [1, 1]} : vector<2x4xf32> to vector<2x1xf32>
    %153 = vector.extract_strided_slice %144 {offsets = [1, 0], sizes = [1, 768], strides = [1, 1]} : vector<4x768xf32> to vector<1x768xf32>
    %154 = vector.broadcast %152 : vector<2x1xf32> to vector<2x768xf32>
    %155 = vector.broadcast %153 : vector<1x768xf32> to vector<2x768xf32>
    %156 = arith.mulf %154, %155 : vector<2x768xf32>
    %157 = arith.addf %151, %156 : vector<2x768xf32>
    %158 = vector.extract_strided_slice %146 {offsets = [0, 2], sizes = [2, 1], strides = [1, 1]} : vector<2x4xf32> to vector<2x1xf32>
    %159 = vector.extract_strided_slice %144 {offsets = [2, 0], sizes = [1, 768], strides = [1, 1]} : vector<4x768xf32> to vector<1x768xf32>
    %160 = vector.broadcast %158 : vector<2x1xf32> to vector<2x768xf32>
    %161 = vector.broadcast %159 : vector<1x768xf32> to vector<2x768xf32>
    %162 = arith.mulf %160, %161 : vector<2x768xf32>
    %163 = arith.addf %157, %162 : vector<2x768xf32>
    %164 = vector.extract_strided_slice %146 {offsets = [0, 3], sizes = [2, 1], strides = [1, 1]} : vector<2x4xf32> to vector<2x1xf32>
    %165 = vector.extract_strided_slice %144 {offsets = [3, 0], sizes = [1, 768], strides = [1, 1]} : vector<4x768xf32> to vector<1x768xf32>
    %166 = vector.broadcast %164 : vector<2x1xf32> to vector<2x768xf32>
    %167 = vector.broadcast %165 : vector<1x768xf32> to vector<2x768xf32>
    %168 = arith.mulf %166, %167 : vector<2x768xf32>
    %169 = arith.addf %163, %168 : vector<2x768xf32>
    %170 = arith.addf %143, %169 : vector<2x768xf32>
    %c751_i32 = arith.constant 751 : i32
    %171 = tpu.dynamic_rotate %0 by %c751_i32 dim 1 : vector<4x768xf32>, i32 -> vector<4x768xf32>
    %c6 = arith.constant 6 : index
    %c0_18 = arith.constant 0 : index
    %c0_19 = arith.constant 0 : index
    %172 = vector.load %arg2[%c6, %c0_18, %c0_19] : memref<9x2x4xf32, #tpu.memory_space<vmem>>, vector<1x2x4xf32>
    %173 = vector.shape_cast %172 : vector<1x2x4xf32> to vector<2x4xf32>
    %174 = vector.extract_strided_slice %173 {offsets = [0, 0], sizes = [2, 1], strides = [1, 1]} : vector<2x4xf32> to vector<2x1xf32>
    %175 = vector.extract_strided_slice %171 {offsets = [0, 0], sizes = [1, 768], strides = [1, 1]} : vector<4x768xf32> to vector<1x768xf32>
    %176 = vector.broadcast %174 : vector<2x1xf32> to vector<2x768xf32>
    %177 = vector.broadcast %175 : vector<1x768xf32> to vector<2x768xf32>
    %178 = arith.mulf %176, %177 : vector<2x768xf32>
    %179 = vector.extract_strided_slice %173 {offsets = [0, 1], sizes = [2, 1], strides = [1, 1]} : vector<2x4xf32> to vector<2x1xf32>
    %180 = vector.extract_strided_slice %171 {offsets = [1, 0], sizes = [1, 768], strides = [1, 1]} : vector<4x768xf32> to vector<1x768xf32>
    %181 = vector.broadcast %179 : vector<2x1xf32> to vector<2x768xf32>
    %182 = vector.broadcast %180 : vector<1x768xf32> to vector<2x768xf32>
    %183 = arith.mulf %181, %182 : vector<2x768xf32>
    %184 = arith.addf %178, %183 : vector<2x768xf32>
    %185 = vector.extract_strided_slice %173 {offsets = [0, 2], sizes = [2, 1], strides = [1, 1]} : vector<2x4xf32> to vector<2x1xf32>
    %186 = vector.extract_strided_slice %171 {offsets = [2, 0], sizes = [1, 768], strides = [1, 1]} : vector<4x768xf32> to vector<1x768xf32>
    %187 = vector.broadcast %185 : vector<2x1xf32> to vector<2x768xf32>
    %188 = vector.broadcast %186 : vector<1x768xf32> to vector<2x768xf32>
    %189 = arith.mulf %187, %188 : vector<2x768xf32>
    %190 = arith.addf %184, %189 : vector<2x768xf32>
    %191 = vector.extract_strided_slice %173 {offsets = [0, 3], sizes = [2, 1], strides = [1, 1]} : vector<2x4xf32> to vector<2x1xf32>
    %192 = vector.extract_strided_slice %171 {offsets = [3, 0], sizes = [1, 768], strides = [1, 1]} : vector<4x768xf32> to vector<1x768xf32>
    %193 = vector.broadcast %191 : vector<2x1xf32> to vector<2x768xf32>
    %194 = vector.broadcast %192 : vector<1x768xf32> to vector<2x768xf32>
    %195 = arith.mulf %193, %194 : vector<2x768xf32>
    %196 = arith.addf %190, %195 : vector<2x768xf32>
    %197 = arith.addf %170, %196 : vector<2x768xf32>
    %c750_i32 = arith.constant 750 : i32
    %198 = tpu.dynamic_rotate %0 by %c750_i32 dim 1 : vector<4x768xf32>, i32 -> vector<4x768xf32>
    %c7 = arith.constant 7 : index
    %c0_20 = arith.constant 0 : index
    %c0_21 = arith.constant 0 : index
    %199 = vector.load %arg2[%c7, %c0_20, %c0_21] : memref<9x2x4xf32, #tpu.memory_space<vmem>>, vector<1x2x4xf32>
    %200 = vector.shape_cast %199 : vector<1x2x4xf32> to vector<2x4xf32>
    %201 = vector.extract_strided_slice %200 {offsets = [0, 0], sizes = [2, 1], strides = [1, 1]} : vector<2x4xf32> to vector<2x1xf32>
    %202 = vector.extract_strided_slice %198 {offsets = [0, 0], sizes = [1, 768], strides = [1, 1]} : vector<4x768xf32> to vector<1x768xf32>
    %203 = vector.broadcast %201 : vector<2x1xf32> to vector<2x768xf32>
    %204 = vector.broadcast %202 : vector<1x768xf32> to vector<2x768xf32>
    %205 = arith.mulf %203, %204 : vector<2x768xf32>
    %206 = vector.extract_strided_slice %200 {offsets = [0, 1], sizes = [2, 1], strides = [1, 1]} : vector<2x4xf32> to vector<2x1xf32>
    %207 = vector.extract_strided_slice %198 {offsets = [1, 0], sizes = [1, 768], strides = [1, 1]} : vector<4x768xf32> to vector<1x768xf32>
    %208 = vector.broadcast %206 : vector<2x1xf32> to vector<2x768xf32>
    %209 = vector.broadcast %207 : vector<1x768xf32> to vector<2x768xf32>
    %210 = arith.mulf %208, %209 : vector<2x768xf32>
    %211 = arith.addf %205, %210 : vector<2x768xf32>
    %212 = vector.extract_strided_slice %200 {offsets = [0, 2], sizes = [2, 1], strides = [1, 1]} : vector<2x4xf32> to vector<2x1xf32>
    %213 = vector.extract_strided_slice %198 {offsets = [2, 0], sizes = [1, 768], strides = [1, 1]} : vector<4x768xf32> to vector<1x768xf32>
    %214 = vector.broadcast %212 : vector<2x1xf32> to vector<2x768xf32>
    %215 = vector.broadcast %213 : vector<1x768xf32> to vector<2x768xf32>
    %216 = arith.mulf %214, %215 : vector<2x768xf32>
    %217 = arith.addf %211, %216 : vector<2x768xf32>
    %218 = vector.extract_strided_slice %200 {offsets = [0, 3], sizes = [2, 1], strides = [1, 1]} : vector<2x4xf32> to vector<2x1xf32>
    %219 = vector.extract_strided_slice %198 {offsets = [3, 0], sizes = [1, 768], strides = [1, 1]} : vector<4x768xf32> to vector<1x768xf32>
    %220 = vector.broadcast %218 : vector<2x1xf32> to vector<2x768xf32>
    %221 = vector.broadcast %219 : vector<1x768xf32> to vector<2x768xf32>
    %222 = arith.mulf %220, %221 : vector<2x768xf32>
    %223 = arith.addf %217, %222 : vector<2x768xf32>
    %224 = arith.addf %197, %223 : vector<2x768xf32>
    %c749_i32 = arith.constant 749 : i32
    %225 = tpu.dynamic_rotate %0 by %c749_i32 dim 1 : vector<4x768xf32>, i32 -> vector<4x768xf32>
    %c8 = arith.constant 8 : index
    %c0_22 = arith.constant 0 : index
    %c0_23 = arith.constant 0 : index
    %226 = vector.load %arg2[%c8, %c0_22, %c0_23] : memref<9x2x4xf32, #tpu.memory_space<vmem>>, vector<1x2x4xf32>
    %227 = vector.shape_cast %226 : vector<1x2x4xf32> to vector<2x4xf32>
    %228 = vector.extract_strided_slice %227 {offsets = [0, 0], sizes = [2, 1], strides = [1, 1]} : vector<2x4xf32> to vector<2x1xf32>
    %229 = vector.extract_strided_slice %225 {offsets = [0, 0], sizes = [1, 768], strides = [1, 1]} : vector<4x768xf32> to vector<1x768xf32>
    %230 = vector.broadcast %228 : vector<2x1xf32> to vector<2x768xf32>
    %231 = vector.broadcast %229 : vector<1x768xf32> to vector<2x768xf32>
    %232 = arith.mulf %230, %231 : vector<2x768xf32>
    %233 = vector.extract_strided_slice %227 {offsets = [0, 1], sizes = [2, 1], strides = [1, 1]} : vector<2x4xf32> to vector<2x1xf32>
    %234 = vector.extract_strided_slice %225 {offsets = [1, 0], sizes = [1, 768], strides = [1, 1]} : vector<4x768xf32> to vector<1x768xf32>
    %235 = vector.broadcast %233 : vector<2x1xf32> to vector<2x768xf32>
    %236 = vector.broadcast %234 : vector<1x768xf32> to vector<2x768xf32>
    %237 = arith.mulf %235, %236 : vector<2x768xf32>
    %238 = arith.addf %232, %237 : vector<2x768xf32>
    %239 = vector.extract_strided_slice %227 {offsets = [0, 2], sizes = [2, 1], strides = [1, 1]} : vector<2x4xf32> to vector<2x1xf32>
    %240 = vector.extract_strided_slice %225 {offsets = [2, 0], sizes = [1, 768], strides = [1, 1]} : vector<4x768xf32> to vector<1x768xf32>
    %241 = vector.broadcast %239 : vector<2x1xf32> to vector<2x768xf32>
    %242 = vector.broadcast %240 : vector<1x768xf32> to vector<2x768xf32>
    %243 = arith.mulf %241, %242 : vector<2x768xf32>
    %244 = arith.addf %238, %243 : vector<2x768xf32>
    %245 = vector.extract_strided_slice %227 {offsets = [0, 3], sizes = [2, 1], strides = [1, 1]} : vector<2x4xf32> to vector<2x1xf32>
    %246 = vector.extract_strided_slice %225 {offsets = [3, 0], sizes = [1, 768], strides = [1, 1]} : vector<4x768xf32> to vector<1x768xf32>
    %247 = vector.broadcast %245 : vector<2x1xf32> to vector<2x768xf32>
    %248 = vector.broadcast %246 : vector<1x768xf32> to vector<2x768xf32>
    %249 = arith.mulf %247, %248 : vector<2x768xf32>
    %250 = arith.addf %244, %249 : vector<2x768xf32>
    %251 = arith.addf %224, %250 : vector<2x768xf32>
    %252 = vector.broadcast %3 : vector<2x1xf32> to vector<2x768xf32>
    %253 = arith.addf %251, %252 : vector<2x768xf32>
    %254 = vector.broadcast %1 : vector<1x768xf32> to vector<2x768xf32>
    %255 = arith.mulf %253, %254 : vector<2x768xf32>
    %cst = arith.constant dense<0.000000e+00> : vector<2xf32>
    %256 = vector.multi_reduction <add>, %255, %cst [1] : vector<2x768xf32> to vector<2xf32>
    %257 = vector.shape_cast %256 : vector<2xf32> to vector<2x1xf32>
    %cst_24 = arith.constant 0.001953125 : f32
    %258 = vector.broadcast %cst_24 : f32 to vector<2x1xf32>
    %259 = arith.mulf %257, %258 : vector<2x1xf32>
    %260 = arith.mulf %255, %255 : vector<2x768xf32>
    %cst_25 = arith.constant dense<0.000000e+00> : vector<2xf32>
    %261 = vector.multi_reduction <add>, %260, %cst_25 [1] : vector<2x768xf32> to vector<2xf32>
    %262 = vector.shape_cast %261 : vector<2xf32> to vector<2x1xf32>
    %cst_26 = arith.constant 0.001953125 : f32
    %263 = vector.broadcast %cst_26 : f32 to vector<2x1xf32>
    %264 = arith.mulf %262, %263 : vector<2x1xf32>
    %265 = arith.mulf %259, %259 : vector<2x1xf32>
    %266 = arith.subf %264, %265 : vector<2x1xf32>
    %267 = vector.broadcast %259 : vector<2x1xf32> to vector<2x768xf32>
    %268 = arith.subf %253, %267 : vector<2x768xf32>
    %cst_27 = arith.constant 9.99999974E-6 : f32
    %269 = vector.broadcast %cst_27 : f32 to vector<2x1xf32>
    %270 = arith.addf %266, %269 : vector<2x1xf32>
    %271 = math.rsqrt %270 : vector<2x1xf32>
    %272 = vector.broadcast %271 : vector<2x1xf32> to vector<2x768xf32>
    %273 = arith.mulf %268, %272 : vector<2x768xf32>
    %274 = vector.broadcast %7 : vector<2x1xf32> to vector<2x768xf32>
    %275 = arith.mulf %273, %274 : vector<2x768xf32>
    %276 = vector.broadcast %8 : vector<2x1xf32> to vector<2x768xf32>
    %277 = arith.addf %275, %276 : vector<2x768xf32>
    %cst_28 = arith.constant 2.000000e-01 : f32
    %278 = vector.broadcast %cst_28 : f32 to vector<2x768xf32>
    %279 = arith.mulf %278, %277 : vector<2x768xf32>
    %280 = arith.maximumf %277, %279 : vector<2x768xf32>
    %281 = vector.broadcast %1 : vector<1x768xf32> to vector<2x768xf32>
    %282 = arith.mulf %280, %281 : vector<2x768xf32>
    %c0_29 = arith.constant 0 : index
    %c0_30 = arith.constant 0 : index
    %283 = vector.load %arg3[%c0_29, %c0_30] : memref<2x2xf32, #tpu.memory_space<vmem>>, vector<2x2xf32>
    %284 = vector.extract_strided_slice %283 {offsets = [0, 0], sizes = [2, 1], strides = [1, 1]} : vector<2x2xf32> to vector<2x1xf32>
    %285 = vector.extract_strided_slice %282 {offsets = [0, 0], sizes = [1, 768], strides = [1, 1]} : vector<2x768xf32> to vector<1x768xf32>
    %286 = vector.broadcast %284 : vector<2x1xf32> to vector<2x768xf32>
    %287 = vector.broadcast %285 : vector<1x768xf32> to vector<2x768xf32>
    %288 = arith.mulf %286, %287 : vector<2x768xf32>
    %289 = vector.extract_strided_slice %283 {offsets = [0, 1], sizes = [2, 1], strides = [1, 1]} : vector<2x2xf32> to vector<2x1xf32>
    %290 = vector.extract_strided_slice %282 {offsets = [1, 0], sizes = [1, 768], strides = [1, 1]} : vector<2x768xf32> to vector<1x768xf32>
    %291 = vector.broadcast %289 : vector<2x1xf32> to vector<2x768xf32>
    %292 = vector.broadcast %290 : vector<1x768xf32> to vector<2x768xf32>
    %293 = arith.mulf %291, %292 : vector<2x768xf32>
    %294 = arith.addf %288, %293 : vector<2x768xf32>
    %295 = vector.broadcast %4 : vector<2x1xf32> to vector<2x768xf32>
    %296 = arith.addf %294, %295 : vector<2x768xf32>
    %297 = vector.broadcast %1 : vector<1x768xf32> to vector<2x768xf32>
    %298 = arith.mulf %296, %297 : vector<2x768xf32>
    %cst_31 = arith.constant dense<0.000000e+00> : vector<2xf32>
    %299 = vector.multi_reduction <add>, %298, %cst_31 [1] : vector<2x768xf32> to vector<2xf32>
    %300 = vector.shape_cast %299 : vector<2xf32> to vector<2x1xf32>
    %cst_32 = arith.constant 0.001953125 : f32
    %301 = vector.broadcast %cst_32 : f32 to vector<2x1xf32>
    %302 = arith.mulf %300, %301 : vector<2x1xf32>
    %303 = arith.mulf %298, %298 : vector<2x768xf32>
    %cst_33 = arith.constant dense<0.000000e+00> : vector<2xf32>
    %304 = vector.multi_reduction <add>, %303, %cst_33 [1] : vector<2x768xf32> to vector<2xf32>
    %305 = vector.shape_cast %304 : vector<2xf32> to vector<2x1xf32>
    %cst_34 = arith.constant 0.001953125 : f32
    %306 = vector.broadcast %cst_34 : f32 to vector<2x1xf32>
    %307 = arith.mulf %305, %306 : vector<2x1xf32>
    %308 = arith.mulf %302, %302 : vector<2x1xf32>
    %309 = arith.subf %307, %308 : vector<2x1xf32>
    %310 = vector.broadcast %302 : vector<2x1xf32> to vector<2x768xf32>
    %311 = arith.subf %296, %310 : vector<2x768xf32>
    %cst_35 = arith.constant 9.99999974E-6 : f32
    %312 = vector.broadcast %cst_35 : f32 to vector<2x1xf32>
    %313 = arith.addf %309, %312 : vector<2x1xf32>
    %314 = math.rsqrt %313 : vector<2x1xf32>
    %315 = vector.broadcast %314 : vector<2x1xf32> to vector<2x768xf32>
    %316 = arith.mulf %311, %315 : vector<2x768xf32>
    %317 = vector.broadcast %7 : vector<2x1xf32> to vector<2x768xf32>
    %318 = arith.mulf %316, %317 : vector<2x768xf32>
    %319 = vector.broadcast %8 : vector<2x1xf32> to vector<2x768xf32>
    %320 = arith.addf %318, %319 : vector<2x768xf32>
    %cst_36 = arith.constant 2.000000e-01 : f32
    %321 = vector.broadcast %cst_36 : f32 to vector<2x768xf32>
    %322 = arith.mulf %321, %320 : vector<2x768xf32>
    %323 = arith.maximumf %320, %322 : vector<2x768xf32>
    %324 = vector.broadcast %1 : vector<1x768xf32> to vector<2x768xf32>
    %325 = arith.mulf %323, %324 : vector<2x768xf32>
    %c0_37 = arith.constant 0 : index
    %c0_38 = arith.constant 0 : index
    %326 = vector.load %arg4[%c0_37, %c0_38] : memref<2x2xf32, #tpu.memory_space<vmem>>, vector<2x2xf32>
    %327 = vector.extract_strided_slice %326 {offsets = [0, 0], sizes = [2, 1], strides = [1, 1]} : vector<2x2xf32> to vector<2x1xf32>
    %328 = vector.extract_strided_slice %325 {offsets = [0, 0], sizes = [1, 768], strides = [1, 1]} : vector<2x768xf32> to vector<1x768xf32>
    %329 = vector.broadcast %327 : vector<2x1xf32> to vector<2x768xf32>
    %330 = vector.broadcast %328 : vector<1x768xf32> to vector<2x768xf32>
    %331 = arith.mulf %329, %330 : vector<2x768xf32>
    %332 = vector.extract_strided_slice %326 {offsets = [0, 1], sizes = [2, 1], strides = [1, 1]} : vector<2x2xf32> to vector<2x1xf32>
    %333 = vector.extract_strided_slice %325 {offsets = [1, 0], sizes = [1, 768], strides = [1, 1]} : vector<2x768xf32> to vector<1x768xf32>
    %334 = vector.broadcast %332 : vector<2x1xf32> to vector<2x768xf32>
    %335 = vector.broadcast %333 : vector<1x768xf32> to vector<2x768xf32>
    %336 = arith.mulf %334, %335 : vector<2x768xf32>
    %337 = arith.addf %331, %336 : vector<2x768xf32>
    %338 = vector.broadcast %5 : vector<2x1xf32> to vector<2x768xf32>
    %339 = arith.addf %337, %338 : vector<2x768xf32>
    %340 = vector.broadcast %1 : vector<1x768xf32> to vector<2x768xf32>
    %341 = arith.mulf %339, %340 : vector<2x768xf32>
    %cst_39 = arith.constant dense<0.000000e+00> : vector<2xf32>
    %342 = vector.multi_reduction <add>, %341, %cst_39 [1] : vector<2x768xf32> to vector<2xf32>
    %343 = vector.shape_cast %342 : vector<2xf32> to vector<2x1xf32>
    %cst_40 = arith.constant 0.001953125 : f32
    %344 = vector.broadcast %cst_40 : f32 to vector<2x1xf32>
    %345 = arith.mulf %343, %344 : vector<2x1xf32>
    %346 = arith.mulf %341, %341 : vector<2x768xf32>
    %cst_41 = arith.constant dense<0.000000e+00> : vector<2xf32>
    %347 = vector.multi_reduction <add>, %346, %cst_41 [1] : vector<2x768xf32> to vector<2xf32>
    %348 = vector.shape_cast %347 : vector<2xf32> to vector<2x1xf32>
    %cst_42 = arith.constant 0.001953125 : f32
    %349 = vector.broadcast %cst_42 : f32 to vector<2x1xf32>
    %350 = arith.mulf %348, %349 : vector<2x1xf32>
    %351 = arith.mulf %345, %345 : vector<2x1xf32>
    %352 = arith.subf %350, %351 : vector<2x1xf32>
    %353 = vector.broadcast %345 : vector<2x1xf32> to vector<2x768xf32>
    %354 = arith.subf %339, %353 : vector<2x768xf32>
    %cst_43 = arith.constant 9.99999974E-6 : f32
    %355 = vector.broadcast %cst_43 : f32 to vector<2x1xf32>
    %356 = arith.addf %352, %355 : vector<2x1xf32>
    %357 = math.rsqrt %356 : vector<2x1xf32>
    %358 = vector.broadcast %357 : vector<2x1xf32> to vector<2x768xf32>
    %359 = arith.mulf %354, %358 : vector<2x768xf32>
    %360 = vector.broadcast %7 : vector<2x1xf32> to vector<2x768xf32>
    %361 = arith.mulf %359, %360 : vector<2x768xf32>
    %362 = vector.broadcast %8 : vector<2x1xf32> to vector<2x768xf32>
    %363 = arith.addf %361, %362 : vector<2x768xf32>
    %cst_44 = arith.constant 2.000000e-01 : f32
    %364 = vector.broadcast %cst_44 : f32 to vector<2x768xf32>
    %365 = arith.mulf %364, %363 : vector<2x768xf32>
    %366 = arith.maximumf %363, %365 : vector<2x768xf32>
    %367 = vector.broadcast %1 : vector<1x768xf32> to vector<2x768xf32>
    %368 = arith.mulf %366, %367 : vector<2x768xf32>
    %369 = arith.addf %282, %368 : vector<2x768xf32>
    %c19_i32_45 = arith.constant 19 : i32
    %370 = tpu.dynamic_rotate %369 by %c19_i32_45 dim 1 : vector<2x768xf32>, i32 -> vector<2x768xf32>
    %c0_46 = arith.constant 0 : index
    %c0_47 = arith.constant 0 : index
    %c0_48 = arith.constant 0 : index
    %371 = vector.load %arg5[%c0_46, %c0_47, %c0_48] : memref<9x4x2xf32, #tpu.memory_space<vmem>>, vector<1x4x2xf32>
    %372 = vector.shape_cast %371 : vector<1x4x2xf32> to vector<4x2xf32>
    %373 = vector.extract_strided_slice %372 {offsets = [0, 0], sizes = [4, 1], strides = [1, 1]} : vector<4x2xf32> to vector<4x1xf32>
    %374 = vector.extract_strided_slice %370 {offsets = [0, 0], sizes = [1, 768], strides = [1, 1]} : vector<2x768xf32> to vector<1x768xf32>
    %375 = vector.broadcast %373 : vector<4x1xf32> to vector<4x768xf32>
    %376 = vector.broadcast %374 : vector<1x768xf32> to vector<4x768xf32>
    %377 = arith.mulf %375, %376 : vector<4x768xf32>
    %378 = vector.extract_strided_slice %372 {offsets = [0, 1], sizes = [4, 1], strides = [1, 1]} : vector<4x2xf32> to vector<4x1xf32>
    %379 = vector.extract_strided_slice %370 {offsets = [1, 0], sizes = [1, 768], strides = [1, 1]} : vector<2x768xf32> to vector<1x768xf32>
    %380 = vector.broadcast %378 : vector<4x1xf32> to vector<4x768xf32>
    %381 = vector.broadcast %379 : vector<1x768xf32> to vector<4x768xf32>
    %382 = arith.mulf %380, %381 : vector<4x768xf32>
    %383 = arith.addf %377, %382 : vector<4x768xf32>
    %c18_i32_49 = arith.constant 18 : i32
    %384 = tpu.dynamic_rotate %369 by %c18_i32_49 dim 1 : vector<2x768xf32>, i32 -> vector<2x768xf32>
    %c1_50 = arith.constant 1 : index
    %c0_51 = arith.constant 0 : index
    %c0_52 = arith.constant 0 : index
    %385 = vector.load %arg5[%c1_50, %c0_51, %c0_52] : memref<9x4x2xf32, #tpu.memory_space<vmem>>, vector<1x4x2xf32>
    %386 = vector.shape_cast %385 : vector<1x4x2xf32> to vector<4x2xf32>
    %387 = vector.extract_strided_slice %386 {offsets = [0, 0], sizes = [4, 1], strides = [1, 1]} : vector<4x2xf32> to vector<4x1xf32>
    %388 = vector.extract_strided_slice %384 {offsets = [0, 0], sizes = [1, 768], strides = [1, 1]} : vector<2x768xf32> to vector<1x768xf32>
    %389 = vector.broadcast %387 : vector<4x1xf32> to vector<4x768xf32>
    %390 = vector.broadcast %388 : vector<1x768xf32> to vector<4x768xf32>
    %391 = arith.mulf %389, %390 : vector<4x768xf32>
    %392 = vector.extract_strided_slice %386 {offsets = [0, 1], sizes = [4, 1], strides = [1, 1]} : vector<4x2xf32> to vector<4x1xf32>
    %393 = vector.extract_strided_slice %384 {offsets = [1, 0], sizes = [1, 768], strides = [1, 1]} : vector<2x768xf32> to vector<1x768xf32>
    %394 = vector.broadcast %392 : vector<4x1xf32> to vector<4x768xf32>
    %395 = vector.broadcast %393 : vector<1x768xf32> to vector<4x768xf32>
    %396 = arith.mulf %394, %395 : vector<4x768xf32>
    %397 = arith.addf %391, %396 : vector<4x768xf32>
    %398 = arith.addf %383, %397 : vector<4x768xf32>
    %c17_i32_53 = arith.constant 17 : i32
    %399 = tpu.dynamic_rotate %369 by %c17_i32_53 dim 1 : vector<2x768xf32>, i32 -> vector<2x768xf32>
    %c2_54 = arith.constant 2 : index
    %c0_55 = arith.constant 0 : index
    %c0_56 = arith.constant 0 : index
    %400 = vector.load %arg5[%c2_54, %c0_55, %c0_56] : memref<9x4x2xf32, #tpu.memory_space<vmem>>, vector<1x4x2xf32>
    %401 = vector.shape_cast %400 : vector<1x4x2xf32> to vector<4x2xf32>
    %402 = vector.extract_strided_slice %401 {offsets = [0, 0], sizes = [4, 1], strides = [1, 1]} : vector<4x2xf32> to vector<4x1xf32>
    %403 = vector.extract_strided_slice %399 {offsets = [0, 0], sizes = [1, 768], strides = [1, 1]} : vector<2x768xf32> to vector<1x768xf32>
    %404 = vector.broadcast %402 : vector<4x1xf32> to vector<4x768xf32>
    %405 = vector.broadcast %403 : vector<1x768xf32> to vector<4x768xf32>
    %406 = arith.mulf %404, %405 : vector<4x768xf32>
    %407 = vector.extract_strided_slice %401 {offsets = [0, 1], sizes = [4, 1], strides = [1, 1]} : vector<4x2xf32> to vector<4x1xf32>
    %408 = vector.extract_strided_slice %399 {offsets = [1, 0], sizes = [1, 768], strides = [1, 1]} : vector<2x768xf32> to vector<1x768xf32>
    %409 = vector.broadcast %407 : vector<4x1xf32> to vector<4x768xf32>
    %410 = vector.broadcast %408 : vector<1x768xf32> to vector<4x768xf32>
    %411 = arith.mulf %409, %410 : vector<4x768xf32>
    %412 = arith.addf %406, %411 : vector<4x768xf32>
    %413 = arith.addf %398, %412 : vector<4x768xf32>
    %c1_i32_57 = arith.constant 1 : i32
    %414 = tpu.dynamic_rotate %369 by %c1_i32_57 dim 1 : vector<2x768xf32>, i32 -> vector<2x768xf32>
    %c3_58 = arith.constant 3 : index
    %c0_59 = arith.constant 0 : index
    %c0_60 = arith.constant 0 : index
    %415 = vector.load %arg5[%c3_58, %c0_59, %c0_60] : memref<9x4x2xf32, #tpu.memory_space<vmem>>, vector<1x4x2xf32>
    %416 = vector.shape_cast %415 : vector<1x4x2xf32> to vector<4x2xf32>
    %417 = vector.extract_strided_slice %416 {offsets = [0, 0], sizes = [4, 1], strides = [1, 1]} : vector<4x2xf32> to vector<4x1xf32>
    %418 = vector.extract_strided_slice %414 {offsets = [0, 0], sizes = [1, 768], strides = [1, 1]} : vector<2x768xf32> to vector<1x768xf32>
    %419 = vector.broadcast %417 : vector<4x1xf32> to vector<4x768xf32>
    %420 = vector.broadcast %418 : vector<1x768xf32> to vector<4x768xf32>
    %421 = arith.mulf %419, %420 : vector<4x768xf32>
    %422 = vector.extract_strided_slice %416 {offsets = [0, 1], sizes = [4, 1], strides = [1, 1]} : vector<4x2xf32> to vector<4x1xf32>
    %423 = vector.extract_strided_slice %414 {offsets = [1, 0], sizes = [1, 768], strides = [1, 1]} : vector<2x768xf32> to vector<1x768xf32>
    %424 = vector.broadcast %422 : vector<4x1xf32> to vector<4x768xf32>
    %425 = vector.broadcast %423 : vector<1x768xf32> to vector<4x768xf32>
    %426 = arith.mulf %424, %425 : vector<4x768xf32>
    %427 = arith.addf %421, %426 : vector<4x768xf32>
    %428 = arith.addf %413, %427 : vector<4x768xf32>
    %c4_61 = arith.constant 4 : index
    %c0_62 = arith.constant 0 : index
    %c0_63 = arith.constant 0 : index
    %429 = vector.load %arg5[%c4_61, %c0_62, %c0_63] : memref<9x4x2xf32, #tpu.memory_space<vmem>>, vector<1x4x2xf32>
    %430 = vector.shape_cast %429 : vector<1x4x2xf32> to vector<4x2xf32>
    %431 = vector.extract_strided_slice %430 {offsets = [0, 0], sizes = [4, 1], strides = [1, 1]} : vector<4x2xf32> to vector<4x1xf32>
    %432 = vector.extract_strided_slice %369 {offsets = [0, 0], sizes = [1, 768], strides = [1, 1]} : vector<2x768xf32> to vector<1x768xf32>
    %433 = vector.broadcast %431 : vector<4x1xf32> to vector<4x768xf32>
    %434 = vector.broadcast %432 : vector<1x768xf32> to vector<4x768xf32>
    %435 = arith.mulf %433, %434 : vector<4x768xf32>
    %436 = vector.extract_strided_slice %430 {offsets = [0, 1], sizes = [4, 1], strides = [1, 1]} : vector<4x2xf32> to vector<4x1xf32>
    %437 = vector.extract_strided_slice %369 {offsets = [1, 0], sizes = [1, 768], strides = [1, 1]} : vector<2x768xf32> to vector<1x768xf32>
    %438 = vector.broadcast %436 : vector<4x1xf32> to vector<4x768xf32>
    %439 = vector.broadcast %437 : vector<1x768xf32> to vector<4x768xf32>
    %440 = arith.mulf %438, %439 : vector<4x768xf32>
    %441 = arith.addf %435, %440 : vector<4x768xf32>
    %442 = arith.addf %428, %441 : vector<4x768xf32>
    %c767_i32_64 = arith.constant 767 : i32
    %443 = tpu.dynamic_rotate %369 by %c767_i32_64 dim 1 : vector<2x768xf32>, i32 -> vector<2x768xf32>
    %c5_65 = arith.constant 5 : index
    %c0_66 = arith.constant 0 : index
    %c0_67 = arith.constant 0 : index
    %444 = vector.load %arg5[%c5_65, %c0_66, %c0_67] : memref<9x4x2xf32, #tpu.memory_space<vmem>>, vector<1x4x2xf32>
    %445 = vector.shape_cast %444 : vector<1x4x2xf32> to vector<4x2xf32>
    %446 = vector.extract_strided_slice %445 {offsets = [0, 0], sizes = [4, 1], strides = [1, 1]} : vector<4x2xf32> to vector<4x1xf32>
    %447 = vector.extract_strided_slice %443 {offsets = [0, 0], sizes = [1, 768], strides = [1, 1]} : vector<2x768xf32> to vector<1x768xf32>
    %448 = vector.broadcast %446 : vector<4x1xf32> to vector<4x768xf32>
    %449 = vector.broadcast %447 : vector<1x768xf32> to vector<4x768xf32>
    %450 = arith.mulf %448, %449 : vector<4x768xf32>
    %451 = vector.extract_strided_slice %445 {offsets = [0, 1], sizes = [4, 1], strides = [1, 1]} : vector<4x2xf32> to vector<4x1xf32>
    %452 = vector.extract_strided_slice %443 {offsets = [1, 0], sizes = [1, 768], strides = [1, 1]} : vector<2x768xf32> to vector<1x768xf32>
    %453 = vector.broadcast %451 : vector<4x1xf32> to vector<4x768xf32>
    %454 = vector.broadcast %452 : vector<1x768xf32> to vector<4x768xf32>
    %455 = arith.mulf %453, %454 : vector<4x768xf32>
    %456 = arith.addf %450, %455 : vector<4x768xf32>
    %457 = arith.addf %442, %456 : vector<4x768xf32>
    %c751_i32_68 = arith.constant 751 : i32
    %458 = tpu.dynamic_rotate %369 by %c751_i32_68 dim 1 : vector<2x768xf32>, i32 -> vector<2x768xf32>
    %c6_69 = arith.constant 6 : index
    %c0_70 = arith.constant 0 : index
    %c0_71 = arith.constant 0 : index
    %459 = vector.load %arg5[%c6_69, %c0_70, %c0_71] : memref<9x4x2xf32, #tpu.memory_space<vmem>>, vector<1x4x2xf32>
    %460 = vector.shape_cast %459 : vector<1x4x2xf32> to vector<4x2xf32>
    %461 = vector.extract_strided_slice %460 {offsets = [0, 0], sizes = [4, 1], strides = [1, 1]} : vector<4x2xf32> to vector<4x1xf32>
    %462 = vector.extract_strided_slice %458 {offsets = [0, 0], sizes = [1, 768], strides = [1, 1]} : vector<2x768xf32> to vector<1x768xf32>
    %463 = vector.broadcast %461 : vector<4x1xf32> to vector<4x768xf32>
    %464 = vector.broadcast %462 : vector<1x768xf32> to vector<4x768xf32>
    %465 = arith.mulf %463, %464 : vector<4x768xf32>
    %466 = vector.extract_strided_slice %460 {offsets = [0, 1], sizes = [4, 1], strides = [1, 1]} : vector<4x2xf32> to vector<4x1xf32>
    %467 = vector.extract_strided_slice %458 {offsets = [1, 0], sizes = [1, 768], strides = [1, 1]} : vector<2x768xf32> to vector<1x768xf32>
    %468 = vector.broadcast %466 : vector<4x1xf32> to vector<4x768xf32>
    %469 = vector.broadcast %467 : vector<1x768xf32> to vector<4x768xf32>
    %470 = arith.mulf %468, %469 : vector<4x768xf32>
    %471 = arith.addf %465, %470 : vector<4x768xf32>
    %472 = arith.addf %457, %471 : vector<4x768xf32>
    %c750_i32_72 = arith.constant 750 : i32
    %473 = tpu.dynamic_rotate %369 by %c750_i32_72 dim 1 : vector<2x768xf32>, i32 -> vector<2x768xf32>
    %c7_73 = arith.constant 7 : index
    %c0_74 = arith.constant 0 : index
    %c0_75 = arith.constant 0 : index
    %474 = vector.load %arg5[%c7_73, %c0_74, %c0_75] : memref<9x4x2xf32, #tpu.memory_space<vmem>>, vector<1x4x2xf32>
    %475 = vector.shape_cast %474 : vector<1x4x2xf32> to vector<4x2xf32>
    %476 = vector.extract_strided_slice %475 {offsets = [0, 0], sizes = [4, 1], strides = [1, 1]} : vector<4x2xf32> to vector<4x1xf32>
    %477 = vector.extract_strided_slice %473 {offsets = [0, 0], sizes = [1, 768], strides = [1, 1]} : vector<2x768xf32> to vector<1x768xf32>
    %478 = vector.broadcast %476 : vector<4x1xf32> to vector<4x768xf32>
    %479 = vector.broadcast %477 : vector<1x768xf32> to vector<4x768xf32>
    %480 = arith.mulf %478, %479 : vector<4x768xf32>
    %481 = vector.extract_strided_slice %475 {offsets = [0, 1], sizes = [4, 1], strides = [1, 1]} : vector<4x2xf32> to vector<4x1xf32>
    %482 = vector.extract_strided_slice %473 {offsets = [1, 0], sizes = [1, 768], strides = [1, 1]} : vector<2x768xf32> to vector<1x768xf32>
    %483 = vector.broadcast %481 : vector<4x1xf32> to vector<4x768xf32>
    %484 = vector.broadcast %482 : vector<1x768xf32> to vector<4x768xf32>
    %485 = arith.mulf %483, %484 : vector<4x768xf32>
    %486 = arith.addf %480, %485 : vector<4x768xf32>
    %487 = arith.addf %472, %486 : vector<4x768xf32>
    %c749_i32_76 = arith.constant 749 : i32
    %488 = tpu.dynamic_rotate %369 by %c749_i32_76 dim 1 : vector<2x768xf32>, i32 -> vector<2x768xf32>
    %c8_77 = arith.constant 8 : index
    %c0_78 = arith.constant 0 : index
    %c0_79 = arith.constant 0 : index
    %489 = vector.load %arg5[%c8_77, %c0_78, %c0_79] : memref<9x4x2xf32, #tpu.memory_space<vmem>>, vector<1x4x2xf32>
    %490 = vector.shape_cast %489 : vector<1x4x2xf32> to vector<4x2xf32>
    %491 = vector.extract_strided_slice %490 {offsets = [0, 0], sizes = [4, 1], strides = [1, 1]} : vector<4x2xf32> to vector<4x1xf32>
    %492 = vector.extract_strided_slice %488 {offsets = [0, 0], sizes = [1, 768], strides = [1, 1]} : vector<2x768xf32> to vector<1x768xf32>
    %493 = vector.broadcast %491 : vector<4x1xf32> to vector<4x768xf32>
    %494 = vector.broadcast %492 : vector<1x768xf32> to vector<4x768xf32>
    %495 = arith.mulf %493, %494 : vector<4x768xf32>
    %496 = vector.extract_strided_slice %490 {offsets = [0, 1], sizes = [4, 1], strides = [1, 1]} : vector<4x2xf32> to vector<4x1xf32>
    %497 = vector.extract_strided_slice %488 {offsets = [1, 0], sizes = [1, 768], strides = [1, 1]} : vector<2x768xf32> to vector<1x768xf32>
    %498 = vector.broadcast %496 : vector<4x1xf32> to vector<4x768xf32>
    %499 = vector.broadcast %497 : vector<1x768xf32> to vector<4x768xf32>
    %500 = arith.mulf %498, %499 : vector<4x768xf32>
    %501 = arith.addf %495, %500 : vector<4x768xf32>
    %502 = arith.addf %487, %501 : vector<4x768xf32>
    %503 = vector.broadcast %6 : vector<4x1xf32> to vector<4x768xf32>
    %504 = arith.addf %502, %503 : vector<4x768xf32>
    %505 = vector.broadcast %1 : vector<1x768xf32> to vector<4x768xf32>
    %506 = arith.mulf %504, %505 : vector<4x768xf32>
    %cst_80 = arith.constant dense<0.000000e+00> : vector<4xf32>
    %507 = vector.multi_reduction <add>, %506, %cst_80 [1] : vector<4x768xf32> to vector<4xf32>
    %508 = vector.shape_cast %507 : vector<4xf32> to vector<4x1xf32>
    %cst_81 = arith.constant 0.001953125 : f32
    %509 = vector.broadcast %cst_81 : f32 to vector<4x1xf32>
    %510 = arith.mulf %508, %509 : vector<4x1xf32>
    %511 = arith.mulf %506, %506 : vector<4x768xf32>
    %cst_82 = arith.constant dense<0.000000e+00> : vector<4xf32>
    %512 = vector.multi_reduction <add>, %511, %cst_82 [1] : vector<4x768xf32> to vector<4xf32>
    %513 = vector.shape_cast %512 : vector<4xf32> to vector<4x1xf32>
    %cst_83 = arith.constant 0.001953125 : f32
    %514 = vector.broadcast %cst_83 : f32 to vector<4x1xf32>
    %515 = arith.mulf %513, %514 : vector<4x1xf32>
    %516 = arith.mulf %510, %510 : vector<4x1xf32>
    %517 = arith.subf %515, %516 : vector<4x1xf32>
    %518 = vector.broadcast %510 : vector<4x1xf32> to vector<4x768xf32>
    %519 = arith.subf %504, %518 : vector<4x768xf32>
    %cst_84 = arith.constant 9.99999974E-6 : f32
    %520 = vector.broadcast %cst_84 : f32 to vector<4x1xf32>
    %521 = arith.addf %517, %520 : vector<4x1xf32>
    %522 = math.rsqrt %521 : vector<4x1xf32>
    %523 = vector.broadcast %522 : vector<4x1xf32> to vector<4x768xf32>
    %524 = arith.mulf %519, %523 : vector<4x768xf32>
    %525 = vector.broadcast %9 : vector<4x1xf32> to vector<4x768xf32>
    %526 = arith.mulf %524, %525 : vector<4x768xf32>
    %527 = vector.broadcast %10 : vector<4x1xf32> to vector<4x768xf32>
    %528 = arith.addf %526, %527 : vector<4x768xf32>
    %cst_85 = arith.constant 2.000000e-01 : f32
    %529 = vector.broadcast %cst_85 : f32 to vector<4x768xf32>
    %530 = arith.mulf %529, %528 : vector<4x768xf32>
    %531 = arith.maximumf %528, %530 : vector<4x768xf32>
    %532 = vector.broadcast %1 : vector<1x768xf32> to vector<4x768xf32>
    %533 = arith.mulf %531, %532 : vector<4x768xf32>
    %534 = arith.addf %0, %533 : vector<4x768xf32>
    %c0_86 = arith.constant 0 : index
    %c0_87 = arith.constant 0 : index
    %535 = vector.load %arg7[%c0_86, %c0_87] : memref<4x768xf32, #tpu.memory_space<vmem>>, vector<4x768xf32>
    tpu.vector_store %arg7[%c0_86, %c0_87], %534 {strides = array<i32>} : memref<4x768xf32, #tpu.memory_space<vmem>>, vector<4x768xf32>,
    return
  }
}

</mosaic_0001>

<bundles_post_ra>
// kernel: rirb_forward.1
= control target key start
LH: loop header
LB: loop body
LE: loop exit
PB: predicated region body
PF: predicated region fallthrough
CT: control target
= control target key end

     0   :  { %v5946_v0 = vmov 1   ;;  %v5940_v1 = vmov 0   ;;  %s3369_s30 = smov 19   ;;  %v5944_v6 = vmov 2   ;;  %s3371_s10 = smov 18   ;;  %v5942_v12 = vmov 3   ;;  %s5932_s2 = inlined_call_operand.vmem [shape: f32[9,2,4], index: 2, kind: input, shape index: {}]   ;;  %s5933_s0 = inlined_call_operand.vmem [shape: f32[4,768], index: 0, kind: input, shape index: {}]   ;;  %s5934_s1 = inlined_call_operand.vmem [shape: f32[1,768], index: 1, kind: input, shape index: {}]   ;;  %s5935_s6 = inlined_call_operand.vmem [shape: f32[4,8], index: 6, kind: input, shape index: {}]   ;;  %s5936_s3 = inlined_call_operand.vmem [shape: f32[2,2], index: 3, kind: input, shape index: {}]   ;;  %s5937_s4 = inlined_call_operand.vmem [shape: f32[2,2], index: 4, kind: input, shape index: {}]   ;;  %s5938_s5 = inlined_call_operand.vmem [shape: f32[9,4,2], index: 5, kind: input, shape index: {}]   ;;  %s5939_s7 = inlined_call_operand.vmem [shape: f32[4,768], index: 7, kind: output, shape index: {}]  }
   0x1   :  { %3304 = vset.pattern.permute.xlu0 %v5946_v0  ;;  %3305 = vset.pattern.permute.xlu1 %v5940_v1  ;;  %v3272_v2 = vld [vmem:[%s5932_s2 + $0x2] sm:$0x3]  ;;  %v3431_v3 = vld [vmem:[%s5932_s2] sm:$0x3]  ;;  %v3450_v7 = vld [vmem:[%s5933_s0 + $0x10] sm:$0xff]  ;;  %s3372_s11 = smov 17   ;;  %v52_v27 = vlaneseq }
   0x2   :  { %v3436_v4 = vld [vmem:[%s5933_s0] sm:$0xff]  ;;  %240 = vperm.xlu1 %3305, %v3272_v2   ;;  %98 = vperm.xlu0 %3304, %v3431_v3   ;;  %v3455_v8 = vcombine.high %v3450_v7, %v3450_v7  ;;  %v3471_v9 = vld [vmem:[%s5933_s0 + $0x8] sm:$0xff]  ;;  %s3373_s16 = smov 1   ;;  %s3375_s21 = smov 127   ;;  %v3554_v18 = vld [vmem:[%s5932_s2 + $0x10] sm:$0x3] }
   0x3   :  { %v3441_v5 = vcombine.high %v3436_v4, %v3436_v4  ;;  %v3477_v10 = vcombine.high %v3471_v9, %v3471_v9  ;;  %v3273_v11 = vld [vmem:[%s5932_s2 + $0x4] sm:$0x3]  ;;  %v3275_v13 = vld [vmem:[%s5932_s2 + $0x8] sm:$0x3]  ;;  %v3274_v14 = vld [vmem:[%s5932_s2 + $0x6] sm:$0x3] }
   0x4   :  { %v3277_v15 = vld [vmem:[%s5932_s2 + $0xc] sm:$0x3]  ;;  %s3376_s24 = smov 111   ;;  %v3536_v16 = vld [vmem:[%s5932_s2 + $0xe] sm:$0x3]  ;;  %s3377_s27 = smov 110  }
   0x5   :  { %v3276_v17 = vld [vmem:[%s5932_s2 + $0xa] sm:$0x3]  ;;  %s3378_s2 = smov 109   ;;  %v68_v30 = vshrl.u32 %v52_v27, 7  ;;  %v3614_v33 = vand.u32 127, %v52_v27  ;;  %vm1822_vm8 = vcmask 1041408  }
   0x6   :  { %3306 = vset.pattern.permute.xlu1 %v5946_v0  ;;  %42 = vrot.lane.b32.xlu0 %v3441_v5, %s3369_s30  ;;  %vm3161_vm9 = vcmask 1043456  }
   0x7   :  { %274 = vperm.xlu1 %3306, %v3272_v2   ;;  %3307 = vset.pattern.permute.xlu0 %v5944_v6  ;;  %v3616_v34 = vsub.s32 2, %v68_v30  ;;  %v910_v35 = vsub.s32 6, %v68_v30  ;;  %v3626_v39 = vsub.s32 0, %v68_v30  ;;  %v776_v42 = vsub.s32 4, %v68_v30 }
   0x8   :  { %vm54_vm0 = vcmp.lt.s32.totalorder %v3614_v33, 19  ;;  %v3634_v43 = vsub.s32 1, %v68_v30  ;;  %v3645_v50 = vsub.s32 3, %v68_v30  ;;  %vm229_vm1 = vcmp.lt.s32.totalorder %v3614_v33, 18 }
   0x9   :  { %v907_v38 = vrot.slane %v3436_v4, %v3616_v34  ;;  %v915_v40 = vrot.slane %v3471_v9, %v3616_v34  ;;  %v923_v41 = vrot.slane %v3450_v7, %v3616_v34  ;;  %v911_v44 = vrot.slane %v3436_v4, %v910_v35 }
   0xa   :  { %138 = vperm.xlu0 %3307, %v3431_v3   ;;  %v919_v46 = vrot.slane %v3471_v9, %v910_v35  ;;  %v927_v47 = vrot.slane %v3450_v7, %v910_v35  ;;  %v773_v48 = vrot.slane %v3436_v4, %v3626_v39  ;;  %v781_v49 = vrot.slane %v3471_v9, %v3626_v39 }
   0xb   :  { %40 = vrot.lane.b32.xlu1 %v3436_v4, %s3369_s30  ;;  %v3651_v51 = vrot.slane %v907_v38, %v3616_v34  ;;  %v789_v52 = vrot.slane %v3450_v7, %v3626_v39  ;;  %v3658_v54 = vrot.slane %v915_v40, %v3616_v34  ;;  %v3661_v55 = vrot.slane %v923_v41, %v3616_v34 }
   0xc   :  { %3308 = vset.pattern.permute.xlu1 %v5944_v6  ;;  %v777_v56 = vrot.slane %v3436_v4, %v776_v42  ;;  %v3664_v57 = vsub.s32 5, %v68_v30  ;;  %v3667_v58 = vrot.slane %v911_v44, %v3616_v34  ;;  %v785_v59 = vrot.slane %v3471_v9, %v776_v42 }
   0xd   :  { %v793_v60 = vrot.slane %v3450_v7, %v776_v42  ;;  %v837_v61 = vrot.slane %v3436_v4, %v3634_v43  ;;  %v3676_v63 = vrot.slane %v919_v46, %v3616_v34  ;;  %v980_v27 = vsub.s32 7, %v68_v30 }
   0xe   :  { %227 = vrot.lane.b32.xlu0 %v3455_v8, %s3371_s10  ;;  %6000 = vst [vmem:[#allocation5_spill] sm:$0xff] %v3664_v57  ;;  %v3704_v38 = vrot.slane %v777_v56, %v3626_v39  ;;  %v841_v41 = vrot.slane %v3436_v4, %v3664_v57  ;;  %v849_v44 = vrot.slane %v3471_v9, %v3664_v57  ;;  %vm411_vm2 = vcmp.lt.s32.totalorder %v3614_v33, 17 }
   0xf   :  { %50 = vrot.lane.b32.xlu1 %v3455_v8, %s3369_s30  ;;  %v3715_v46 = vrot.slane %v785_v59, %v3626_v39  ;;  %v3718_v30 = vrot.slane %v793_v60, %v3626_v39  ;;  %v985_v56 = vrot.slane %v3471_v9, %v3645_v50  ;;  %v993_v59 = vrot.slane %v3450_v7, %v3645_v50 }
  0x10   :  { %6005 = vst [vmem:[#allocation10_spill] sm:$0xff] %v3704_v38  ;;  %vm593_vm3 = vcmp.lt.s32.totalorder %v3614_v33, 1  ;;  %vm1058_vm4 = vcmp.lt.s32.totalorder %v3614_v33, 127  ;;  %vm1240_vm5 = vcmp.lt.s32.totalorder %v3614_v33, 111  ;;  %vm1604_vm6 = vcmp.lt.s32.totalorder %v3614_v33, 109 }
  0x11   :  { %6007 = vst [vmem:[#allocation12_spill] sm:$0xff] %v3715_v46  ;;  %6008 = vst [vmem:[#allocation13_spill] sm:$0xff] %v3718_v30  ;;  %vm1422_vm7 = vcmp.lt.s32.totalorder %v3614_v33, 110 }
  0x12   :  { %399 = vrot.lane.b32.xlu0 %v3436_v4, %s3372_s11 }
  0x13   :  { %217 = vrot.lane.b32.xlu1 %v3436_v4, %s3371_s10 }
  0x16   :  { %409 = vrot.lane.b32.xlu0 %v3455_v8, %s3372_s11 }
  0x17   :  { %219 = vrot.lane.b32.xlu1 %v3441_v5, %s3371_s10 }
  0x1a   :  { %223 = vrot.lane.b32.xlu0 %v3477_v10, %s3371_s10 }
  0x1b   :  { %314 = vperm.xlu1 %3308, %v3272_v2  }
  0x1e   :  { %591 = vrot.lane.b32.xlu0 %v3455_v8, %s3373_s16 }
  0x1f   :  { %3309 = vset.pattern.permute.xlu1 %v5946_v0 }
  0x20   :  { %456 = vperm.xlu1 %3309, %v3273_v11  }
  0x22   :  { %225 = vrot.lane.b32.xlu0 %v3450_v7, %s3371_s10 }
  0x24   :  { %44 = vrot.lane.b32.xlu1 %v3471_v9, %s3369_s30 }
  0x25   :  { %3310 = vset.pattern.permute.xlu1 %v5942_v12 }
  0x26   :  { %585 = vrot.lane.b32.xlu0 %v3471_v9, %s3373_s16 }
  0x28   :  { %221 = vrot.lane.b32.xlu1 %v3471_v9, %s3371_s10 }
  0x2a   :  { %901 = vperm.xlu0 %3307, %v3275_v13  }
  0x2c   :  { %354 = vperm.xlu1 %3310, %v3272_v2   ;;  %v3679_v2 = vrot.slane %v927_v47, %v3616_v34  ;;  %v857_v47 = vrot.slane %v3450_v7, %v3664_v57 }
  0x2e   :  { %3316 = vset.pattern.permute.xlu0 %v5940_v1 }
  0x2f   :  { %64 = vperm.xlu0 %3316, %v3431_v3  }
  0x30   :  { %401 = vrot.lane.b32.xlu1 %v3441_v5, %s3372_s11 }
  0x31   :  { %3311 = vset.pattern.permute.xlu1 %v5944_v6 }
  0x33   :  { %422 = vperm.xlu0 %3316, %v3273_v11  }
  0x34   :  { %496 = vperm.xlu1 %3311, %v3273_v11  }
  0x37   :  { %604 = vperm.xlu0 %3316, %v3274_v14  }
  0x38   :  { %3312 = vset.pattern.permute.xlu1 %v5946_v0 }
  0x39   :  { %638 = vperm.xlu1 %3312, %v3274_v14  }
  0x3b   :  { %767 = vperm.xlu0 %3316, %v3275_v13  }
  0x3d   :  { %46 = vrot.lane.b32.xlu1 %v3477_v10, %s3369_s30 }
  0x3e   :  { %3313 = vset.pattern.permute.xlu1 %v5944_v6 }
  0x3f   :  { %407 = vrot.lane.b32.xlu0 %v3450_v7, %s3372_s11 }
  0x41   :  { %403 = vrot.lane.b32.xlu1 %v3471_v9, %s3372_s11 }
  0x43   :  { %1050 = vrot.lane.b32.xlu0 %v3471_v9, %s3375_s21 }
  0x45   :  { %581 = vrot.lane.b32.xlu1 %v3436_v4, %s3373_s16 }
  0x47   :  { %1251 = vperm.xlu0 %3316, %v3277_v15  }
  0x49   :  { %583 = vrot.lane.b32.xlu1 %v3441_v5, %s3373_s16 }
  0x4b   :  { %1052 = vrot.lane.b32.xlu0 %v3477_v10, %s3375_s21 }
  0x4d   :  { %678 = vperm.xlu1 %3313, %v3274_v14  }
  0x4f   :  { %1228 = vrot.lane.b32.xlu0 %v3436_v4, %s3376_s24 }
  0x51   :  { %3314 = vset.pattern.permute.xlu1 %v5946_v0 }
  0x52   :  { %831 = vperm.xlu1 %3314, %v3275_v13  }
  0x53   :  { %1232 = vrot.lane.b32.xlu0 %v3471_v9, %s3376_s24 }
  0x56   :  { %48 = vrot.lane.b32.xlu1 %v3450_v7, %s3369_s30 }
  0x57   :  { %1433 = vperm.xlu0 %3316, %v3536_v16   ;;  %3315 = vset.pattern.permute.xlu1 %v5942_v12 }
  0x5a   :  { %405 = vrot.lane.b32.xlu1 %v3477_v10, %s3372_s11 }
  0x5b   :  { %1054 = vrot.lane.b32.xlu0 %v3450_v7, %s3375_s21 }
  0x5e   :  { %718 = vperm.xlu1 %3315, %v3274_v14   ;;  %v3695_v14 = vrot.slane %v789_v52, %v3626_v39  ;;  %v977_v52 = vrot.slane %v3436_v4, %v3645_v50 }
  0x5f   :  { %1414 = vrot.lane.b32.xlu0 %v3471_v9, %s3377_s27 }
  0x60   :  { %6004 = vst [vmem:[#allocation9_spill] sm:$0xff] %v3695_v14 }
  0x62   :  { %3317 = vset.pattern.permute.xlu1 %v5940_v1  ;;  %v981_v1 = vrot.slane %v3436_v4, %v980_v27 }
  0x63   :  { %1069 = vperm.xlu1 %3317, %v3276_v17   ;;  %1615 = vperm.xlu0 %3316, %v3554_v18  }
  0x67   :  { %3318 = vset.pattern.permute.xlu1 %v5946_v0  ;;  %3325 = vset.pattern.permute.xlu0 %v5942_v12 }
  0x68   :  { %1103 = vperm.xlu1 %3318, %v3276_v17   ;;  %178 = vperm.xlu0 %3325, %v3431_v3   ;;  %v3682_v3 = vrot.slane %v773_v48, %v3626_v39 }
  0x6a   :  { %6001 = vst [vmem:[#allocation6_spill] sm:$0xff] %v3682_v3 }
  0x6c   :  { %587 = vrot.lane.b32.xlu1 %v3477_v10, %s3373_s16  ;;  %536 = vperm.xlu0 %3325, %v3273_v11   ;;  %v3685_v11 = vrot.slane %v781_v49, %v3626_v39 }
  0x6d   :  { %3319 = vset.pattern.permute.xlu1 %v5944_v6 }
  0x6e   :  { %6002 = vst [vmem:[#allocation7_spill] sm:$0xff] %v3685_v11 }
  0x70   :  { %1046 = vrot.lane.b32.xlu1 %v3436_v4, %s3375_s21  ;;  %971 = vperm.xlu0 %3325, %v3275_v13   ;;  %v3692_v13 = vld [vmem:[%s5934_s1] sm:$0x3f] }
  0x71   :  { %6003 = vst [vmem:[#allocation8_spill] sm:$0xff] %v3692_v13  ;;  %v3707_v40 = vrot.slane %v3692_v13, %v776_v42  ;;  %v3723_v42 = vrot.slane %v837_v61, %v3634_v43  ;;  %v3783_v13 = vrot.slane %v977_v52, %v3645_v50 }
  0x73   :  { %6006 = vst [vmem:[#allocation11_spill] sm:$0xff] %v3707_v40  ;;  %6009 = vst [vmem:[#allocation14_spill] sm:$0xff] %v3723_v42  ;;  %v3755_v40 = vrot.slane %v841_v41, %v3634_v43  ;;  %v3772_v41 = vrot.slane %v857_v47, %v3634_v43 }
  0x74   :  { %1048 = vrot.lane.b32.xlu1 %v3441_v5, %s3375_s21  ;;  %1365 = vperm.xlu0 %3325, %v3277_v15   ;;  %6016 = vst [vmem:[#allocation21_spill] sm:$0xff] %v3783_v13 }
  0x75   :  { %6013 = vst [vmem:[#allocation18_spill] sm:$0xff] %v3755_v40  ;;  %6015 = vst [vmem:[#allocation20_spill] sm:$0xff] %v3772_v41 }
  0x78   :  { %1143 = vperm.xlu1 %3319, %v3276_v17   ;;  %1236 = vrot.lane.b32.xlu0 %v3450_v7, %s3376_s24 }
  0x7c   :  { %3320 = vset.pattern.permute.xlu1 %v5946_v0  ;;  %1547 = vperm.xlu0 %3325, %v3536_v16  }
  0x7d   :  { %v3572_v19 = vpop.permute.xlu1 %240  ;;  %v3574_v20 = vpop.permute.xlu0 %98  ;;  %1285 = vperm.xlu1 %3320, %v3277_v15  }
  0x80   :  { %1596 = vrot.lane.b32.xlu0 %v3471_v9, %s3378_s2 }
  0x81   :  { %589 = vrot.lane.b32.xlu1 %v3450_v7, %s3373_s16  ;;  %v3580_v21 = vpop.permute.xlu0 %42 }
  0x82   :  { %v3582_v22 = vpop.permute.xlu1 %274  ;;  %3321 = vset.pattern.permute.xlu1 %v5942_v12  ;;  %v989_v12 = vrot.slane %v3471_v9, %v980_v27 }
  0x84   :  { %1238 = vrot.lane.b32.xlu0 %v3455_v8, %s3376_s24  ;;  %v3800_v52 = vrot.slane %v989_v12, %v3645_v50 }
  0x85   :  { %1183 = vperm.xlu1 %3321, %v3276_v17   ;;  %v3587_v23 = vpop.permute.xlu0 %138  ;;  %v853_v17 = vrot.slane %v3450_v7, %v3634_v43 }
  0x86   :  { %v3589_v24 = vpop.permute.xlu1 %40  ;;  %6021 = vst [vmem:[#allocation25_spill] sm:$0xff] %v3800_v52 }
  0x87   :  { %v3729_v48 = vsel %vm54_vm0, %v3589_v24, %v3580_v21  ;;  %v3744_v61 = vrot.slane %v853_v17, %v3634_v43 }
  0x88   :  { %1598 = vrot.lane.b32.xlu0 %v3477_v10, %s3378_s2  ;;  %v108_v17 = vrot.slane %v3729_v48, %v3634_v43 }
  0x89   :  { %1230 = vrot.lane.b32.xlu1 %v3441_v5, %s3376_s24  ;;  %v3595_v25 = vpop.permute.xlu0 %227  ;;  %6012 = vst [vmem:[#allocation17_spill] sm:$0xff] %v3744_v61  ;;  %v3786_v61 = vrot.slane %v985_v56, %v3645_v50 }
  0x8a   :  { %v3597_v26 = vpop.permute.xlu1 %50  ;;  %3322 = vset.pattern.permute.xlu1 %v5944_v6 }
  0x8b   :  { %5997 = vst [vmem:[#allocation2_spill] sm:$0xff] %v3597_v26  ;;  %6017 = vst [vmem:[#allocation22_spill] sm:$0xff] %v3786_v61 }
  0x8c   :  { %1420 = vrot.lane.b32.xlu0 %v3455_v8, %s3377_s27 }
  0x8d   :  { %1325 = vperm.xlu1 %3322, %v3277_v15   ;;  %v3602_v28 = vpop.permute.xlu0 %399  ;;  %v845_v15 = vrot.slane %v3471_v9, %v3634_v43  ;;  %v148_v9 = vrot.slane %v3729_v48, %v3616_v34 }
  0x8e   :  { %v3604_v29 = vpop.permute.xlu1 %217 }
  0x8f   :  { %v3741_v60 = vrot.slane %v845_v15, %v3634_v43  ;;  %v997_v15 = vrot.slane %v3450_v7, %v980_v27  ;;  %v3778_v27 = vsel %vm54_vm0, %v3597_v26, %v3589_v24  ;;  %v3797_v24 = vrot.slane %v981_v1, %v3645_v50 }
  0x90   :  { %1602 = vrot.lane.b32.xlu0 %v3455_v8, %s3378_s2  ;;  %v3815_v1 = vmul.f32 %v108_v17, %v3574_v20  ;;  %v3818_v12 = vmul.f32 %v148_v9, %v3587_v23  ;;  %v144_v13 = vrot.slane %v3778_v27, %v3616_v34 }
  0x91   :  { %3323 = vset.pattern.permute.xlu1 %v5946_v0  ;;  %v3609_v31 = vpop.permute.xlu0 %409  ;;  %6011 = vst [vmem:[#allocation16_spill] sm:$0xff] %v3741_v60  ;;  %6020 = vst [vmem:[#allocation24_spill] sm:$0xff] %v3797_v24  ;;  %v104_v24 = vrot.slane %v3778_v27, %v3634_v43 }
  0x92   :  { %5998 = vst [vmem:[#allocation3_spill] sm:$0xff] %v3609_v31  ;;  %1467 = vperm.xlu1 %3323, %v3536_v16   ;;  %v3612_v32 = vpop.permute.xlu1 %219  ;;  %6023 = vst [vmem:[#allocation27_spill] sm:$0xff] %v3818_v12 }
  0x93   :  { %v3769_v57 = vsel %vm229_vm1, %v3604_v29, %v3612_v32  ;;  %v3872_v30 = vmul.f32 %v104_v24, %v3574_v20 }
  0x94   :  { %v364_v14 = vrot.slane %v3769_v57, %v3645_v50 }
  0x95   :  { %v3618_v36 = vpop.permute.xlu0 %223 }
  0x96   :  { %1234 = vrot.lane.b32.xlu1 %v3477_v10, %s3376_s24  ;;  %v3622_v37 = vpop.permute.xlu1 %314 }
  0x97   :  { %3324 = vset.pattern.permute.xlu1 %v5944_v6  ;;  %v3752_v6 = vsel %vm229_vm1, %v3595_v25, %v3604_v29  ;;  %v3789_v29 = vrot.slane %v993_v59, %v3645_v50  ;;  %v250_v59 = vrot.slane %v3769_v57, %v3626_v39 }
  0x98   :  { %v246_v47 = vrot.slane %v3752_v6, %v3626_v39  ;;  %v280_v41 = vrot.slane %v3752_v6, %v3634_v43 }
  0x99   :  { %v3637_v45 = vpop.permute.xlu0 %591  ;;  %6018 = vst [vmem:[#allocation23_spill] sm:$0xff] %v3789_v29  ;;  %v284_v29 = vrot.slane %v3769_v57, %v3634_v43 }
  0x9a   :  { %5999 = vst [vmem:[#allocation4_spill] sm:$0xff] %v3637_v45  ;;  %1410 = vrot.lane.b32.xlu1 %v3436_v4, %s3377_s27  ;;  %v267_v56 = vmul.f32 %v246_v47, %v3572_v19  ;;  %v301_v52 = vmul.f32 %v280_v41, %v3582_v22  ;;  %v324_v47 = vrot.slane %v3769_v57, %v3616_v34 }
  0x9b   :  { %v3655_v53 = vpop.permute.xlu1 %456  ;;  %v302_v40 = vmul.f32 %v284_v29, %v3582_v22 }
  0x9c   :  { %v307_v46 = vadd.f32 %v301_v52, %v267_v56  ;;  %v342_v38 = vmul.f32 %v324_v47, %v3622_v37 }
  0x9d   :  { %v3673_v62 = vpop.permute.xlu0 %225 }
  0x9e   :  { %1412 = vrot.lane.b32.xlu1 %v3441_v5, %s3377_s27  ;;  %v3838_v17 = vsel %vm229_vm1, %v3618_v36, %v3673_v62 }
  0x9f   :  { %v3701_v35 = vpop.permute.xlu1 %44  ;;  %v262_v9 = vrot.slane %v3838_v17, %v3626_v39  ;;  %v296_v26 = vrot.slane %v3838_v17, %v3634_v43 }
  0xa1   :  { %v3731_v49 = vpop.permute.xlu0 %585 }
  0xa2   :  { %6010 = vst [vmem:[#allocation15_spill] sm:$0xff] %v3731_v49  ;;  %1507 = vperm.xlu1 %3324, %v3536_v16   ;;  %v3758_v16 = vrot.slane %v849_v44, %v3634_v43  ;;  %v336_v49 = vrot.slane %v3838_v17, %v3616_v34 }
  0xa3   :  { %v222_v0 = vpop.permute.xlu1 %221 }
  0xa4   :  { %6014 = vst [vmem:[#allocation19_spill] sm:$0xff] %v3758_v16  ;;  %v6019_v16 = vmov 1   ;;  %v3887_v24 = vsel %vm229_vm1, %v3612_v32, %v222_v0  ;;  %v3897_v52 = vsel %vm229_vm1, %v222_v0, %v3618_v36  ;;  %v271_v32 = vmul.f32 %v262_v9, %v3572_v19 }
  0xa5   :  { %v3780_v44 = vpop.permute.xlu0 %901  ;;  %v3913_v0 = vsel %vm54_vm0, %v3580_v21, %v3701_v35  ;;  %v288_v36 = vrot.slane %v3887_v24, %v3634_v43  ;;  %v258_v9 = vrot.slane %v3897_v52, %v3626_v39 }
  0xa6   :  { %3326 = vset.pattern.permute.xlu1 %v6019_v16  ;;  %v3812_v16 = vrot.slane %v997_v15, %v3645_v50  ;;  %v3832_v15 = vsel %vm229_vm1, %v3673_v62, %v3595_v25  ;;  %v3852_v25 = vsel %vm411_vm2, %v3609_v31, %v3602_v28  ;;  %v268_v62 = vmul.f32 %v250_v59, %v3572_v19 }
  0xa7   :  { %1649 = vperm.xlu1 %3326, %v3554_v18   ;;  %v3809_v61 = vpop.permute.xlu1 %354  ;;  %v266_v42 = vrot.slane %v3832_v15, %v3626_v39  ;;  %v300_v29 = vrot.slane %v3832_v15, %v3634_v43  ;;  %v6024_v59 = vmov 2   ;;  %v462_v45 = vrot.slane %v3852_v25, %v3634_v43 }
  0xa8   :  { %6022 = vst [vmem:[#allocation26_spill] sm:$0xff] %v3812_v16  ;;  %v320_v16 = vrot.slane %v3752_v6, %v3616_v34  ;;  %v340_v47 = vrot.slane %v3832_v15, %v3616_v34  ;;  %v345_v31 = vmul.f32 %v336_v49, %v3622_v37  ;;  %v328_v49 = vrot.slane %v3887_v24, %v3616_v34 }
  0xa9   :  { %v272_v56 = vmul.f32 %v266_v42, %v3572_v19 }
  0xaa   :  { %v3846_v60 = vpop.permute.xlu0 %64  ;;  %v341_v11 = vmul.f32 %v320_v16, %v3622_v37  ;;  %v346_v57 = vmul.f32 %v340_v47, %v3622_v37 }
  0xab   :  { %1056 = vrot.lane.b32.xlu1 %v3455_v8, %s3375_s21  ;;  %v3860_v41 = vpop.permute.xlu1 %401  ;;  %v3875_v8 = vmul.f32 %v144_v13, %v3587_v23  ;;  %v308_v13 = vadd.f32 %v302_v40, %v268_v62  ;;  %v305_v40 = vmul.f32 %v296_v26, %v3582_v22  ;;  %v306_v62 = vmul.f32 %v300_v29, %v3582_v22 }
  0xac   :  { %3327 = vset.pattern.permute.xlu1 %v6024_v59  ;;  %v292_v29 = vrot.slane %v3897_v52, %v3634_v43  ;;  %v3931_v3 = vadd.f32 %v341_v11, %v307_v46  ;;  %v3936_v26 = vmul.f32 %v462_v45, %v3655_v53  ;;  %v152_v11 = vrot.slane %v3913_v0, %v3616_v34 }
  0xad   :  { %6025 = vst [vmem:[#allocation28_spill] sm:$0xff] %v3875_v8  ;;  %v3933_v12 = vadd.f32 %v342_v38, %v308_v13  ;;  %v311_v42 = vadd.f32 %v305_v40, %v271_v32  ;;  %v312_v8 = vadd.f32 %v306_v62, %v272_v56  ;;  %v303_v38 = vmul.f32 %v288_v36, %v3582_v22 }
  0xae   :  { %v3889_v59 = vpop.permute.xlu0 %422  ;;  %v304_v46 = vmul.f32 %v292_v29, %v3582_v22  ;;  %v332_v13 = vrot.slane %v3897_v52, %v3616_v34  ;;  %v376_v56 = vrot.slane %v3838_v17, %v3645_v50  ;;  %v380_v40 = vrot.slane %v3832_v15, %v3645_v50 }
  0xaf   :  { %1416 = vrot.lane.b32.xlu1 %v3477_v10, %s3377_s27  ;;  %v3901_v16 = vpop.permute.xlu1 %496  ;;  %v254_v10 = vrot.slane %v3887_v24, %v3626_v39  ;;  %v78_v62 = vrot.slane %v3913_v0, %v3626_v39  ;;  %v351_v22 = vadd.f32 %v345_v31, %v311_v42  ;;  %v352_v47 = vadd.f32 %v346_v57, %v312_v8 }
  0xb0   :  { %6026 = vst [vmem:[#allocation29_spill] sm:$0xff] %v3901_v16  ;;  %v3973_v17 = vsel %vm411_vm2, %v3602_v28, %v3860_v41  ;;  %v3978_v36 = vmul.f32 %v152_v11, %v3587_v23  ;;  %v368_v29 = vrot.slane %v3887_v24, %v3645_v50  ;;  %v343_v8 = vmul.f32 %v328_v49, %v3622_v37 }
  0xb1   :  { %v269_v45 = vmul.f32 %v254_v10, %v3572_v19  ;;  %6029 = vst [vmem:[#allocation32_spill] sm:$0xff] %v3973_v17  ;;  %v344_v42 = vmul.f32 %v332_v13, %v3622_v37  ;;  %v3988_v28 = vmul.f32 %v3651_v51, %v3780_v44  ;;  %v3994_v57 = vmul.f32 %v3667_v58, %v3780_v44 }
  0xb2   :  { %v3927_v21 = vpop.permute.xlu0 %604  ;;  %v3998_v24 = vmul.f32 %v3658_v54, %v3780_v44  ;;  %v466_v37 = vrot.slane %v3973_v17, %v3634_v43  ;;  %v4007_v51 = vmul.f32 %v3676_v63, %v3780_v44  ;;  %v4011_v58 = vmul.f32 %v3661_v55, %v3780_v44 }
  0xb3   :  { %6027 = vst [vmem:[#allocation30_spill] sm:$0xff] %v3927_v21  ;;  %1592 = vrot.lane.b32.xlu1 %v3436_v4, %s3378_s2  ;;  %v112_v21 = vrot.slane %v3913_v0, %v3634_v43  ;;  %v270_v4 = vmul.f32 %v258_v9, %v3572_v19  ;;  %v309_v9 = vadd.f32 %v303_v38, %v269_v45 }
  0xb4   :  { %v3943_v16 = vpop.permute.xlu1 %638  ;;  %6030 = vst [vmem:[#allocation33_spill] sm:$0xff] %v4011_v58  ;;  %v6031_v54 = vrot.slane %v3752_v6, %v3645_v50  ;;  %v382_v45 = vmul.f32 %v364_v14, %v3809_v61  ;;  %v6033_v63 = vrot.slane %v3778_v27, %v3626_v39  ;;  %v6034_v49 = vrot.slane %v3729_v48, %v3626_v39 }
  0xb5   :  { %6028 = vst [vmem:[#allocation31_spill] sm:$0xff] %v3943_v16  ;;  %v127_v10 = vmul.f32 %v112_v21, %v3574_v20  ;;  %v310_v31 = vadd.f32 %v304_v46, %v270_v4  ;;  %v349_v4 = vadd.f32 %v343_v8, %v309_v9  ;;  %v4022_v46 = vmul.f32 %v3679_v2, %v3780_v44 }
  0xb6   :  { %v3956_v32 = vpop.permute.xlu0 %767  ;;  %v381_v11 = vmul.f32 %v6031_v54, %v3809_v61  ;;  %v91_v55 = vmul.f32 %v6033_v63, %v3846_v60  ;;  %v92_v6 = vmul.f32 %v6034_v49, %v3846_v60  ;;  %v383_v13 = vmul.f32 %v368_v29, %v3809_v61 }
  0xb7   :  { %1594 = vrot.lane.b32.xlu1 %v3441_v5, %s3378_s2  ;;  %v372_v5 = vrot.slane %v3897_v52, %v3645_v50  ;;  %v432_v52 = vrot.slane %v3973_v17, %v3626_v39  ;;  %6032 = vst [vmem:[#allocation34_spill] sm:$0xff] %v4022_v46  ;;  %v350_v14 = vadd.f32 %v344_v42, %v310_v31 }
  0xb8   :  { %v3975_v15 = vpop.permute.xlu1 %46  ;;  %v93_v9 = vmul.f32 %v78_v62, %v3846_v60  ;;  %v6035_v2 = vrot.slane %v3852_v25, %v3626_v39  ;;  %v484_v63 = vmul.f32 %v466_v37, %v3655_v53  ;;  %v506_v49 = vrot.slane %v3973_v17, %v3616_v34 }
  0xb9   :  { %v384_v54 = vmul.f32 %v372_v5, %v3809_v61  ;;  %v450_v31 = vmul.f32 %v432_v52, %v3889_v59  ;;  %v385_v62 = vmul.f32 %v376_v56, %v3809_v61  ;;  %v386_v29 = vmul.f32 %v380_v40, %v3809_v61 }
  0xba   :  { %v3990_v21 = vpop.permute.xlu0 %407  ;;  %v449_v44 = vmul.f32 %v6035_v2, %v3889_v59  ;;  %v4051_v42 = vadd.f32 %v381_v11, %v3931_v3  ;;  %v4054_v2 = vadd.f32 %v382_v45, %v3933_v12  ;;  %v6039_v37 = vmov 3   ;;  %v6041_v12 = vld [vmem:[#allocation29_spill] sm:$0xff]  ;;  %v6043_v45 = vld [vmem:[#allocation3_spill] sm:$0xff] }
  0xbb   :  { %1689 = vperm.xlu1 %3327, %v3554_v18   ;;  %v4057_v19 = vadd.f32 %v383_v13, %v349_v4  ;;  %v131_v52 = vadd.f32 %v3872_v30, %v91_v55  ;;  %v132_v46 = vadd.f32 %v3815_v1, %v92_v6  ;;  %v4065_v61 = vsel %vm54_vm0, %v3701_v35, %v3975_v15 }
  0xbc   :  { %v4018_v38 = vpop.permute.xlu1 %403  ;;  %6037 = vst [vmem:[#allocation36_spill] sm:$0xff] %v4051_v42  ;;  %6038 = vst [vmem:[#allocation37_spill] sm:$0xff] %v4054_v2  ;;  %v133_v3 = vadd.f32 %v127_v10, %v93_v9  ;;  %v489_v56 = vadd.f32 %v3936_v26, %v449_v44  ;;  %v6042_v40 = vrot.slane %v3852_v25, %v3616_v34 }
  0xbd   :  { %6040 = vst [vmem:[#allocation38_spill] sm:$0xff] %v4057_v19  ;;  %v4076_v30 = vsel %vm411_vm2, %v3990_v21, %v6043_v45  ;;  %v4080_v4 = vadd.f32 %v384_v54, %v350_v14  ;;  %v490_v35 = vadd.f32 %v484_v63, %v450_v31  ;;  %v524_v10 = vmul.f32 %v506_v49, %v6041_v12  ;;  %v6052_v49 = vld [vmem:[#allocation27_spill] sm:$0xff]  ;;  %v6067_v19 = vld [vmem:[#allocation13_spill] sm:$0xff] }
  0xbe   :  { %v4039_v8 = vpop.permute.xlu0 %1050  ;;  %v523_v11 = vmul.f32 %v6042_v40, %v6041_v12  ;;  %6044 = vst [vmem:[#allocation29_spill] sm:$0xff] %v4076_v30  ;;  %v4087_v26 = vsel %vm411_vm2, %v3860_v41, %v4018_v38  ;;  %v4090_v55 = vadd.f32 %v385_v62, %v351_v22  ;;  %v4092_v6 = vadd.f32 %v386_v29, %v352_v47  ;;  %v6050_v22 = vld [vmem:[#allocation28_spill] sm:$0xff]  ;;  %v6056_v40 = vld [vmem:[#allocation6_spill] sm:$0xff] }
  0xbf   :  { %6036 = vst [vmem:[#allocation35_spill] sm:$0xff] %v4039_v8  ;;  %1418 = vrot.lane.b32.xlu1 %v3450_v7, %s3377_s27  ;;  %6046 = vst [vmem:[#allocation39_spill] sm:$0xff] %v4080_v4  ;;  %v82_v14 = vrot.slane %v4065_v61, %v3626_v39  ;;  %v116_v44 = vrot.slane %v4065_v61, %v3634_v43  ;;  %v448_v41 = vrot.slane %v4076_v30, %v3626_v39  ;;  %v6066_v4 = vld [vmem:[#allocation15_spill] sm:$0xff] }
  0xc0   :  { %v582_v5 = vpop.permute.xlu1 %581  ;;  %3328 = vset.pattern.permute.xlu1 %v6039_v37  ;;  %6047 = vst [vmem:[#allocation40_spill] sm:$0xff] %v4087_v26  ;;  %6048 = vst [vmem:[#allocation41_spill] sm:$0xff] %v4090_v55  ;;  %v4105_v54 = vadd.f32 %v6050_v22, %v131_v52  ;;  %v436_v47 = vrot.slane %v4087_v26, %v3626_v39  ;;  %v4112_v31 = vadd.f32 %v6052_v49, %v132_v46  ;;  %v6057_v52 = vld [vmem:[#allocation10_spill] sm:$0xff]  ;;  %v6059_v46 = vld [vmem:[#allocation7_spill] sm:$0xff] }
  0xc1   :  { %6049 = vst [vmem:[#allocation42_spill] sm:$0xff] %v4092_v6  ;;  %v4115_v62 = vadd.f32 %v3978_v36, %v133_v3  ;;  %v4117_v29 = vadd.f32 %v523_v11, %v489_v56  ;;  %v4121_v45 = vmul.f32 %v6056_v40, %v3956_v32  ;;  %v4125_v22 = vmul.f32 %v6057_v52, %v3956_v32  ;;  %v6060_v49 = vld [vmem:[#allocation4_spill] sm:$0xff] }
  0xc2   :  { %v4078_v1 = vpop.permute.xlu0 %1251  ;;  %6051 = vst [vmem:[#allocation28_spill] sm:$0xff] %v4105_v54  ;;  %6053 = vst [vmem:[#allocation27_spill] sm:$0xff] %v4112_v31  ;;  %v470_v13 = vrot.slane %v4087_v26, %v3634_v43  ;;  %v4132_v36 = vadd.f32 %v524_v10, %v490_v35  ;;  %v4136_v3 = vmul.f32 %v6059_v46, %v3956_v32  ;;  %v30_v35 = vld [vmem:[%s5935_s6] sm:$0xf] }
  0xc3   :  { %6045 = vst [vmem:[#allocation3_spill] sm:$0xff] %v4078_v1  ;;  %1729 = vperm.xlu1 %3328, %v3554_v18   ;;  %v482_v18 = vrot.slane %v4076_v30, %v3634_v43  ;;  %6054 = vst [vmem:[#allocation43_spill] sm:$0xff] %v4115_v62  ;;  %v94_v56 = vmul.f32 %v82_v14, %v3846_v60  ;;  %v156_v11 = vrot.slane %v4065_v61, %v3616_v34  ;;  %v6063_v1 = vld [vmem:[#allocation12_spill] sm:$0xff] }
  0xc4   :  { %v584_v9 = vpop.permute.xlu1 %583  ;;  %6055 = vst [vmem:[#allocation44_spill] sm:$0xff] %v4117_v29  ;;  %6058 = vst [vmem:[#allocation6_spill] sm:$0xff] %v4132_v36  ;;  %v4144_v40 = vsel %vm593_vm3, %v6060_v49, %v582_v5  ;;  %v128_v10 = vmul.f32 %v116_v44, %v3574_v20  ;;  %v454_v14 = vmul.f32 %v448_v41, %v3889_v59 }
  0xc5   :  { %v488_v46 = vmul.f32 %v482_v18, %v3655_v53  ;;  %v4157_v37 = vsel %vm593_vm3, %v582_v5, %v584_v9  ;;  %v4161_v49 = vmul.f32 %v6063_v1, %v3956_v32  ;;  %v522_v55 = vrot.slane %v4076_v30, %v3616_v34 }
  0xc6   :  { %v4109_v63 = vpop.permute.xlu0 %1052  ;;  %v451_v44 = vmul.f32 %v436_v47, %v3889_v59  ;;  %v485_v18 = vmul.f32 %v470_v13, %v3655_v53  ;;  %v610_v5 = vrot.slane %v4144_v40, %v3626_v39  ;;  %v644_v1 = vrot.slane %v4144_v40, %v3634_v43 }
  0xc7   :  { %1600 = vrot.lane.b32.xlu1 %v3450_v7, %s3378_s2  ;;  %v6062_v7 = vmov 0   ;;  %v4184_v2 = vmul.f32 %v6067_v19, %v3956_v32  ;;  %v614_v13 = vrot.slane %v4157_v37, %v3626_v39  ;;  %v134_v36 = vadd.f32 %v128_v10, %v94_v56  ;;  %v6069_v10 = vld [vmem:[#allocation30_spill] sm:$0xff] }
  0xc8   :  { %v4146_v52 = vpop.permute.xlu1 %678  ;;  %3329 = vset.pattern.permute.xlu1 %v6062_v7  ;;  %v6064_v7 = vld [vmem:[#allocation9_spill] sm:$0xff]  ;;  %v168_v42 = vmul.f32 %v156_v11, %v3587_v23  ;;  %v494_v62 = vadd.f32 %v488_v46, %v454_v14  ;;  %v491_v56 = vadd.f32 %v485_v18, %v451_v44  ;;  %v631_v14 = vmul.f32 %v610_v5, %v6069_v10 }
  0xc9   :  { %6061 = vst [vmem:[#allocation10_spill] sm:$0xff] %v4146_v52  ;;  %v4165_v6 = vmul.f32 %v6064_v7, %v3956_v32  ;;  %v4180_v7 = vsel %vm593_vm3, %v584_v9, %v6066_v4  ;;  %v510_v9 = vrot.slane %v4087_v26, %v3616_v34  ;;  %v528_v32 = vmul.f32 %v522_v55, %v6041_v12  ;;  %v6082_v26 = vld [vmem:[#allocation20_spill] sm:$0xff] }
  0xca   :  { %v4170_v41 = vpop.permute.xlu0 %1228  ;;  %v618_v47 = vrot.slane %v4180_v7, %v3626_v39  ;;  %v652_v29 = vrot.slane %v4180_v7, %v3634_v43  ;;  %v665_v46 = vmul.f32 %v644_v1, %v3943_v16  ;;  %v684_v55 = vrot.slane %v4144_v40, %v3616_v34 }
  0xcb   :  { %6065 = vst [vmem:[#allocation7_spill] sm:$0xff] %v4170_v41  ;;  %1776 = vperm.xlu1 %3329, %v30_v35   ;;  %v648_v41 = vrot.slane %v4157_v37, %v3634_v43  ;;  %v632_v19 = vmul.f32 %v614_v13, %v6069_v10  ;;  %v688_v58 = vrot.slane %v4157_v37, %v3616_v34 }
  0xcc   :  { %v4214_v17 = vadd.f32 %v168_v42, %v134_v36  ;;  %v4216_v44 = vadd.f32 %v528_v32, %v494_v62  ;;  %v525_v18 = vmul.f32 %v510_v9, %v6041_v12  ;;  %v692_v5 = vrot.slane %v4180_v7, %v3616_v34 }
  0xcd   :  { %v832_v35 = vpop.permute.xlu1 %831  ;;  %v666_v30 = vmul.f32 %v648_v41, %v3943_v16  ;;  %v633_v11 = vmul.f32 %v618_v47, %v6069_v10  ;;  %v4227_v41 = vsel %vm1058_vm4, %v4039_v8, %v4109_v63  ;;  %v705_v42 = vmul.f32 %v684_v55, %v4146_v52 }
  0xce   :  { %v4202_v31 = vpop.permute.xlu0 %1232  ;;  %6070 = vst [vmem:[#allocation9_spill] sm:$0xff] %v4214_v17  ;;  %6071 = vst [vmem:[#allocation15_spill] sm:$0xff] %v4216_v44  ;;  %v4232_v36 = vadd.f32 %v525_v18, %v491_v56  ;;  %v671_v13 = vadd.f32 %v665_v46, %v631_v14  ;;  %v706_v8 = vmul.f32 %v688_v58, %v4146_v52  ;;  %v6077_v14 = vld [vmem:[#allocation14_spill] sm:$0xff]  ;;  %v6080_v44 = vld [vmem:[#allocation19_spill] sm:$0xff] }
  0xcf   :  { %6068 = vst [vmem:[#allocation12_spill] sm:$0xff] %v4202_v31  ;;  %v667_v31 = vmul.f32 %v652_v29, %v3943_v16  ;;  %6072 = vst [vmem:[#allocation13_spill] sm:$0xff] %v4227_v41  ;;  %v672_v29 = vadd.f32 %v666_v30, %v632_v19  ;;  %v6075_v30 = vld [vmem:[#allocation2_spill] sm:$0xff]  ;;  %v707_v32 = vmul.f32 %v692_v5, %v4146_v52 }
  0xd0   :  { %6074 = vst [vmem:[#allocation46_spill] sm:$0xff] %v4232_v36  ;;  %v4260_v47 = vadd.f32 %v705_v42, %v671_v13  ;;  %v888_v9 = vmul.f32 %v6077_v14, %v832_v35  ;;  %v6081_v36 = vld [vmem:[#allocation17_spill] sm:$0xff]  ;;  %v893_v16 = vmul.f32 %v6082_v26, %v832_v35 }
  0xd1   :  { %v49_v1 = vpop.permute.xlu1 %48  ;;  %v673_v18 = vadd.f32 %v667_v31, %v633_v11  ;;  %v6078_v11 = vld [vmem:[#allocation18_spill] sm:$0xff]  ;;  %v4284_v14 = vadd.f32 %v706_v8, %v672_v29  ;;  %v892_v17 = vmul.f32 %v6081_v36, %v832_v35 }
  0xd2   :  { %v4230_v62 = vpop.permute.xlu0 %1433  ;;  %v4244_v55 = vsel %vm54_vm0, %v3975_v15, %v49_v1  ;;  %v4255_v19 = vsel %vm54_vm0, %v49_v1, %v6075_v30  ;;  %v889_v30 = vmul.f32 %v6078_v11, %v832_v35  ;;  %v6079_v15 = vld [vmem:[#allocation16_spill] sm:$0xff]  ;;  %v894_v26 = vadd.f32 %v888_v9, %v4121_v45 }
  0xd3   :  { %6073 = vst [vmem:[#allocation45_spill] sm:$0xff] %v4230_v62  ;;  %v86_v46 = vrot.slane %v4244_v55, %v3626_v39  ;;  %v120_v1 = vrot.slane %v4244_v55, %v3634_v43  ;;  %v90_v5 = vrot.slane %v4255_v19, %v3626_v39  ;;  %v124_v42 = vrot.slane %v4255_v19, %v3634_v43 }
  0xd4   :  { %v890_v62 = vmul.f32 %v6079_v15, %v832_v35  ;;  %v4291_v52 = vadd.f32 %v707_v32, %v673_v18  ;;  %v4318_v54 = vadd.f32 %v893_v16, %v4184_v2  ;;  %v164_v45 = vrot.slane %v4255_v19, %v3616_v34 }
  0xd5   :  { %v406_v58 = vpop.permute.xlu1 %405  ;;  %v95_v29 = vmul.f32 %v86_v46, %v3846_v60  ;;  %v130_v18 = vmul.f32 %v124_v42, %v3574_v20 }
  0xd6   :  { %v4262_v56 = vpop.permute.xlu0 %1054  ;;  %v4272_v31 = vsel %vm411_vm2, %v4018_v38, %v406_v58  ;;  %v4282_v13 = vsel %vm411_vm2, %v406_v58, %v3990_v21  ;;  %v891_v38 = vmul.f32 %v6080_v44, %v832_v35  ;;  %v129_v44 = vmul.f32 %v120_v1, %v3574_v20 }
  0xd7   :  { %6076 = vst [vmem:[#allocation2_spill] sm:$0xff] %v4262_v56  ;;  %v440_v10 = vrot.slane %v4272_v31, %v3626_v39  ;;  %v474_v21 = vrot.slane %v4272_v31, %v3634_v43  ;;  %v444_v36 = vrot.slane %v4282_v13, %v3626_v39  ;;  %v478_v32 = vrot.slane %v4282_v13, %v3634_v43 }
  0xd8   :  { %v895_v35 = vadd.f32 %v889_v30, %v4125_v22  ;;  %v96_v58 = vmul.f32 %v90_v5, %v3846_v60  ;;  %v896_v15 = vadd.f32 %v890_v62, %v4136_v3  ;;  %v897_v46 = vadd.f32 %v891_v38, %v4161_v49  ;;  %v6086_v62 = vld [vmem:[#allocation8_spill] sm:$0xff] }
  0xd9   :  { %v4289_v11 = vpop.permute.xlu1 %718  ;;  %v4313_v1 = vadd.f32 %v892_v17, %v4165_v6  ;;  %v452_v60 = vmul.f32 %v440_v10, %v3889_v59  ;;  %v486_v20 = vmul.f32 %v474_v21, %v3655_v53  ;;  %v135_v49 = vadd.f32 %v129_v44, %v95_v29 }
  0xda   :  { %v4298_v8 = vpop.permute.xlu0 %1414  ;;  %v453_v17 = vmul.f32 %v444_v36, %v3889_v59  ;;  %v487_v6 = vmul.f32 %v478_v32, %v3655_v53  ;;  %v4332_v16 = vrot.slane %v6086_v62, %v3626_v39  ;;  %v136_v2 = vadd.f32 %v130_v18, %v96_v58 }
  0xdb   :  { %6083 = vst [vmem:[#allocation14_spill] sm:$0xff] %v4298_v8  ;;  %v160_v8 = vrot.slane %v4244_v55, %v3616_v34  ;;  %v514_v9 = vrot.slane %v4272_v31, %v3616_v34  ;;  %v4337_v10 = vadd.f32 %v3988_v28, %v894_v26  ;;  %v4341_v30 = vrot.slane %v6086_v62, %v3634_v43 }
  0xdc   :  { %6087 = vst [vmem:[#allocation19_spill] sm:$0xff] %v4332_v16  ;;  %v518_v53 = vrot.slane %v4282_v13, %v3616_v34  ;;  %v4347_v59 = vadd.f32 %v3994_v57, %v895_v35  ;;  %v170_v42 = vmul.f32 %v164_v45, %v3587_v23  ;;  %v200_v38 = vrot.slane %v4244_v55, %v3645_v50 }
  0xdd   :  { %6088 = vst [vmem:[#allocation17_spill] sm:$0xff] %v4341_v30  ;;  %v169_v5 = vmul.f32 %v160_v8, %v3587_v23  ;;  %v492_v21 = vadd.f32 %v486_v20, %v452_v60  ;;  %v4356_v28 = vsel %vm1058_vm4, %v4109_v63, %v4262_v56  ;;  %v3379_v29 = vmov 5   ;;  %v6110_v60 = vld [vmem:[#allocation27_spill] sm:$0xff]  ;;  %v6111_v30 = vld [vmem:[#allocation44_spill] sm:$0xff] }
  0xde   :  { %v4324_v22 = vpop.permute.xlu1 %1069  ;;  %v4326_v3 = vpop.permute.xlu0 %1615  ;;  %6089 = vst [vmem:[#allocation20_spill] sm:$0xff] %v4356_v28  ;;  %3331 = vset.pattern.permute.xlu1 %v3379_v29  ;;  %v204_v57 = vrot.slane %v4255_v19, %v3645_v50  ;;  %v493_v44 = vadd.f32 %v487_v6, %v453_v17  ;;  %v6090_v23 = vrot.slane %v4144_v40, %v3645_v50  ;;  %v6106_v17 = vld [vmem:[#allocation40_spill] sm:$0xff] }
  0xdf   :  { %6084 = vst [vmem:[#allocation18_spill] sm:$0xff] %v4324_v22  ;;  %6085 = vst [vmem:[#allocation16_spill] sm:$0xff] %v4326_v3  ;;  %v4358_v8 = vadd.f32 %v169_v5, %v135_v49  ;;  %v4368_v26 = vadd.f32 %v170_v42, %v136_v2  ;;  %v526_v63 = vmul.f32 %v514_v9, %v6041_v12  ;;  %v6113_v3 = vld [vmem:[#allocation10_spill] sm:$0xff] }
  0xe0   :  { %v745_v55 = vmul.f32 %v6090_v23, %v4289_v11  ;;  %v6091_v35 = vrot.slane %v4157_v37, %v3645_v50  ;;  %v6092_v19 = vrot.slane %v4180_v7, %v3645_v50  ;;  %v527_v40 = vmul.f32 %v518_v53, %v6041_v12 }
  0xe1   :  { %v554_v45 = vrot.slane %v4272_v31, %v3645_v50  ;;  %v1087_v20 = vrot.slane %v4356_v28, %v3626_v39  ;;  %v532_v49 = vadd.f32 %v526_v63, %v492_v21  ;;  %v1121_v37 = vrot.slane %v4356_v28, %v3634_v43 }
  0xe2   :  { %v746_v58 = vmul.f32 %v6091_v35, %v4289_v11  ;;  %v747_v18 = vmul.f32 %v6092_v19, %v4289_v11  ;;  %v4392_v12 = vadd.f32 %v527_v40, %v493_v44  ;;  %v4395_v31 = vadd.f32 %v745_v55, %v4260_v47  ;;  %v6101_v40 = vld [vmem:[#allocation32_spill] sm:$0xff] }
  0xe3   :  { %v4366_v36 = vpop.permute.xlu1 %1103  ;;  %v179_v32 = vpop.permute.xlu0 %178  ;;  %v6093_v6 = vrot.slane %v3778_v27, %v3645_v50  ;;  %v4403_v53 = vadd.f32 %v3998_v24, %v896_v15  ;;  %v6095_v47 = vrot.slane %v4227_v41, %v3626_v39  ;;  %v1099_v44 = vmul.f32 %v1087_v20, %v4324_v22 }
  0xe4   :  { %v4406_v42 = vadd.f32 %v746_v58, %v4284_v14  ;;  %v4409_v21 = vadd.f32 %v747_v18, %v4291_v52  ;;  %v6096_v24 = vrot.slane %v3729_v48, %v3645_v50  ;;  %v6097_v52 = vrot.slane %v3852_v25, %v3645_v50  ;;  %v6100_v18 = vld [vmem:[#allocation28_spill] sm:$0xff] }
  0xe5   :  { %v205_v2 = vmul.f32 %v6093_v6, %v179_v32  ;;  %v1098_v29 = vmul.f32 %v6095_v47, %v4324_v22  ;;  %v4427_v23 = vadd.f32 %v4007_v51, %v897_v46  ;;  %v6098_v55 = vrot.slane %v3913_v0, %v3645_v50  ;;  %v6103_v0 = vld [vmem:[#allocation33_spill] sm:$0xff]  ;;  %v6116_v22 = vld [vmem:[#allocation6_spill] sm:$0xff] }
  0xe6   :  { %v206_v14 = vmul.f32 %v6096_v24, %v179_v32  ;;  %v6099_v48 = vrot.slane %v4065_v61, %v3645_v50  ;;  %v6102_v51 = vrot.slane %v6101_v40, %v3645_v50  ;;  %v4446_v6 = vadd.f32 %v6103_v0, %v4313_v1  ;;  %v6104_v24 = vld [vmem:[#allocation30_spill] sm:$0xff] }
  0xe7   :  { %v4400_v9 = vpop.permute.xlu1 %587  ;;  %v537_v5 = vpop.permute.xlu0 %536  ;;  %v207_v63 = vmul.f32 %v6098_v55, %v179_v32  ;;  %v211_v25 = vadd.f32 %v205_v2, %v6100_v18  ;;  %v6105_v55 = vld [vmem:[#allocation31_spill] sm:$0xff]  ;;  %v6107_v61 = vrot.slane %v6106_v17, %v3645_v50  ;;  %v6108_v2 = vld [vmem:[#allocation34_spill] sm:$0xff]  ;;  %v6109_v40 = vrot.slane %v4227_v41, %v3634_v43 }
  0xe8   :  { %6094 = vst [vmem:[#allocation8_spill] sm:$0xff] %v4400_v9  ;;  %v596_v27 = vsel %vm593_vm3, %v6066_v4, %v4400_v9  ;;  %v563_v15 = vmul.f32 %v6097_v52, %v537_v5  ;;  %v208_v19 = vmul.f32 %v6099_v48, %v179_v32  ;;  %v564_v46 = vmul.f32 %v6102_v51, %v537_v5 }
  0xe9   :  { %v622_v35 = vrot.slane %v596_v27, %v3626_v39  ;;  %v656_v4 = vrot.slane %v596_v27, %v3634_v43  ;;  %v696_v58 = vrot.slane %v596_v27, %v3616_v34  ;;  %v565_v48 = vmul.f32 %v6107_v61, %v537_v5 }
  0xea   :  { %v969_v18 = vadd.f32 %v6108_v2, %v4318_v54  ;;  %v1132_v51 = vmul.f32 %v6109_v40, %v4366_v36  ;;  %v212_v1 = vadd.f32 %v206_v14, %v6110_v60  ;;  %v566_v0 = vmul.f32 %v554_v45, %v537_v5  ;;  %v6115_v2 = vld [vmem:[#allocation36_spill] sm:$0xff] }
  0xeb   :  { %v4442_v20 = vpop.permute.xlu1 %1046  ;;  %v972_v47 = vpop.permute.xlu0 %971  ;;  %v634_v52 = vmul.f32 %v622_v35, %v6104_v24  ;;  %v668_v7 = vmul.f32 %v656_v4, %v6105_v55  ;;  %v569_v16 = vadd.f32 %v563_v15, %v6111_v30  ;;  %v6112_v35 = vld [vmem:[#allocation43_spill] sm:$0xff]  ;;  %v708_v28 = vmul.f32 %v696_v58, %v6113_v3  ;;  %v6114_v55 = vld [vmem:[#allocation9_spill] sm:$0xff]  ;;  %v6117_v30 = vld [vmem:[#allocation46_spill] sm:$0xff] }
  0xec   :  { %v213_v56 = vadd.f32 %v207_v63, %v6112_v35  ;;  %v736_v17 = vrot.slane %v596_v27, %v3645_v50  ;;  %v209_v61 = vmul.f32 %v200_v38, %v179_v32  ;;  %v214_v54 = vadd.f32 %v208_v19, %v6114_v55  ;;  %v6119_v38 = vld [vmem:[#allocation37_spill] sm:$0xff] }
  0xed   :  { %v674_v4 = vadd.f32 %v668_v7, %v634_v52  ;;  %v393_v24 = vadd.f32 %v6115_v2, %v211_v25  ;;  %v570_v41 = vadd.f32 %v564_v46, %v6116_v22  ;;  %v210_v45 = vmul.f32 %v204_v57, %v179_v32  ;;  %v6120_v22 = vld [vmem:[#allocation38_spill] sm:$0xff]  ;;  %v6121_v57 = vld [vmem:[#allocation21_spill] sm:$0xff]  ;;  %v6122_v52 = vld [vmem:[#allocation39_spill] sm:$0xff] }
  0xee   :  { %v571_v14 = vadd.f32 %v565_v48, %v6117_v30  ;;  %v4472_v7 = vrot.slane %v6086_v62, %v3616_v34  ;;  %v1133_v27 = vmul.f32 %v1121_v37, %v4366_v36  ;;  %v394_v15 = vadd.f32 %v6119_v38, %v212_v1  ;;  %v6123_v48 = vld [vmem:[#allocation24_spill] sm:$0xff]  ;;  %v6129_v30 = vld [vmem:[#allocation23_spill] sm:$0xff] }
  0xef   :  { %v1049_v40 = vpop.permute.xlu1 %1048  ;;  %v4467_v9 = vpop.permute.xlu0 %1365  ;;  %v714_v60 = vadd.f32 %v708_v28, %v674_v4  ;;  %v572_v63 = vadd.f32 %v566_v0, %v532_v49  ;;  %v575_v58 = vadd.f32 %v569_v16, %v393_v24  ;;  %v4476_v19 = vadd.f32 %v1132_v51, %v1098_v29 }
  0xf0   :  { %6118 = vst [vmem:[#allocation28_spill] sm:$0xff] %v4472_v7  ;;  %v395_v25 = vadd.f32 %v6120_v22, %v213_v56  ;;  %v748_v46 = vmul.f32 %v736_v17, %v4289_v11  ;;  %v1028_v28 = vmul.f32 %v6121_v57, %v972_v47  ;;  %v215_v32 = vadd.f32 %v209_v61, %v4358_v8  ;;  %v6124_v56 = vld [vmem:[#allocation22_spill] sm:$0xff]  ;;  %v6126_v8 = vld [vmem:[#allocation29_spill] sm:$0xff] }
  0xf1   :  { %v396_v55 = vadd.f32 %v6122_v52, %v214_v54  ;;  %v576_v62 = vadd.f32 %v570_v41, %v394_v15  ;;  %v1029_v35 = vmul.f32 %v6123_v48, %v972_v47  ;;  %v216_v16 = vadd.f32 %v210_v45, %v4368_v26  ;;  %v6128_v54 = vld [vmem:[#allocation25_spill] sm:$0xff]  ;;  %v6130_v26 = vld [vmem:[#allocation26_spill] sm:$0xff] }
  0xf2   :  { %v754_v49 = vadd.f32 %v748_v46, %v714_v60  ;;  %v577_v29 = vadd.f32 %v571_v14, %v395_v25  ;;  %v1030_v24 = vmul.f32 %v6124_v56, %v972_v47  ;;  %v6125_v51 = vrot.slane %v4282_v13, %v3645_v50  ;;  %v6131_v15 = vld [vmem:[#allocation41_spill] sm:$0xff]  ;;  %v6133_v25 = vld [vmem:[#allocation15_spill] sm:$0xff]  ;;  %v6136_v56 = vld [vmem:[#allocation4_spill] sm:$0xff] }
  0xf3   :  { %v4484_v37 = vpop.permute.xlu1 %1143  ;;  %v4486_v1 = vpop.permute.xlu0 %1236  ;;  %v6127_v4 = vrot.slane %v6126_v8, %v3645_v50  ;;  %v578_v17 = vadd.f32 %v572_v63, %v396_v55  ;;  %v757_v61 = vadd.f32 %v4395_v31, %v575_v58  ;;  %v1031_v2 = vmul.f32 %v6128_v54, %v972_v47 }
  0xf4   :  { %v567_v0 = vmul.f32 %v6125_v51, %v537_v5  ;;  %v1032_v38 = vmul.f32 %v6129_v30, %v972_v47  ;;  %v1033_v45 = vmul.f32 %v6130_v26, %v972_v47  ;;  %v1034_v60 = vadd.f32 %v1028_v28, %v4337_v10  ;;  %v6137_v51 = vld [vmem:[#allocation8_spill] sm:$0xff] }
  0xf5   :  { %v568_v41 = vmul.f32 %v6127_v4, %v537_v5  ;;  %v4501_v14 = vadd.f32 %v1133_v27, %v1099_v44  ;;  %v4504_v13 = vadd.f32 %v6131_v15, %v215_v32  ;;  %v758_v22 = vadd.f32 %v4406_v42, %v576_v62  ;;  %v6132_v27 = vld [vmem:[#allocation42_spill] sm:$0xff] }
  0xf6   :  { %v1035_v5 = vadd.f32 %v1029_v35, %v4347_v59  ;;  %v759_v31 = vadd.f32 %v4409_v21, %v577_v29  ;;  %v760_v58 = vadd.f32 %v754_v49, %v578_v17  ;;  %v1036_v47 = vadd.f32 %v1030_v24, %v4403_v53  ;;  %v6134_v21 = vld [vmem:[#allocation35_spill] sm:$0xff] }
  0xf7   :  { %v4508_v63 = vpop.permute.xlu0 %1547  ;;  %v4516_v10 = vsel %vm1058_vm4, %v4442_v20, %v1049_v40  ;;  %v4521_v42 = vadd.f32 %v6132_v27, %v216_v16  ;;  %v4524_v59 = vadd.f32 %v567_v0, %v4392_v12  ;;  %v4527_v46 = vadd.f32 %v568_v41, %v6133_v25 }
  0xf8   :  { %v4518_v44 = vpop.permute.xlu1 %1285  ;;  %v4532_v53 = vsel %vm1058_vm4, %v1049_v40, %v6134_v21  ;;  %v1037_v57 = vadd.f32 %v1031_v2, %v4427_v23  ;;  %v4536_v28 = vadd.f32 %v1032_v38, %v4446_v6  ;;  %v4538_v32 = vadd.f32 %v1033_v45, %v969_v18  ;;  %v6139_v45 = vld [vmem:[#allocation30_spill] sm:$0xff] }
  0xf9   :  { %v4540_v52 = vadd.f32 %v1034_v60, %v757_v61  ;;  %v4542_v55 = vadd.f32 %v1035_v5, %v758_v22  ;;  %v1075_v12 = vrot.slane %v4516_v10, %v3626_v39  ;;  %v1109_v62 = vrot.slane %v4516_v10, %v3634_v43  ;;  %v6138_v61 = vld [vmem:[#allocation18_spill] sm:$0xff]  ;;  %v6140_v22 = vld [vmem:[#allocation31_spill] sm:$0xff] }
  0xfa   :  { %v4550_v40 = vadd.f32 %v1036_v47, %v759_v31  ;;  %v4552_v23 = vadd.f32 %v1037_v57, %v760_v58  ;;  %v1079_v6 = vrot.slane %v4532_v53, %v3626_v39  ;;  %v1113_v18 = vrot.slane %v4532_v53, %v3634_v43 }
  0xfb   :  { %v4548_v48 = vpop.permute.xlu0 %1596  ;;  %v3380_v16 = vmov 4   ;;  %v1149_v49 = vrot.slane %v4516_v10, %v3616_v34  ;;  %v1153_v29 = vrot.slane %v4532_v53, %v3616_v34  ;;  %v1096_v54 = vmul.f32 %v1075_v12, %v6138_v61 }
  0xfc   :  { %6135 = vst [vmem:[#allocation32_spill] sm:$0xff] %v4548_v48  ;;  %v590_v35 = vpop.permute.xlu1 %589  ;;  %3330 = vset.pattern.permute.xlu0 %v3380_v16  ;;  %v1130_v2 = vmul.f32 %v1109_v62, %v4366_v36  ;;  %v1097_v47 = vmul.f32 %v1079_v6, %v6138_v61  ;;  %v1131_v27 = vmul.f32 %v1113_v18, %v4366_v36 }
  0xfd   :  { %v594_v24 = vsel %vm593_vm3, %v590_v35, %v6136_v56  ;;  %v595_v0 = vsel %vm593_vm3, %v6137_v51, %v590_v35  ;;  %v1189_v25 = vrot.slane %v4516_v10, %v3645_v50  ;;  %v1193_v21 = vrot.slane %v4532_v53, %v3645_v50  ;;  %v6141_v35 = vld [vmem:[#allocation7_spill] sm:$0xff] }
  0xfe   :  { %v626_v8 = vrot.slane %v595_v0, %v3626_v39  ;;  %v630_v4 = vrot.slane %v594_v24, %v3626_v39  ;;  %v660_v41 = vrot.slane %v595_v0, %v3634_v43  ;;  %v664_v17 = vrot.slane %v594_v24, %v3634_v43 }
  0xff   :  { %v700_v30 = vrot.slane %v595_v0, %v3616_v34  ;;  %v704_v38 = vrot.slane %v594_v24, %v3616_v34  ;;  %v1239_v26 = vpop.permute.xlu0 %1238  ;;  %v1136_v6 = vadd.f32 %v1130_v2, %v1096_v54  ;;  %v1170_v18 = vmul.f32 %v1149_v49, %v4484_v37 }
 0x100   :  { %v635_v60 = vmul.f32 %v626_v8, %v6139_v45  ;;  %v636_v15 = vmul.f32 %v630_v4, %v6139_v45  ;;  %v669_v5 = vmul.f32 %v660_v41, %v6140_v22  ;;  %v670_v31 = vmul.f32 %v664_v17, %v6140_v22  ;;  %v4580_v58 = vpop.permute.xlu1 %1183 }
 0x101   :  { %v1241_v62 = vsel %vm1240_vm5, %v4486_v1, %v1239_v26  ;;  %v4594_v16 = vsel %vm1240_vm5, %v1239_v26, %v6141_v35  ;;  %v709_v10 = vmul.f32 %v700_v30, %v6113_v3  ;;  %v740_v53 = vrot.slane %v595_v0, %v3645_v50  ;;  %v6142_v0 = vld [vmem:[#allocation13_spill] sm:$0xff] }
 0x102   :  { %v675_v57 = vadd.f32 %v669_v5, %v635_v60  ;;  %v676_v12 = vadd.f32 %v670_v31, %v636_v15  ;;  %v1171_v56 = vmul.f32 %v1153_v29, %v4484_v37  ;;  %v710_v51 = vmul.f32 %v704_v38, %v6113_v3 }
 0x103   :  { %v744_v8 = vrot.slane %v594_v24, %v3645_v50  ;;  %v1273_v4 = vrot.slane %v1241_v62, %v3626_v39  ;;  %v1277_v26 = vrot.slane %v4594_v16, %v3626_v39  ;;  %v1307_v54 = vrot.slane %v1241_v62, %v3634_v43  ;;  %v6144_v24 = vld [vmem:[#allocation20_spill] sm:$0xff] }
 0x104   :  { %v1231_v41 = vpop.permute.xlu1 %1230  ;;  %v715_v17 = vadd.f32 %v709_v10, %v675_v57  ;;  %v1311_v49 = vrot.slane %v4594_v16, %v3634_v43  ;;  %v1137_v2 = vadd.f32 %v1131_v27, %v1097_v47  ;;  %v6143_v29 = vrot.slane %v6142_v0, %v3616_v34  ;;  %v6146_v47 = vld [vmem:[#allocation3_spill] sm:$0xff] }
 0x105   :  { %v6145_v30 = vrot.slane %v6144_v24, %v3616_v34  ;;  %v716_v45 = vadd.f32 %v710_v51, %v676_v12  ;;  %v1176_v60 = vadd.f32 %v1170_v18, %v1136_v6  ;;  %v579_v15 = vadd.f32 %v4524_v59, %v4504_v13 }
 0x106   :  { %v1172_v3 = vmul.f32 %v6143_v29, %v4484_v37  ;;  %v580_v22 = vadd.f32 %v4527_v46, %v4521_v42  ;;  %v749_v5 = vmul.f32 %v740_v53, %v4289_v11  ;;  %v750_v31 = vmul.f32 %v744_v8, %v4289_v11  ;;  %v4634_v53 = vpop.permute.xlu0 %1598 }
 0x107   :  { %v1173_v38 = vmul.f32 %v6145_v30, %v4484_v37  ;;  %v1282_v27 = vmul.f32 %v1273_v4, %v6146_v47  ;;  %v1210_v57 = vmul.f32 %v1189_v25, %v4580_v58  ;;  %v1211_v10 = vmul.f32 %v1193_v21, %v4580_v58  ;;  %6147 = vst [vmem:[#allocation33_spill] sm:$0xff] %v4634_v53 }
 0x108   :  { %v4626_v29 = vpop.permute.xlu1 %1325  ;;  %v755_v12 = vadd.f32 %v749_v5, %v715_v17  ;;  %v1283_v6 = vmul.f32 %v1277_v26, %v6146_v47  ;;  %v1316_v13 = vmul.f32 %v1307_v54, %v4518_v44  ;;  %v1317_v59 = vmul.f32 %v1311_v49, %v4518_v44  ;;  %v6148_v26 = vld [vmem:[#allocation12_spill] sm:$0xff] }
 0x109   :  { %v1177_v42 = vadd.f32 %v1171_v56, %v1137_v2  ;;  %v756_v46 = vadd.f32 %v750_v31, %v716_v45  ;;  %v1387_v18 = vrot.slane %v1241_v62, %v3645_v50  ;;  %v1391_v11 = vrot.slane %v4594_v16, %v3645_v50 }
 0x10a   :  { %v4637_v25 = vadd.f32 %v1172_v3, %v4476_v19  ;;  %v4640_v21 = vadd.f32 %v1173_v38, %v4501_v14  ;;  %v1347_v51 = vrot.slane %v1241_v62, %v3616_v34  ;;  %v1245_v56 = vsel %vm1240_vm5, %v6141_v35, %v1231_v41 }
 0x10b   :  { %v1351_v8 = vrot.slane %v4594_v16, %v3616_v34  ;;  %v1216_v4 = vadd.f32 %v1210_v57, %v1176_v60  ;;  %v1217_v17 = vadd.f32 %v1211_v10, %v1177_v42  ;;  %v1244_v54 = vsel %vm1240_vm5, %v1231_v41, %v6148_v26  ;;  %v6151_v57 = vld [vmem:[#allocation16_spill] sm:$0xff] }
 0x10c   :  { %v4651_v19 = vadd.f32 %v755_v12, %v579_v15  ;;  %v1322_v49 = vadd.f32 %v1316_v13, %v1282_v27  ;;  %v4653_v14 = vadd.f32 %v1317_v59, %v1283_v6  ;;  %v4659_v62 = vsel %vm1604_vm6, %v4548_v48, %v4634_v53 }
 0x10d   :  { %v4661_v35 = vpop.permute.xlu1 %1467  ;;  %v4664_v16 = vadd.f32 %v756_v46, %v580_v22  ;;  %v4667_v2 = vmul.f32 %v1387_v18, %v4467_v9  ;;  %v4670_v41 = vmul.f32 %v1391_v11, %v4467_v9  ;;  %v1257_v3 = vrot.slane %v1245_v56, %v3626_v39 }
 0x10e   :  { %v6149_v30 = vrot.slane %v6142_v0, %v3645_v50  ;;  %v6150_v45 = vrot.slane %v6144_v24, %v3645_v50  ;;  %v1261_v15 = vrot.slane %v1244_v54, %v3626_v39  ;;  %v1356_v22 = vmul.f32 %v1347_v51, %v4626_v29 }
 0x10f   :  { %v4684_v5 = vadd.f32 %v1216_v4, %v4540_v52  ;;  %v4687_v31 = vadd.f32 %v1217_v17, %v4542_v55  ;;  %v1629_v27 = vrot.slane %v4659_v62, %v3626_v39  ;;  %v1291_v0 = vrot.slane %v1245_v56, %v3634_v43 }
 0x110   :  { %v1212_v38 = vmul.f32 %v6149_v30, %v4580_v58  ;;  %v1213_v60 = vmul.f32 %v6150_v45, %v4580_v58  ;;  %v1295_v52 = vrot.slane %v1244_v54, %v3634_v43  ;;  %v1278_v55 = vmul.f32 %v1257_v3, %v6146_v47 }
 0x111   :  { %v1235_v12 = vpop.permute.xlu1 %1234  ;;  %v1331_v6 = vrot.slane %v1245_v56, %v3616_v34  ;;  %v1279_v42 = vmul.f32 %v1261_v15, %v6146_v47  ;;  %v1335_v46 = vrot.slane %v1244_v54, %v3616_v34  ;;  %v1371_v18 = vrot.slane %v1245_v56, %v3645_v50  ;;  %v4719_v56 = vpop.permute.xlu0 %1420 }
 0x112   :  { %v1242_v13 = vsel %vm1240_vm5, %v1235_v12, %v4486_v1  ;;  %v1243_v59 = vsel %vm1240_vm5, %v6148_v26, %v1235_v12  ;;  %v1312_v51 = vmul.f32 %v1291_v0, %v4518_v44  ;;  %v1313_v3 = vmul.f32 %v1295_v52, %v4518_v44 }
 0x113   :  { %v1265_v11 = vrot.slane %v1243_v59, %v3626_v39  ;;  %v1269_v4 = vrot.slane %v1242_v13, %v3626_v39  ;;  %v1299_v17 = vrot.slane %v1243_v59, %v3634_v43  ;;  %v1303_v1 = vrot.slane %v1242_v13, %v3634_v43 }
 0x114   :  { %v1375_v26 = vrot.slane %v1244_v54, %v3645_v50  ;;  %v1339_v45 = vrot.slane %v1243_v59, %v3616_v34  ;;  %v1343_v24 = vrot.slane %v1242_v13, %v3616_v34  ;;  %v4726_v7 = vmul.f32 %v1629_v27, %v6151_v57 }
 0x115   :  { %v1280_v30 = vmul.f32 %v1265_v11, %v6146_v47  ;;  %v1411_v15 = vpop.permute.xlu1 %1410  ;;  %v1281_v12 = vmul.f32 %v1269_v4, %v6146_v47  ;;  %v1314_v0 = vmul.f32 %v1299_v17, %v4518_v44  ;;  %v1315_v10 = vmul.f32 %v1303_v1, %v4518_v44 }
 0x116   :  { %v1392_v54 = vmul.f32 %v1371_v18, %v4467_v9  ;;  %v1352_v52 = vmul.f32 %v1331_v6, %v4626_v29  ;;  %v1353_v11 = vmul.f32 %v1335_v46, %v4626_v29  ;;  %v4732_v53 = vmul.f32 %v1351_v8, %v4626_v29 }
 0x117   :  { %v1320_v48 = vadd.f32 %v1314_v0, %v1280_v30  ;;  %v1321_v47 = vadd.f32 %v1315_v10, %v1281_v12  ;;  %v1428_v44 = vsel %vm1422_vm7, %v4719_v56, %v1411_v15  ;;  %v1318_v4 = vadd.f32 %v1312_v51, %v1278_v55  ;;  %v6152_v12 = vld [vmem:[#allocation14_spill] sm:$0xff] }
 0x118   :  { %v1319_v17 = vadd.f32 %v1313_v3, %v1279_v42  ;;  %v1393_v27 = vmul.f32 %v1375_v26, %v4467_v9  ;;  %v1362_v1 = vadd.f32 %v1356_v22, %v1322_v49  ;;  %v1354_v18 = vmul.f32 %v1339_v45, %v4626_v29 }
 0x119   :  { %v1413_v57 = vpop.permute.xlu1 %1412  ;;  %v1355_v6 = vmul.f32 %v1343_v24, %v4626_v29  ;;  %v1379_v46 = vrot.slane %v1243_v59, %v3645_v50  ;;  %v1383_v8 = vrot.slane %v1242_v13, %v3645_v50  ;;  %v1459_v10 = vrot.slane %v1428_v44, %v3626_v39 }
 0x11a   :  { %v1493_v30 = vrot.slane %v1428_v44, %v3634_v43  ;;  %v1426_v55 = vsel %vm1422_vm7, %v1413_v57, %v6152_v12  ;;  %v1427_v49 = vsel %vm1422_vm7, %v1411_v15, %v1413_v57  ;;  %v1218_v22 = vadd.f32 %v1212_v38, %v4637_v25  ;;  %v6153_v38 = vld [vmem:[#allocation45_spill] sm:$0xff] }
 0x11b   :  { %v1360_v42 = vadd.f32 %v1354_v18, %v1320_v48  ;;  %v1361_v51 = vadd.f32 %v1355_v6, %v1321_v47  ;;  %v1439_v29 = vrot.slane %v1427_v49, %v3626_v39  ;;  %v1219_v24 = vadd.f32 %v1213_v60, %v4640_v21 }
 0x11c   :  { %v1443_v13 = vrot.slane %v1426_v55, %v3626_v39  ;;  %v1473_v59 = vrot.slane %v1427_v49, %v3634_v43  ;;  %v1477_v3 = vrot.slane %v1426_v55, %v3634_v43  ;;  %v1358_v45 = vadd.f32 %v1352_v52, %v1318_v4 }
 0x11d   :  { %v4755_v26 = vpop.permute.xlu1 %1507  ;;  %v1394_v0 = vmul.f32 %v1379_v46, %v4467_v9  ;;  %v1395_v57 = vmul.f32 %v1383_v8, %v4467_v9  ;;  %v4761_v48 = vadd.f32 %v4536_v28, %v4651_v19  ;;  %v1359_v25 = vadd.f32 %v1353_v11, %v1319_v17 }
 0x11e   :  { %v1465_v21 = vmul.f32 %v1459_v10, %v6153_v38  ;;  %v1499_v60 = vmul.f32 %v1493_v30, %v4661_v35  ;;  %v1573_v15 = vrot.slane %v1428_v44, %v3645_v50  ;;  %v1460_v6 = vmul.f32 %v1439_v29, %v6153_v38 }
 0x11f   :  { %v1400_v47 = vadd.f32 %v1394_v0, %v1360_v42  ;;  %v1401_v18 = vadd.f32 %v1395_v57, %v1361_v51  ;;  %v1513_v52 = vrot.slane %v1427_v49, %v3616_v34  ;;  %v1461_v4 = vmul.f32 %v1443_v13, %v6153_v38 }
 0x120   :  { %v1494_v9 = vmul.f32 %v1473_v59, %v4661_v35  ;;  %v1495_v28 = vmul.f32 %v1477_v3, %v4661_v35  ;;  %v1517_v19 = vrot.slane %v1426_v55, %v3616_v34  ;;  %v1224_v11 = vadd.f32 %v1218_v22, %v4550_v40  ;;  %v6154_v3 = vld [vmem:[#allocation2_spill] sm:$0xff] }
 0x121   :  { %v1225_v17 = vadd.f32 %v1219_v24, %v4552_v23  ;;  %v1553_v46 = vrot.slane %v1427_v49, %v3645_v50  ;;  %v1557_v8 = vrot.slane %v1426_v55, %v3645_v50  ;;  %v1398_v30 = vadd.f32 %v1392_v54, %v1358_v45 }
 0x122   :  { %v4776_v10 = vpop.permute.xlu1 %1649  ;;  %v1399_v42 = vadd.f32 %v1393_v27, %v1359_v25  ;;  %v1533_v51 = vrot.slane %v1428_v44, %v3616_v34  ;;  %v4781_v29 = vadd.f32 %v4538_v32, %v4664_v16  ;;  %v4783_v13 = vadd.f32 %v1400_v47, %v1224_v11 }
 0x123   :  { %v4785_v59 = vadd.f32 %v1401_v18, %v1225_v17  ;;  %v1505_v40 = vadd.f32 %v1499_v60, %v1465_v21  ;;  %v1579_v23 = vmul.f32 %v1573_v15, %v4508_v63  ;;  %v1500_v49 = vadd.f32 %v1494_v9, %v1460_v6 }
 0x124   :  { %v1501_v22 = vadd.f32 %v1495_v28, %v1461_v4  ;;  %v1534_v55 = vmul.f32 %v1513_v52, %v4755_v26  ;;  %v1535_v54 = vmul.f32 %v1517_v19, %v4755_v26  ;;  %v1574_v27 = vmul.f32 %v1553_v46, %v4508_v63 }
 0x125   :  { %v1575_v44 = vmul.f32 %v1557_v8, %v4508_v63  ;;  %v1539_v32 = vmul.f32 %v1533_v51, %v4755_v26  ;;  %v1363_v24 = vadd.f32 %v4732_v53, %v4653_v14  ;;  %v4802_v57 = vadd.f32 %v4667_v2, %v1362_v1 }
 0x126   :  { %v1057_v16 = vpop.permute.xlu1 %1056  ;;  %v1404_v25 = vadd.f32 %v1398_v30, %v4684_v5  ;;  %v1540_v14 = vadd.f32 %v1534_v55, %v1500_v49  ;;  %v1541_v47 = vadd.f32 %v1535_v54, %v1501_v22  ;;  %v6155_v4 = vrot.slane %v4659_v62, %v3634_v43  ;;  %v4835_v22 = vpop.permute.xlu0 %1602 }
 0x127   :  { %v1059_v45 = vsel %vm1058_vm4, %v6154_v3, %v1057_v16  ;;  %v1064_v0 = vsel %vm1058_vm4, %v1057_v16, %v4442_v20  ;;  %v4824_v11 = vadd.f32 %v4670_v41, %v1363_v24  ;;  %v1405_v16 = vadd.f32 %v1399_v42, %v4687_v31 }
 0x128   :  { %v1091_v21 = vrot.slane %v1059_v45, %v3626_v39  ;;  %v1095_v60 = vrot.slane %v1064_v0, %v3626_v39  ;;  %v1125_v15 = vrot.slane %v1059_v45, %v3634_v43  ;;  %v1129_v53 = vrot.slane %v1064_v0, %v3634_v43 }
 0x129   :  { %v1165_v18 = vrot.slane %v1059_v45, %v3616_v34  ;;  %v1169_v6 = vrot.slane %v1064_v0, %v3616_v34  ;;  %v1678_v9 = vmul.f32 %v6155_v4, %v4776_v10  ;;  %v1205_v28 = vrot.slane %v1059_v45, %v3645_v50 }
 0x12a   :  { %v1100_v20 = vmul.f32 %v1091_v21, %v6138_v61  ;;  %v1101_v2 = vmul.f32 %v1095_v60, %v6138_v61  ;;  %v1134_v5 = vmul.f32 %v1125_v15, %v4366_v36  ;;  %v1135_v1 = vmul.f32 %v1129_v53, %v4366_v36  ;;  %v4815_v52 = vpop.permute.xlu1 %1416 }
 0x12b   :  { %v1209_v19 = vrot.slane %v1064_v0, %v3645_v50  ;;  %v1174_v46 = vmul.f32 %v1165_v18, %v4484_v37  ;;  %v1425_v36 = vsel %vm1422_vm7, %v6152_v12, %v4815_v52  ;;  %v1175_v8 = vmul.f32 %v1169_v6, %v4484_v37  ;;  %v6156_v6 = vld [vmem:[#allocation16_spill] sm:$0xff] }
 0x12c   :  { %v1140_v17 = vadd.f32 %v1134_v5, %v1100_v20  ;;  %v1141_v61 = vadd.f32 %v1135_v1, %v1101_v2  ;;  %v1447_v30 = vrot.slane %v1425_v36, %v3626_v39  ;;  %v1481_v51 = vrot.slane %v1425_v36, %v3634_v43  ;;  %v6157_v2 = vld [vmem:[#allocation32_spill] sm:$0xff] }
 0x12d   :  { %v1521_v49 = vrot.slane %v1425_v36, %v3616_v34  ;;  %v1561_v55 = vrot.slane %v1425_v36, %v3645_v50  ;;  %v1545_v24 = vadd.f32 %v1539_v32, %v1505_v40  ;;  %v1580_v3 = vadd.f32 %v1574_v27, %v1540_v14 }
 0x12e   :  { %v1180_v41 = vadd.f32 %v1174_v46, %v1140_v17  ;;  %v1593_v54 = vpop.permute.xlu1 %1592  ;;  %v1181_v45 = vadd.f32 %v1175_v8, %v1141_v61  ;;  %v1462_v12 = vmul.f32 %v1447_v30, %v6153_v38  ;;  %v1496_v37 = vmul.f32 %v1481_v51, %v4661_v35 }
 0x12f   :  { %v1581_v0 = vadd.f32 %v1575_v44, %v1541_v47  ;;  %v1214_v21 = vmul.f32 %v1205_v28, %v4580_v58  ;;  %v1215_v60 = vmul.f32 %v1209_v19, %v4580_v58  ;;  %v4846_v15 = vsel %vm1604_vm6, %v4835_v22, %v1593_v54 }
 0x130   :  { %v1502_v53 = vadd.f32 %v1496_v37, %v1462_v12  ;;  %v1536_v31 = vmul.f32 %v1521_v49, %v4755_v26  ;;  %v1641_v42 = vrot.slane %v4846_v15, %v3626_v39  ;;  %v1675_v40 = vrot.slane %v4846_v15, %v3634_v43 }
 0x131   :  { %v1684_v27 = vadd.f32 %v1678_v9, %v4726_v7  ;;  %v1220_v44 = vadd.f32 %v1214_v21, %v1180_v41  ;;  %v1576_v32 = vmul.f32 %v1561_v55, %v4508_v63  ;;  %v4855_v14 = vadd.f32 %v1579_v23, %v1545_v24 }
 0x132   :  { %v1595_v58 = vpop.permute.xlu1 %1594  ;;  %v1221_v47 = vadd.f32 %v1215_v60, %v1181_v45  ;;  %v1542_v18 = vadd.f32 %v1536_v31, %v1502_v53  ;;  %v1647_v20 = vmul.f32 %v1641_v42, %v6156_v6  ;;  %v1681_v1 = vmul.f32 %v1675_v40, %v4776_v10 }
 0x133   :  { %v1608_v5 = vsel %vm1604_vm6, %v1595_v58, %v6157_v2  ;;  %v1609_v4 = vsel %vm1604_vm6, %v1593_v54, %v1595_v58  ;;  %v4868_v17 = vadd.f32 %v1580_v3, %v1404_v25  ;;  %v1226_v51 = vadd.f32 %v1220_v44, %v4761_v48 }
 0x134   :  { %v1625_v7 = vrot.slane %v1608_v5, %v3626_v39  ;;  %v1659_v9 = vrot.slane %v1608_v5, %v3634_v43  ;;  %v1582_v28 = vadd.f32 %v1576_v32, %v1542_v18  ;;  %v1621_v23 = vrot.slane %v1609_v4, %v3626_v39 }
 0x135   :  { %v1655_v19 = vrot.slane %v1609_v4, %v3634_v43  ;;  %v1695_v36 = vrot.slane %v1609_v4, %v3616_v34  ;;  %v1699_v8 = vrot.slane %v1608_v5, %v3616_v34  ;;  %v4879_v55 = vadd.f32 %v1581_v0, %v1405_v16 }
 0x136   :  { %v1643_v61 = vmul.f32 %v1625_v7, %v6156_v6  ;;  %v1677_v46 = vmul.f32 %v1659_v9, %v4776_v10  ;;  %v4874_v30 = vpop.permute.xlu1 %1689  ;;  %v1642_v49 = vmul.f32 %v1621_v23, %v6156_v6  ;;  %v1227_v25 = vadd.f32 %v1221_v47, %v4781_v29 }
 0x137   :  { %v1676_v41 = vmul.f32 %v1655_v19, %v4776_v10  ;;  %v1687_v54 = vadd.f32 %v1681_v1, %v1647_v20  ;;  %v1715_v24 = vrot.slane %v4846_v15, %v3616_v34  ;;  %v1755_v3 = vrot.slane %v4846_v15, %v3645_v50 }
 0x138   :  { %v4887_v45 = vadd.f32 %v1582_v28, %v4783_v13  ;;  %v1683_v12 = vadd.f32 %v1677_v46, %v1643_v61  ;;  %v1735_v48 = vrot.slane %v1609_v4, %v3645_v50  ;;  %v1739_v37 = vrot.slane %v1608_v5, %v3645_v50 }
 0x139   :  { %v1682_v21 = vadd.f32 %v1676_v41, %v1642_v49  ;;  %v1716_v16 = vmul.f32 %v1695_v36, %v4874_v30  ;;  %v1717_v29 = vmul.f32 %v1699_v8, %v4874_v30  ;;  %v6158_v0 = vrot.slane %v4659_v62, %v3616_v34 }
 0x13a   :  { %v1419_v53 = vpop.permute.xlu1 %1418  ;;  %v4904_v31 = vadd.f32 %v4802_v57, %v1226_v51  ;;  %v1721_v42 = vmul.f32 %v1715_v24, %v4874_v30  ;;  %v1409_v28 = vadd.f32 %v4824_v11, %v1227_v25  ;;  %v6159_v51 = vrot.slane %v4659_v62, %v3645_v50 }
 0x13b   :  { %v1718_v60 = vmul.f32 %v6158_v0, %v4874_v30  ;;  %v1423_v13 = vsel %vm1422_vm7, %v1419_v53, %v4719_v56  ;;  %v1424_v15 = vsel %vm1422_vm7, %v4815_v52, %v1419_v53  ;;  %v1723_v4 = vadd.f32 %v1717_v29, %v1683_v12 }
 0x13c   :  { %v1451_v40 = vrot.slane %v1424_v15, %v3626_v39  ;;  %v1455_v44 = vrot.slane %v1423_v13, %v3626_v39  ;;  %v1485_v32 = vrot.slane %v1424_v15, %v3634_v43  ;;  %v1489_v58 = vrot.slane %v1423_v13, %v3634_v43 }
 0x13d   :  { %v1525_v47 = vrot.slane %v1424_v15, %v3616_v34  ;;  %v1529_v56 = vrot.slane %v1423_v13, %v3616_v34  ;;  %v1565_v18 = vrot.slane %v1424_v15, %v3645_v50  ;;  %v1569_v52 = vrot.slane %v1423_v13, %v3645_v50 }
 0x13e   :  { %v1463_v57 = vmul.f32 %v1451_v40, %v6153_v38  ;;  %v1464_v20 = vmul.f32 %v1455_v44, %v6153_v38  ;;  %v1497_v2 = vmul.f32 %v1485_v32, %v4661_v35  ;;  %v1498_v5 = vmul.f32 %v1489_v58, %v4661_v35  ;;  %v1730_v1 = vpop.permute.xlu1 %1729 }
 0x13f   :  { %v1724_v7 = vadd.f32 %v1718_v60, %v1684_v27  ;;  %v1537_v9 = vmul.f32 %v1525_v47, %v4755_v26  ;;  %v1756_v61 = vmul.f32 %v1735_v48, %v1730_v1  ;;  %v1757_v46 = vmul.f32 %v1739_v37, %v1730_v1  ;;  %v6160_v37 = vld [vmem:[#allocation33_spill] sm:$0xff] }
 0x140   :  { %v1503_v23 = vadd.f32 %v1497_v2, %v1463_v57  ;;  %v1504_v19 = vadd.f32 %v1498_v5, %v1464_v20  ;;  %v1722_v36 = vadd.f32 %v1716_v16, %v1682_v21  ;;  %v1538_v8 = vmul.f32 %v1529_v56, %v4755_v26 }
 0x141   :  { %v1577_v38 = vmul.f32 %v1565_v18, %v4508_v63  ;;  %v1758_v35 = vmul.f32 %v6159_v51, %v1730_v1  ;;  %v1578_v27 = vmul.f32 %v1569_v52, %v4508_v63  ;;  %v1727_v24 = vadd.f32 %v1721_v42, %v1687_v54 }
 0x142   :  { %v1543_v49 = vadd.f32 %v1537_v9, %v1503_v23  ;;  %v1601_v41 = vpop.permute.xlu1 %1600  ;;  %v1761_v12 = vmul.f32 %v1755_v3, %v1730_v1  ;;  %v1544_v11 = vadd.f32 %v1538_v8, %v1504_v19  ;;  %v1762_v25 = vadd.f32 %v1756_v61, %v1722_v36  ;;  %v3361_v8 = vld [vmem:[%s5934_s1] sm:$0x3f] }
 0x143   :  { %v1605_v48 = vsel %vm1604_vm6, %v1601_v41, %v4835_v22  ;;  %v1606_v26 = vsel %vm1604_vm6, %v6160_v37, %v1601_v41  ;;  %v1763_v21 = vadd.f32 %v1757_v46, %v1723_v4  ;;  %v1764_v63 = vadd.f32 %v1758_v35, %v1724_v7  ;;  %v6163_v46 = vld [vmem:[#allocation28_spill] sm:$0xff] }
 0x144   :  { %v1633_v62 = vrot.slane %v1606_v26, %v3626_v39  ;;  %v1637_v16 = vrot.slane %v1605_v48, %v3626_v39  ;;  %v1667_v54 = vrot.slane %v1606_v26, %v3634_v43  ;;  %v1671_v3 = vrot.slane %v1605_v48, %v3634_v43 }
 0x145   :  { %v1707_v29 = vrot.slane %v1606_v26, %v3616_v34  ;;  %v1711_v0 = vrot.slane %v1605_v48, %v3616_v34  ;;  %v1747_v53 = vrot.slane %v1606_v26, %v3645_v50  ;;  %v1767_v13 = vadd.f32 %v1761_v12, %v1727_v24 }
 0x146   :  { %v1645_v22 = vmul.f32 %v1633_v62, %v6156_v6  ;;  %v1646_v60 = vmul.f32 %v1637_v16, %v6156_v6  ;;  %v1583_v15 = vadd.f32 %v1577_v38, %v1543_v49  ;;  %v1584_v42 = vadd.f32 %v1578_v27, %v1544_v11  ;;  %v1777_v32 = vpop.permute.xlu1 %1776  ;;  %v6164_v38 = vld [vmem:[#allocation5_spill] sm:$0xff] }
 0x147   :  { %v1679_v40 = vmul.f32 %v1667_v54, %v4776_v10  ;;  %v1680_v44 = vmul.f32 %v1671_v3, %v4776_v10  ;;  %v1719_v58 = vmul.f32 %v1707_v29, %v4874_v30  ;;  %v1720_v47 = vmul.f32 %v1711_v0, %v4874_v30 }
 0x148   :  { %v1751_v34 = vrot.slane %v1605_v48, %v3645_v50  ;;  %v1768_v56 = vadd.f32 %v1762_v25, %v4868_v17  ;;  %v1769_v52 = vadd.f32 %v1763_v21, %v4879_v55  ;;  %v1770_v57 = vadd.f32 %v1764_v63, %v4887_v45  ;;  %v6161_v55 = vld [vmem:[#allocation19_spill] sm:$0xff] }
 0x149   :  { %v1685_v18 = vadd.f32 %v1679_v40, %v1645_v22  ;;  %v1686_v6 = vadd.f32 %v1680_v44, %v1646_v60  ;;  %v1759_v20 = vmul.f32 %v1747_v53, %v1730_v1  ;;  %v1591_v5 = vadd.f32 %v4855_v14, %v1409_v28  ;;  %v6162_v14 = vld [vmem:[#allocation17_spill] sm:$0xff] }
 0x14a   :  { %v1760_v2 = vmul.f32 %v1751_v34, %v1730_v1  ;;  %v4951_v10 = vadd.f32 %v1777_v32, %v1768_v56  ;;  %v4953_v9 = vadd.f32 %v1777_v32, %v1769_v52  ;;  %v4955_v30 = vadd.f32 %v1777_v32, %v1770_v57  ;;  %v4998_v57 = vld [vmem:[%s5935_s6] sm:$0xf] }
 0x14b   :  { %v1725_v4 = vadd.f32 %v1719_v58, %v1685_v18  ;;  %v1726_v7 = vadd.f32 %v1720_v47, %v1686_v6  ;;  %v1589_v17 = vadd.f32 %v1583_v15, %v4785_v59  ;;  %v1590_v23 = vadd.f32 %v1584_v42, %v4904_v31 }
 0x14c   :  { %v1773_v19 = vadd.f32 %v1767_v13, %v1591_v5  ;;  %v1816_v45 = vmul.f32 %v6161_v55, %v4951_v10  ;;  %v1817_v28 = vmul.f32 %v6162_v14, %v4953_v9  ;;  %v1818_v36 = vmul.f32 %v6163_v46, %v4955_v30 }
 0x14d   :  { %v1765_v61 = vadd.f32 %v1759_v20, %v1725_v4  ;;  %v1766_v1 = vadd.f32 %v1760_v2, %v1726_v7  ;;  %v4969_v59 = vrot.slane %v3361_v8, %v6164_v38  ;;  %v4975_v41 = vrot.slane %v3361_v8, %v3645_v50  ;;  %v6167_v50 = vld [vmem:[#allocation11_spill] sm:$0xff]  ;;  %v1911_v20 = vld [vmem:[%s5936_s3] sm:$0x3] }
 0x14e   :  { %v4971_v31 = vadd.f32 %v1777_v32, %v1773_v19  ;;  %v1823_v51 = vsel %vm1822_vm8, %v1816_v45, 0.0  ;;  %v1837_v35 = vmul.f32 %v1816_v45, %v1816_v45  ;;  %v1824_v24 = vsel %vm1822_vm8, %v1817_v28, 0.0 }
 0x14f   :  { %6165 = vst [vmem:[#allocation40_spill] sm:$0xff] %v4969_v59  ;;  %v1771_v49 = vadd.f32 %v1765_v61, %v1589_v17  ;;  %v1772_v27 = vadd.f32 %v1766_v1, %v1590_v23  ;;  %6166 = vst [vmem:[#allocation34_spill] sm:$0xff] %v4975_v41  ;;  %v1825_v12 = vadd.f32 %v1824_v24, %v1823_v51  ;;  %v1826_v54 = vsel %vm1822_vm8, %v1818_v36, 0.0 }
 0x150   :  { %v1838_v11 = vmul.f32 %v1817_v28, %v1817_v28  ;;  %v1839_v37 = vmul.f32 %v1818_v36, %v1818_v36  ;;  %v1843_v26 = vsel %vm1822_vm8, %v1837_v35, 0.0  ;;  %v1821_v21 = vmul.f32 %v4969_v59, %v4971_v31 }
 0x151   :  { %v1782_v25 = vadd.f32 %v1777_v32, %v1771_v49  ;;  %v4978_v48 = vadd.f32 %v1777_v32, %v1772_v27  ;;  %v1827_v29 = vadd.f32 %v1826_v54, %v1825_v12  ;;  %v6168_v2 = vmov 0  }
 0x152   :  { %v1844_v62 = vsel %vm1822_vm8, %v1838_v11, 0.0  ;;  %v1846_v53 = vsel %vm1822_vm8, %v1839_v37, 0.0  ;;  %v1842_v40 = vmul.f32 %v1821_v21, %v1821_v21  ;;  %v1832_v47 = vsel %vm1822_vm8, %v1821_v21, 0.0 }
 0x153   :  { %v1819_v16 = vmul.f32 %v4975_v41, %v1782_v25  ;;  %v1820_v63 = vmul.f32 %v6167_v50, %v4978_v48  ;;  %v1845_v3 = vadd.f32 %v1844_v62, %v1843_v26  ;;  %v6169_v5 = vmov 1  }
 0x154   :  { %v1852_v6 = vsel %vm1822_vm8, %v1842_v40, 0.0 }
 0x155   :  { %v1828_v0 = vsel %vm1822_vm8, %v1819_v16, 0.0  ;;  %v1840_v22 = vmul.f32 %v1819_v16, %v1819_v16  ;;  %v1841_v60 = vmul.f32 %v1820_v63, %v1820_v63  ;;  %v1847_v15 = vadd.f32 %v1846_v53, %v1845_v3 }
 0x156   :  { %v1829_v13 = vadd.f32 %v1828_v0, %v1827_v29  ;;  %v1830_v42 = vsel %vm1822_vm8, %v1820_v63, 0.0 }
 0x157   :  { %v1848_v44 = vsel %vm1822_vm8, %v1840_v22, 0.0  ;;  %v1850_v34 = vsel %vm1822_vm8, %v1841_v60, 0.0 }
 0x158   :  { %v1831_v32 = vadd.f32 %v1830_v42, %v1829_v13  ;;  %v1849_v58 = vadd.f32 %v1848_v44, %v1847_v15 }
 0x15a   :  { %v1833_v56 = vadd.f32 %v1832_v47, %v1831_v32  ;;  %v1851_v18 = vadd.f32 %v1850_v34, %v1849_v58 }
 0x15c   :  { %1834 = vadd.xlane.f32.xlu0 %v1833_v56  ;;  %v1853_v52 = vadd.f32 %v1852_v6, %v1851_v18 }
 0x15e   :  { %1854 = vadd.xlane.f32.xlu1 %v1853_v52 }
 0x16f   :  { %1884 = vperm.xlu1 %3331, %v4998_v57  }
 0x172   :  { %1874 = vperm.xlu0 %3330, %v4998_v57  }
 0x173   :  { %3332 = vset.pattern.permute.xlu1 %v6168_v2 }
 0x174   :  { %1914 = vperm.xlu1 %3332, %v1911_v20  }
 0x176   :  { %3335 = vset.pattern.permute.xlu0 %v6169_v5 }
 0x178   :  { %3333 = vset.pattern.permute.xlu1 %v6169_v5 }
 0x179   :  { %1948 = vperm.xlu1 %3333, %v1911_v20  }
 0x17d   :  { %1988 = vperm.xlu1 %3333, %v4998_v57  }
 0x181   :  { %3334 = vset.pattern.permute.xlu1 %v6168_v2 }
 0x1e5   :  { %v1835_v4 = vpop.xlane.xlu0 %1834 }
 0x1e6   :  { %v1836_v7 = vmul.f32 0.001953125, %v1835_v4 }
 0x1e7   :  { %v1855_v17 = vpop.xlane.xlu1 %1854 }
 0x1e8   :  { %v1856_v23 = vmul.f32 0.001953125, %v1855_v17  ;;  %v1857_v19 = vmul.f32 %v1836_v7, %v1836_v7  ;;  %v1859_v1 = vsub.f32 %v4951_v10, %v1836_v7  ;;  %v1860_v28 = vsub.f32 %v4953_v9, %v1836_v7 }
 0x1e9   :  { %v1861_v36 = vsub.f32 %v4955_v30, %v1836_v7  ;;  %v1862_v8 = vsub.f32 %v1782_v25, %v1836_v7  ;;  %v1863_v51 = vsub.f32 %v4978_v48, %v1836_v7  ;;  %v1864_v35 = vsub.f32 %v4971_v31, %v1836_v7 }
 0x1ea   :  { %v1858_v45 = vsub.f32 %v1856_v23, %v1857_v19 }
 0x1eb   :  { %v5017_v37 = vpop.permute.xlu1 %1884 }
 0x1ec   :  { %v1865_v61 = vadd.f32 1e-05, %v1858_v45 }
 0x1ed   :  { %v5015_v49 = vpop.permute.xlu0 %1874 }
 0x1ee   :  { %3353 = vrsqrt.f32 %v1865_v61 }
 0x1ef   :  { %v1915_v53 = vpop.permute.xlu1 %1914 }
 0x1fb   :  { %v3354_v38 = vpop.eup %3353 }
 0x1fc   :  { %v1867_v27 = vmul.f32 %v3354_v38, %v1859_v1  ;;  %v1868_v24 = vmul.f32 %v3354_v38, %v1860_v28  ;;  %v1869_v12 = vmul.f32 %v3354_v38, %v1861_v36  ;;  %v1870_v11 = vmul.f32 %v3354_v38, %v1862_v8  ;;  %v1949_v28 = vpop.permute.xlu1 %1948 }
 0x1fd   :  { %v1871_v26 = vmul.f32 %v3354_v38, %v1863_v51  ;;  %v1872_v10 = vmul.f32 %v3354_v38, %v1864_v35 }
 0x1fe   :  { %v1877_v9 = vmul.f32 %v5015_v49, %v1867_v27  ;;  %v1878_v30 = vmul.f32 %v5015_v49, %v1868_v24  ;;  %v1879_v25 = vmul.f32 %v5015_v49, %v1869_v12  ;;  %v1880_v48 = vmul.f32 %v5015_v49, %v1870_v11 }
 0x1ff   :  { %v1881_v31 = vmul.f32 %v5015_v49, %v1871_v26  ;;  %v1882_v21 = vmul.f32 %v5015_v49, %v1872_v10 }
 0x200   :  { %v1887_v62 = vadd.f32 %v5017_v37, %v1877_v9  ;;  %v1888_v16 = vadd.f32 %v5017_v37, %v1878_v30  ;;  %v1889_v63 = vadd.f32 %v5017_v37, %v1879_v25  ;;  %v1890_v54 = vadd.f32 %v5017_v37, %v1880_v48 }
 0x201   :  { %v1891_v3 = vadd.f32 %v5017_v37, %v1881_v31  ;;  %v1892_v29 = vadd.f32 %v5017_v37, %v1882_v21 }
 0x202   :  { %v1893_v0 = vmul.f32 0.2, %v1887_v62  ;;  %v1894_v22 = vmul.f32 0.2, %v1888_v16  ;;  %v1895_v60 = vmul.f32 0.2, %v1889_v63 }
 0x203   :  { %v1896_v13 = vmul.f32 0.2, %v1890_v54  ;;  %v1897_v15 = vmul.f32 0.2, %v1891_v3  ;;  %v1898_v42 = vmul.f32 0.2, %v1892_v29 }
 0x204   :  { %v1899_v40 = vmax.f32 %v1887_v62, %v1893_v0  ;;  %v1900_v44 = vmax.f32 %v1888_v16, %v1894_v22  ;;  %v1901_v32 = vmax.f32 %v1889_v63, %v1895_v60  ;;  %v1989_v63 = vpop.permute.xlu1 %1988 }
 0x205   :  { %v1902_v58 = vmax.f32 %v1890_v54, %v1896_v13  ;;  %v1903_v47 = vmax.f32 %v1891_v3, %v1897_v15  ;;  %v1904_v34 = vmax.f32 %v1892_v29, %v1898_v42 }
 0x206   :  { %v5032_v56 = vmul.f32 %v1899_v40, %v6161_v55  ;;  %v5035_v18 = vmul.f32 %v1900_v44, %v6162_v14  ;;  %v5038_v6 = vmul.f32 %v1901_v32, %v6163_v46 }
 0x207   :  { %v5041_v52 = vmul.f32 %v1902_v58, %v4975_v41  ;;  %v5044_v20 = vmul.f32 %v1903_v47, %v6167_v50  ;;  %v5047_v4 = vmul.f32 %v1904_v34, %v4969_v59 }
 0x208   :  { %v1920_v7 = vrot.slane %v5032_v56, %v3626_v39  ;;  %v1924_v17 = vrot.slane %v5035_v18, %v3626_v39  ;;  %v1928_v23 = vrot.slane %v5038_v6, %v3626_v39  ;;  %v1954_v19 = vrot.slane %v5032_v56, %v3634_v43 }
 0x209   :  { %v1932_v45 = vrot.slane %v5041_v52, %v3626_v39  ;;  %v1936_v61 = vrot.slane %v5044_v20, %v3626_v39  ;;  %v1940_v1 = vrot.slane %v5047_v4, %v3626_v39  ;;  %v1958_v36 = vrot.slane %v5035_v18, %v3634_v43 }
 0x20a   :  { %v1941_v8 = vmul.f32 %v1920_v7, %v1915_v53  ;;  %v1942_v38 = vmul.f32 %v1924_v17, %v1915_v53  ;;  %v1943_v51 = vmul.f32 %v1928_v23, %v1915_v53  ;;  %v1962_v35 = vrot.slane %v5038_v6, %v3634_v43 }
 0x20b   :  { %v1944_v27 = vmul.f32 %v1932_v45, %v1915_v53  ;;  %v1945_v24 = vmul.f32 %v1936_v61, %v1915_v53  ;;  %v1946_v12 = vmul.f32 %v1940_v1, %v1915_v53  ;;  %v1966_v11 = vrot.slane %v5041_v52, %v3634_v43 }
 0x20c   :  { %v1970_v26 = vrot.slane %v5044_v20, %v3634_v43  ;;  %v1974_v10 = vrot.slane %v5047_v4, %v3634_v43  ;;  %v1975_v9 = vmul.f32 %v1954_v19, %v1949_v28  ;;  %v1976_v30 = vmul.f32 %v1958_v36, %v1949_v28 }
 0x20d   :  { %v1977_v25 = vmul.f32 %v1962_v35, %v1949_v28  ;;  %v1978_v48 = vmul.f32 %v1966_v11, %v1949_v28 }
 0x20e   :  { %v1979_v31 = vmul.f32 %v1970_v26, %v1949_v28  ;;  %v1980_v21 = vmul.f32 %v1974_v10, %v1949_v28  ;;  %v1981_v62 = vadd.f32 %v1975_v9, %v1941_v8  ;;  %v1982_v16 = vadd.f32 %v1976_v30, %v1942_v38 }
 0x20f   :  { %v1983_v54 = vadd.f32 %v1977_v25, %v1943_v51  ;;  %v1984_v3 = vadd.f32 %v1978_v48, %v1944_v27 }
 0x210   :  { %v5073_v29 = vadd.f32 %v1989_v63, %v1981_v62  ;;  %v5075_v0 = vadd.f32 %v1989_v63, %v1982_v16  ;;  %v1985_v22 = vadd.f32 %v1979_v31, %v1945_v24  ;;  %v1986_v60 = vadd.f32 %v1980_v21, %v1946_v12 }
 0x211   :  { %v5077_v53 = vadd.f32 %v1989_v63, %v1983_v54  ;;  %v5079_v13 = vadd.f32 %v1989_v63, %v1984_v3  ;;  %v2083_v54 = vld [vmem:[%s5937_s4] sm:$0x3]  ;;  %v6170_v3 = vmov 2  }
 0x212   :  { %v1997_v15 = vmul.f32 %v5073_v29, %v6161_v55  ;;  %v1998_v42 = vmul.f32 %v5075_v0, %v6162_v14  ;;  %v5085_v40 = vadd.f32 %v1989_v63, %v1985_v22  ;;  %v5087_v44 = vadd.f32 %v1989_v63, %v1986_v60  ;;  %v2279_v22 = vld [vmem:[%s5938_s5] sm:$0xf]  ;;  %v3281_v60 = vld [vmem:[%s5938_s5 + $0x8] sm:$0xf] }
 0x213   :  { %v1999_v32 = vmul.f32 %v5077_v53, %v6163_v46  ;;  %v2000_v58 = vmul.f32 %v5079_v13, %v4975_v41 }
 0x214   :  { %v2003_v47 = vsel %vm1822_vm8, %v1997_v15, 0.0  ;;  %v2004_v34 = vsel %vm1822_vm8, %v1998_v42, 0.0  ;;  %v2017_v17 = vmul.f32 %v1997_v15, %v1997_v15  ;;  %v2001_v23 = vmul.f32 %v5085_v40, %v6167_v50  ;;  %v3284_v15 = vld [vmem:[%s5938_s5 + $0x14] sm:$0xf] }
 0x215   :  { %v2005_v7 = vadd.f32 %v2004_v34, %v2003_v47  ;;  %v2006_v19 = vsel %vm1822_vm8, %v1999_v32, 0.0  ;;  %v2018_v45 = vmul.f32 %v1998_v42, %v1998_v42  ;;  %v2019_v61 = vmul.f32 %v1999_v32, %v1999_v32  ;;  %v3280_v42 = vld [vmem:[%s5938_s5 + $0x4] sm:$0xf]  ;;  %v5133_v32 = vld [vmem:[%s5938_s5 + $0x18] sm:$0xf] }
 0x216   :  { %v2002_v1 = vmul.f32 %v5087_v44, %v4969_v59  ;;  %v2008_v36 = vsel %vm1822_vm8, %v2000_v58, 0.0  ;;  %v2020_v8 = vmul.f32 %v2000_v58, %v2000_v58  ;;  %v2023_v38 = vsel %vm1822_vm8, %v2017_v17, 0.0  ;;  %v3282_v58 = vld [vmem:[%s5938_s5 + $0xc] sm:$0xf]  ;;  %v5145_v47 = vld [vmem:[%s5938_s5 + $0x10] sm:$0xf] }
 0x217   :  { %v2007_v28 = vadd.f32 %v2006_v19, %v2005_v7  ;;  %v2024_v51 = vsel %vm1822_vm8, %v2018_v45, 0.0  ;;  %v2010_v24 = vsel %vm1822_vm8, %v2001_v23, 0.0  ;;  %v2021_v12 = vmul.f32 %v2001_v23, %v2001_v23 }
 0x218   :  { %v2025_v27 = vadd.f32 %v2024_v51, %v2023_v38  ;;  %v2026_v11 = vsel %vm1822_vm8, %v2019_v61, 0.0  ;;  %v2012_v9 = vsel %vm1822_vm8, %v2002_v1, 0.0  ;;  %v2022_v30 = vmul.f32 %v2002_v1, %v2002_v1 }
 0x219   :  { %v2009_v35 = vadd.f32 %v2008_v36, %v2007_v28  ;;  %v2028_v25 = vsel %vm1822_vm8, %v2020_v8, 0.0  ;;  %v2030_v21 = vsel %vm1822_vm8, %v2021_v12, 0.0 }
 0x21a   :  { %v2027_v10 = vadd.f32 %v2026_v11, %v2025_v27  ;;  %v2032_v16 = vsel %vm1822_vm8, %v2022_v30, 0.0 }
 0x21b   :  { %v2011_v26 = vadd.f32 %v2010_v24, %v2009_v35 }
 0x21c   :  { %v2029_v31 = vadd.f32 %v2028_v25, %v2027_v10 }
 0x21d   :  { %v2013_v48 = vadd.f32 %v2012_v9, %v2011_v26 }
 0x21e   :  { %v2031_v62 = vadd.f32 %v2030_v21, %v2029_v31 }
 0x21f   :  { %2014 = vadd.xlane.f32.xlu1 %v2013_v48 }
 0x220   :  { %v2033_v63 = vadd.f32 %v2032_v16, %v2031_v62 }
 0x222   :  { %2034 = vadd.xlane.f32.xlu0 %v2033_v63 }
 0x230   :  { %2086 = vperm.xlu1 %3334, %v2083_v54  }
 0x234   :  { %3336 = vset.pattern.permute.xlu1 %v6170_v3 }
 0x235   :  { %2160 = vperm.xlu1 %3336, %v4998_v57  }
 0x238   :  { %2120 = vperm.xlu0 %3335, %v2083_v54  }
 0x239   :  { %3337 = vset.pattern.permute.xlu1 %v6168_v2 }
 0x23a   :  { %2282 = vperm.xlu1 %3337, %v2279_v22  }
 0x23c   :  { %3340 = vset.pattern.permute.xlu0 %v6168_v2 }
 0x23d   :  { %2478 = vperm.xlu0 %3340, %v3281_v60  }
 0x23e   :  { %3338 = vset.pattern.permute.xlu1 %v6169_v5 }
 0x23f   :  { %2316 = vperm.xlu1 %3338, %v2279_v22  }
 0x241   :  { %2763 = vperm.xlu0 %3340, %v3284_v15  }
 0x243   :  { %3339 = vset.pattern.permute.xlu1 %v6168_v2 }
 0x244   :  { %2377 = vperm.xlu1 %3339, %v3280_v42  }
 0x245   :  { %2864 = vperm.xlu0 %3340, %v5133_v32  }
 0x248   :  { %3341 = vset.pattern.permute.xlu1 %v6169_v5 }
 0x249   :  { %2512 = vperm.xlu1 %3341, %v3281_v60   ;;  %3344 = vset.pattern.permute.xlu0 %v6169_v5 }
 0x24a   :  { %2411 = vperm.xlu0 %3344, %v3280_v42  }
 0x24d   :  { %3342 = vset.pattern.permute.xlu1 %v6168_v2 }
 0x24e   :  { %2579 = vperm.xlu1 %3342, %v3282_v58   ;;  %2613 = vperm.xlu0 %3344, %v3282_v58  }
 0x252   :  { %2662 = vperm.xlu1 %3342, %v5145_v47  }
 0x256   :  { %3343 = vset.pattern.permute.xlu1 %v6169_v5 }
 0x257   :  { %2797 = vperm.xlu1 %3343, %v3284_v15  }
 0x2a8   :  { %v2015_v34 = vpop.xlane.xlu1 %2014 }
 0x2a9   :  { %v2016_v7 = vmul.f32 0.001953125, %v2015_v34 }
 0x2ab   :  { %v2035_v17 = vpop.xlane.xlu0 %2034  ;;  %v2037_v23 = vmul.f32 %v2016_v7, %v2016_v7  ;;  %v2039_v1 = vsub.f32 %v5073_v29, %v2016_v7  ;;  %v2040_v28 = vsub.f32 %v5075_v0, %v2016_v7  ;;  %v2041_v36 = vsub.f32 %v5077_v53, %v2016_v7 }
 0x2ac   :  { %v2036_v19 = vmul.f32 0.001953125, %v2035_v17  ;;  %v2042_v8 = vsub.f32 %v5079_v13, %v2016_v7  ;;  %v2043_v5 = vsub.f32 %v5085_v40, %v2016_v7  ;;  %v2044_v51 = vsub.f32 %v5087_v44, %v2016_v7 }
 0x2ae   :  { %v2038_v45 = vsub.f32 %v2036_v19, %v2037_v23 }
 0x2b0   :  { %v2045_v61 = vadd.f32 1e-05, %v2038_v45 }
 0x2b2   :  { %3355 = vrsqrt.f32 %v2045_v61 }
 0x2bf   :  { %v3356_v38 = vpop.eup %3355 }
 0x2c0   :  { %v2047_v35 = vmul.f32 %v3356_v38, %v2039_v1  ;;  %v2048_v27 = vmul.f32 %v3356_v38, %v2040_v28  ;;  %v2049_v24 = vmul.f32 %v3356_v38, %v2041_v36  ;;  %v2050_v12 = vmul.f32 %v3356_v38, %v2042_v8  ;;  %v2087_v1 = vpop.permute.xlu1 %2086 }
 0x2c1   :  { %v2051_v11 = vmul.f32 %v3356_v38, %v2043_v5  ;;  %v2052_v26 = vmul.f32 %v3356_v38, %v2044_v51 }
 0x2c2   :  { %v2053_v10 = vmul.f32 %v2047_v35, %v5015_v49  ;;  %v2054_v29 = vmul.f32 %v2048_v27, %v5015_v49  ;;  %v2055_v0 = vmul.f32 %v2049_v24, %v5015_v49  ;;  %v2056_v53 = vmul.f32 %v2050_v12, %v5015_v49  ;;  %v2121_v27 = vpop.permute.xlu0 %2120 }
 0x2c3   :  { %v2057_v13 = vmul.f32 %v2051_v11, %v5015_v49  ;;  %v2058_v40 = vmul.f32 %v2052_v26, %v5015_v49 }
 0x2c4   :  { %v2059_v44 = vadd.f32 %v2053_v10, %v5017_v37  ;;  %v2060_v9 = vadd.f32 %v2054_v29, %v5017_v37  ;;  %v2061_v30 = vadd.f32 %v2055_v0, %v5017_v37  ;;  %v2062_v25 = vadd.f32 %v2056_v53, %v5017_v37 }
 0x2c5   :  { %v2063_v48 = vadd.f32 %v2057_v13, %v5017_v37  ;;  %v2064_v31 = vadd.f32 %v2058_v40, %v5017_v37 }
 0x2c6   :  { %v2065_v21 = vmul.f32 0.2, %v2059_v44  ;;  %v2066_v62 = vmul.f32 0.2, %v2060_v9  ;;  %v2067_v16 = vmul.f32 0.2, %v2061_v30 }
 0x2c7   :  { %v2068_v63 = vmul.f32 0.2, %v2062_v25  ;;  %v2069_v54 = vmul.f32 0.2, %v2063_v48  ;;  %v2070_v3 = vmul.f32 0.2, %v2064_v31 }
 0x2c8   :  { %v2071_v22 = vmax.f32 %v2059_v44, %v2065_v21  ;;  %v2072_v60 = vmax.f32 %v2060_v9, %v2066_v62  ;;  %v2073_v15 = vmax.f32 %v2061_v30, %v2067_v16 }
 0x2c9   :  { %v2074_v42 = vmax.f32 %v2062_v25, %v2068_v63  ;;  %v2075_v58 = vmax.f32 %v2063_v48, %v2069_v54  ;;  %v2076_v34 = vmax.f32 %v2064_v31, %v2070_v3  ;;  %v2161_v31 = vpop.permute.xlu1 %2160 }
 0x2ca   :  { %v2077_v7 = vmul.f32 %v2071_v22, %v6161_v55  ;;  %v2078_v17 = vmul.f32 %v2072_v60, %v6162_v14  ;;  %v2079_v23 = vmul.f32 %v2073_v15, %v6163_v46 }
 0x2cb   :  { %v2080_v19 = vmul.f32 %v2074_v42, %v4975_v41  ;;  %v2081_v45 = vmul.f32 %v2075_v58, %v6167_v50  ;;  %v2082_v61 = vmul.f32 %v2076_v34, %v4969_v59 }
 0x2cc   :  { %v2092_v28 = vrot.slane %v2077_v7, %v3626_v39  ;;  %v2096_v36 = vrot.slane %v2078_v17, %v3626_v39  ;;  %v2100_v8 = vrot.slane %v2079_v23, %v3626_v39  ;;  %v2126_v38 = vrot.slane %v2077_v7, %v3634_v43 }
 0x2cd   :  { %v2104_v5 = vrot.slane %v2080_v19, %v3626_v39  ;;  %v2108_v51 = vrot.slane %v2081_v45, %v3626_v39  ;;  %v2112_v35 = vrot.slane %v2082_v61, %v3626_v39  ;;  %v2130_v24 = vrot.slane %v2078_v17, %v3634_v43 }
 0x2ce   :  { %v2113_v12 = vmul.f32 %v2092_v28, %v2087_v1  ;;  %v2114_v11 = vmul.f32 %v2096_v36, %v2087_v1  ;;  %v2115_v26 = vmul.f32 %v2100_v8, %v2087_v1  ;;  %v2134_v10 = vrot.slane %v2079_v23, %v3634_v43 }
 0x2cf   :  { %v2116_v29 = vmul.f32 %v2104_v5, %v2087_v1  ;;  %v2117_v0 = vmul.f32 %v2108_v51, %v2087_v1  ;;  %v2118_v53 = vmul.f32 %v2112_v35, %v2087_v1  ;;  %v2138_v13 = vrot.slane %v2080_v19, %v3634_v43 }
 0x2d0   :  { %v2142_v40 = vrot.slane %v2081_v45, %v3634_v43  ;;  %v2146_v44 = vrot.slane %v2082_v61, %v3634_v43  ;;  %v2147_v9 = vmul.f32 %v2126_v38, %v2121_v27  ;;  %v2148_v30 = vmul.f32 %v2130_v24, %v2121_v27 }
 0x2d1   :  { %v2149_v25 = vmul.f32 %v2134_v10, %v2121_v27  ;;  %v2150_v48 = vmul.f32 %v2138_v13, %v2121_v27 }
 0x2d2   :  { %v2151_v21 = vmul.f32 %v2142_v40, %v2121_v27  ;;  %v2152_v62 = vmul.f32 %v2146_v44, %v2121_v27  ;;  %v2153_v16 = vadd.f32 %v2147_v9, %v2113_v12  ;;  %v2154_v63 = vadd.f32 %v2148_v30, %v2114_v11 }
 0x2d3   :  { %v2155_v54 = vadd.f32 %v2149_v25, %v2115_v26  ;;  %v2156_v3 = vadd.f32 %v2150_v48, %v2116_v29 }
 0x2d4   :  { %v5185_v22 = vadd.f32 %v2161_v31, %v2153_v16  ;;  %v5187_v60 = vadd.f32 %v2161_v31, %v2154_v63  ;;  %v2157_v15 = vadd.f32 %v2151_v21, %v2117_v0  ;;  %v2158_v42 = vadd.f32 %v2152_v62, %v2118_v53 }
 0x2d5   :  { %v5189_v58 = vadd.f32 %v2161_v31, %v2155_v54  ;;  %v5191_v34 = vadd.f32 %v2161_v31, %v2156_v3  ;;  %v3286_v3 = vld [vmem:[%s5938_s5 + $0x1c] sm:$0xf] }
 0x2d6   :  { %v2169_v7 = vmul.f32 %v5185_v22, %v6161_v55  ;;  %v2170_v17 = vmul.f32 %v5187_v60, %v6162_v14  ;;  %v5197_v23 = vadd.f32 %v2161_v31, %v2157_v15  ;;  %v5199_v19 = vadd.f32 %v2161_v31, %v2158_v42  ;;  %v3287_v15 = vld [vmem:[%s5938_s5 + $0x20] sm:$0xf] }
 0x2d7   :  { %v2171_v45 = vmul.f32 %v5189_v58, %v6163_v46  ;;  %v2172_v61 = vmul.f32 %v5191_v34, %v4975_v41  ;;  %v6171_v42 = vmov 3  }
 0x2d8   :  { %v2175_v1 = vsel %vm1822_vm8, %v2169_v7, 0.0  ;;  %v2176_v28 = vsel %vm1822_vm8, %v2170_v17, 0.0  ;;  %v2189_v8 = vmul.f32 %v2169_v7, %v2169_v7  ;;  %v2173_v38 = vmul.f32 %v5197_v23, %v6167_v50  ;;  %v5231_v7 = vpop.permute.xlu1 %2282 }
 0x2d9   :  { %v2177_v36 = vadd.f32 %v2176_v28, %v2175_v1  ;;  %v2178_v5 = vsel %vm1822_vm8, %v2171_v45, 0.0  ;;  %v2190_v51 = vmul.f32 %v2170_v17, %v2170_v17  ;;  %v2191_v35 = vmul.f32 %v2171_v45, %v2171_v45  ;;  %v5237_v45 = vpop.permute.xlu0 %2478 }
 0x2da   :  { %v2174_v27 = vmul.f32 %v5199_v19, %v4969_v59  ;;  %v2180_v12 = vsel %vm1822_vm8, %v2172_v61, 0.0  ;;  %v2192_v11 = vmul.f32 %v2172_v61, %v2172_v61  ;;  %v2195_v26 = vsel %vm1822_vm8, %v2189_v8, 0.0 }
 0x2db   :  { %v2179_v24 = vadd.f32 %v2178_v5, %v2177_v36  ;;  %v2196_v10 = vsel %vm1822_vm8, %v2190_v51, 0.0  ;;  %v2182_v53 = vsel %vm1822_vm8, %v2173_v38, 0.0  ;;  %v2193_v13 = vmul.f32 %v2173_v38, %v2173_v38 }
 0x2dc   :  { %v2197_v0 = vadd.f32 %v2196_v10, %v2195_v26  ;;  %v2198_v40 = vsel %vm1822_vm8, %v2191_v35, 0.0  ;;  %v2184_v30 = vsel %vm1822_vm8, %v2174_v27, 0.0  ;;  %v2194_v25 = vmul.f32 %v2174_v27, %v2174_v27 }
 0x2dd   :  { %v2181_v29 = vadd.f32 %v2180_v12, %v2179_v24  ;;  %v2200_v48 = vsel %vm1822_vm8, %v2192_v11, 0.0  ;;  %v2202_v62 = vsel %vm1822_vm8, %v2193_v13, 0.0  ;;  %v5241_v61 = vpop.permute.xlu0 %2763 }
 0x2de   :  { %v2199_v9 = vadd.f32 %v2198_v40, %v2197_v0  ;;  %v2204_v63 = vsel %vm1822_vm8, %v2194_v25, 0.0 }
 0x2df   :  { %v2183_v44 = vadd.f32 %v2182_v53, %v2181_v29 }
 0x2e0   :  { %v2201_v21 = vadd.f32 %v2200_v48, %v2199_v9 }
 0x2e1   :  { %v2185_v31 = vadd.f32 %v2184_v30, %v2183_v44 }
 0x2e2   :  { %v2203_v16 = vadd.f32 %v2202_v62, %v2201_v21 }
 0x2e3   :  { %2186 = vadd.xlane.f32.xlu1 %v2185_v31 }
 0x2e4   :  { %v2205_v54 = vadd.f32 %v2204_v63, %v2203_v16 }
 0x2e6   :  { %2206 = vadd.xlane.f32.xlu0 %v2205_v54 }
 0x2f4   :  { %2898 = vperm.xlu1 %3343, %v5133_v32   ;;  %v5233_v32 = vpop.permute.xlu1 %2316 }
 0x2f8   :  { %3345 = vset.pattern.permute.xlu1 %v6168_v2  ;;  %v5235_v17 = vpop.permute.xlu1 %2377 }
 0x2f9   :  { %2965 = vperm.xlu1 %3345, %v3286_v3  }
 0x2fc   :  { %2696 = vperm.xlu0 %3344, %v5145_v47   ;;  %v5239_v2 = vpop.permute.xlu1 %2512  ;;  %v5245_v47 = vpop.permute.xlu0 %2864 }
 0x2fd   :  { %3066 = vperm.xlu1 %3345, %v3287_v15  }
 0x300   :  { %2999 = vperm.xlu0 %3344, %v3286_v3   ;;  %v5243_v1 = vpop.permute.xlu1 %2579  ;;  %v5249_v36 = vpop.permute.xlu0 %2411 }
 0x304   :  { %3100 = vperm.xlu0 %3344, %v3287_v15   ;;  %v5247_v28 = vpop.permute.xlu1 %2662  ;;  %v5253_v38 = vpop.permute.xlu0 %2613 }
 0x308   :  { %3346 = vset.pattern.permute.xlu0 %v6171_v42  ;;  %v5251_v8 = vpop.permute.xlu1 %2797 }
 0x36c   :  { %v2187_v5 = vpop.xlane.xlu1 %2186 }
 0x36d   :  { %v2188_v51 = vmul.f32 0.001953125, %v2187_v5 }
 0x36f   :  { %v2207_v35 = vpop.xlane.xlu0 %2206  ;;  %v2209_v27 = vmul.f32 %v2188_v51, %v2188_v51  ;;  %v2211_v26 = vsub.f32 %v5185_v22, %v2188_v51  ;;  %v2212_v10 = vsub.f32 %v5187_v60, %v2188_v51  ;;  %v2213_v29 = vsub.f32 %v5189_v58, %v2188_v51 }
 0x370   :  { %v2208_v24 = vmul.f32 0.001953125, %v2207_v35  ;;  %v2214_v0 = vsub.f32 %v5191_v34, %v2188_v51  ;;  %v2215_v13 = vsub.f32 %v5197_v23, %v2188_v51  ;;  %v2216_v40 = vsub.f32 %v5199_v19, %v2188_v51 }
 0x372   :  { %v2210_v12 = vsub.f32 %v2208_v24, %v2209_v27 }
 0x374   :  { %v2217_v11 = vadd.f32 1e-05, %v2210_v12 }
 0x376   :  { %3357 = vrsqrt.f32 %v2217_v11 }
 0x383   :  { %v3358_v53 = vpop.eup %3357 }
 0x384   :  { %v2219_v44 = vmul.f32 %v3358_v53, %v2211_v26  ;;  %v2220_v9 = vmul.f32 %v3358_v53, %v2212_v10  ;;  %v2221_v30 = vmul.f32 %v3358_v53, %v2213_v29  ;;  %v2222_v25 = vmul.f32 %v3358_v53, %v2214_v0 }
 0x385   :  { %v2223_v48 = vmul.f32 %v3358_v53, %v2215_v13  ;;  %v2224_v31 = vmul.f32 %v3358_v53, %v2216_v40  ;;  %v5283_v40 = vpop.permute.xlu0 %2696 }
 0x386   :  { %v2225_v21 = vmul.f32 %v2219_v44, %v5015_v49  ;;  %v2226_v22 = vmul.f32 %v2220_v9, %v5015_v49  ;;  %v2227_v60 = vmul.f32 %v2221_v30, %v5015_v49  ;;  %v2228_v58 = vmul.f32 %v2222_v25, %v5015_v49 }
 0x387   :  { %v2229_v34 = vmul.f32 %v2223_v48, %v5015_v49  ;;  %v2230_v63 = vmul.f32 %v2224_v31, %v5015_v49 }
 0x388   :  { %v2231_v23 = vadd.f32 %v2225_v21, %v5017_v37  ;;  %v2232_v19 = vadd.f32 %v2226_v22, %v5017_v37  ;;  %v2233_v62 = vadd.f32 %v2227_v60, %v5017_v37  ;;  %v2234_v16 = vadd.f32 %v2228_v58, %v5017_v37 }
 0x389   :  { %v2235_v15 = vadd.f32 %v2229_v34, %v5017_v37  ;;  %v2236_v27 = vadd.f32 %v2230_v63, %v5017_v37  ;;  %v3381_v63 = vmov 6  }
 0x38a   :  { %v2237_v54 = vmul.f32 0.2, %v2231_v23  ;;  %v2238_v3 = vmul.f32 0.2, %v2232_v19  ;;  %v2240_v42 = vmul.f32 0.2, %v2234_v16 }
 0x38b   :  { %v2239_v5 = vmul.f32 0.2, %v2233_v62  ;;  %v2241_v11 = vmul.f32 0.2, %v2235_v15  ;;  %v2242_v0 = vmul.f32 0.2, %v2236_v27 }
 0x38c   :  { %v2243_v51 = vmax.f32 %v2231_v23, %v2237_v54  ;;  %v2244_v35 = vmax.f32 %v2232_v19, %v2238_v3  ;;  %v2246_v24 = vmax.f32 %v2234_v16, %v2240_v42 }
 0x38d   :  { %v2245_v10 = vmax.f32 %v2233_v62, %v2239_v5  ;;  %v2247_v44 = vmax.f32 %v2235_v15, %v2241_v11  ;;  %v2248_v25 = vmax.f32 %v2236_v27, %v2242_v0 }
 0x38e   :  { %v2249_v12 = vmul.f32 %v2243_v51, %v6161_v55  ;;  %v2252_v26 = vmul.f32 %v2246_v24, %v4975_v41  ;;  %v2250_v29 = vmul.f32 %v2244_v35, %v6162_v14 }
 0x38f   :  { %v2251_v9 = vmul.f32 %v2245_v10, %v6163_v46  ;;  %v2253_v31 = vmul.f32 %v2247_v44, %v6167_v50 }
 0x390   :  { %v2255_v49 = vadd.f32 %v2249_v12, %v5032_v56  ;;  %v5278_v53 = vadd.f32 %v2252_v26, %v5041_v52  ;;  %v5289_v56 = vadd.f32 %v2250_v29, %v5035_v18  ;;  %v2254_v18 = vmul.f32 %v2248_v25, %v4969_v59 }
 0x391   :  { %v5301_v21 = vadd.f32 %v2251_v9, %v5038_v6  ;;  %v5308_v22 = vadd.f32 %v2253_v31, %v5044_v20  ;;  %v5384_v6 = vpop.permute.xlu1 %2898  ;;  %v5392_v20 = vpop.permute.xlu0 %2999 }
 0x392   :  { %v2702_v13 = vrot.slane %v2255_v49, %v3634_v43  ;;  %2261 = vrot.lane.b32.xlu1 %v2255_v49, %s3369_s30  ;;  %v2668_v37 = vrot.slane %v2255_v49, %v3626_v39  ;;  %2267 = vrot.lane.b32.xlu0 %v5278_v53, %s3369_s30  ;;  %v5311_v60 = vadd.f32 %v2254_v18, %v5047_v4 }
 0x393   :  { %v2706_v0 = vrot.slane %v5289_v56, %v3634_v43 }
 0x394   :  { %v2723_v52 = vmul.f32 %v2702_v13, %v5283_v40  ;;  %v2689_v30 = vmul.f32 %v2668_v37, %v5247_v28 }
 0x395   :  { %v5398_v58 = vpop.permute.xlu0 %3100 }
 0x396   :  { %2263 = vrot.lane.b32.xlu1 %v5289_v56, %s3369_s30  ;;  %v5295_v48 = vadd.f32 %v2723_v52, %v2689_v30  ;;  %2357 = vrot.lane.b32.xlu0 %v5289_v56, %s3371_s10  ;;  %6173 = vst [vmem:[#allocation44_spill] sm:$0xff] %v5398_v58  ;;  %v2710_v52 = vrot.slane %v5301_v21, %v3634_v43 }
 0x397   :  { %v2680_v58 = vrot.slane %v5278_v53, %v3626_v39 }
 0x39a   :  { %2265 = vrot.lane.b32.xlu1 %v5301_v21, %s3369_s30  ;;  %2456 = vrot.lane.b32.xlu0 %v2255_v49, %s3372_s11 }
 0x39e   :  { %2269 = vrot.lane.b32.xlu1 %v5308_v22, %s3369_s30  ;;  %2466 = vrot.lane.b32.xlu0 %v5311_v60, %s3372_s11 }
 0x3a2   :  { %2271 = vrot.lane.b32.xlu1 %v5311_v60, %s3369_s30  ;;  %2557 = vrot.lane.b32.xlu0 %v2255_v49, %s3373_s16 }
 0x3a6   :  { %2355 = vrot.lane.b32.xlu1 %v2255_v49, %s3371_s10  ;;  %2567 = vrot.lane.b32.xlu0 %v5311_v60, %s3373_s16 }
 0x3aa   :  { %2365 = vrot.lane.b32.xlu1 %v5311_v60, %s3371_s10  ;;  %2462 = vrot.lane.b32.xlu0 %v5278_v53, %s3372_s11 }
 0x3ae   :  { %2359 = vrot.lane.b32.xlu1 %v5301_v21, %s3371_s10  ;;  %2563 = vrot.lane.b32.xlu0 %v5278_v53, %s3373_s16 }
 0x3b2   :  { %2458 = vrot.lane.b32.xlu1 %v5289_v56, %s3372_s11  ;;  %2743 = vrot.lane.b32.xlu0 %v5289_v56, %s3375_s21 }
 0x3b6   :  { %2361 = vrot.lane.b32.xlu1 %v5278_v53, %s3371_s10  ;;  %2565 = vrot.lane.b32.xlu0 %v5308_v22, %s3373_s16 }
 0x3ba   :  { %2460 = vrot.lane.b32.xlu1 %v5301_v21, %s3372_s11  ;;  %2842 = vrot.lane.b32.xlu0 %v2255_v49, %s3376_s24 }
 0x3be   :  { %2559 = vrot.lane.b32.xlu1 %v5289_v56, %s3373_s16  ;;  %2846 = vrot.lane.b32.xlu0 %v5301_v21, %s3376_s24 }
 0x3c2   :  { %2363 = vrot.lane.b32.xlu1 %v5308_v22, %s3371_s10  ;;  %2943 = vrot.lane.b32.xlu0 %v2255_v49, %s3377_s27 }
 0x3c6   :  { %2561 = vrot.lane.b32.xlu1 %v5301_v21, %s3373_s16  ;;  %2947 = vrot.lane.b32.xlu0 %v5301_v21, %s3377_s27 }
 0x3ca   :  { %2464 = vrot.lane.b32.xlu1 %v5308_v22, %s3372_s11  ;;  %2850 = vrot.lane.b32.xlu0 %v5308_v22, %s3376_s24 }
 0x3ce   :  { %2741 = vrot.lane.b32.xlu1 %v2255_v49, %s3375_s21  ;;  %3044 = vrot.lane.b32.xlu0 %v2255_v49, %s3378_s2 }
 0x3d2   :  { %2745 = vrot.lane.b32.xlu1 %v5301_v21, %s3375_s21  ;;  %3048 = vrot.lane.b32.xlu0 %v5301_v21, %s3378_s2 }
 0x3d6   :  { %2747 = vrot.lane.b32.xlu1 %v5278_v53, %s3375_s21  ;;  %2951 = vrot.lane.b32.xlu0 %v5308_v22, %s3377_s27 }
 0x3da   :  { %2844 = vrot.lane.b32.xlu1 %v5289_v56, %s3376_s24  ;;  %2953 = vrot.lane.b32.xlu0 %v5311_v60, %s3377_s27 }
 0x3de   :  { %2749 = vrot.lane.b32.xlu1 %v5308_v22, %s3375_s21  ;;  %3146 = vperm.xlu0 %3346, %v4998_v57   ;;  %v5388_v57 = vpop.permute.xlu1 %2965 }
 0x3e2   :  { %2848 = vrot.lane.b32.xlu1 %v5278_v53, %s3376_s24  ;;  %v5396_v4 = vpop.permute.xlu1 %3066  ;;  %3347 = vset.pattern.permute.xlu0 %v3381_v63 }
 0x3e3   :  { %6172 = vst [vmem:[#allocation27_spill] sm:$0xff] %v5396_v4 }
 0x3e6   :  { %2945 = vrot.lane.b32.xlu1 %v5289_v56, %s3377_s27 }
 0x3ea   :  { %2751 = vrot.lane.b32.xlu1 %v5311_v60, %s3375_s21 }
 0x3ee   :  { %2949 = vrot.lane.b32.xlu1 %v5278_v53, %s3377_s27 }
 0x3f2   :  { %3046 = vrot.lane.b32.xlu1 %v5289_v56, %s3378_s2 }
 0x3f6   :  { %2852 = vrot.lane.b32.xlu1 %v5311_v60, %s3376_s24 }
 0x3fa   :  { %3050 = vrot.lane.b32.xlu1 %v5278_v53, %s3378_s2 }
 0x3fe   :  { %3052 = vrot.lane.b32.xlu1 %v5308_v22, %s3378_s2 }
 0x402   :  { %3054 = vrot.lane.b32.xlu1 %v5311_v60, %s3378_s2 }
 0x404   :  { %v2262_v34 = vpop.permute.xlu1 %2261  ;;  %v5402_v23 = vpop.permute.xlu0 %2267 }
 0x408   :  { %v2264_v19 = vpop.permute.xlu1 %2263  ;;  %v2358_v62 = vpop.permute.xlu0 %2357 }
 0x409   :  { %v2277_v16 = vsel %vm54_vm0, %v2262_v34, %v2264_v19 }
 0x40a   :  { %v2292_v51 = vrot.slane %v2277_v16, %v3626_v39  ;;  %v2326_v35 = vrot.slane %v2277_v16, %v3634_v43  ;;  %v2672_v16 = vrot.slane %v5289_v56, %v3626_v39 }
 0x40c   :  { %v2266_v54 = vpop.permute.xlu1 %2265  ;;  %v5406_v3 = vpop.permute.xlu0 %2456  ;;  %v2310_v26 = vmul.f32 %v2292_v51, %v5231_v7  ;;  %v2344_v10 = vmul.f32 %v2326_v35, %v5233_v32 }
 0x40d   :  { %v2276_v15 = vsel %vm54_vm0, %v2264_v19, %v2266_v54 }
 0x40e   :  { %v2350_v18 = vadd.f32 %v2344_v10, %v2310_v26  ;;  %v2330_v63 = vrot.slane %v2276_v15, %v3634_v43 }
 0x410   :  { %v5410_v42 = vpop.permute.xlu1 %2269  ;;  %v5412_v5 = vpop.permute.xlu0 %2466 }
 0x411   :  { %v2473_v29 = vsel %vm411_vm2, %v5412_v5, %v5406_v3  ;;  %v2274_v55 = vsel %vm54_vm0, %v5402_v23, %v5410_v42 }
 0x412   :  { %v2484_v19 = vrot.slane %v2473_v29, %v3626_v39  ;;  %v2518_v51 = vrot.slane %v2473_v29, %v3634_v43 }
 0x414   :  { %v2272_v27 = vpop.permute.xlu1 %2271  ;;  %v5416_v24 = vpop.permute.xlu0 %2557  ;;  %v2505_v50 = vmul.f32 %v2484_v19, %v5237_v45  ;;  %v2539_v41 = vmul.f32 %v2518_v51, %v5239_v2 }
 0x415   :  { %v5421_v12 = vsel %vm54_vm0, %v5410_v42, %v2272_v27  ;;  %v2278_v11 = vsel %vm54_vm0, %v2272_v27, %v2262_v34  ;;  %v2296_v34 = vrot.slane %v2276_v15, %v3626_v39 }
 0x416   :  { %v2288_v13 = vrot.slane %v2278_v11, %v3626_v39  ;;  %v2322_v37 = vrot.slane %v2278_v11, %v3634_v43 }
 0x418   :  { %v2356_v49 = vpop.permute.xlu1 %2355  ;;  %v5435_v44 = vpop.permute.xlu0 %2567  ;;  %v2343_v26 = vmul.f32 %v2322_v37, %v5233_v32  ;;  %v2311_v37 = vmul.f32 %v2296_v34, %v5231_v7 }
 0x419   :  { %v2371_v9 = vsel %vm229_vm1, %v2356_v49, %v2358_v62  ;;  %v2574_v30 = vsel %vm593_vm3, %v5435_v44, %v5416_v24 }
 0x41a   :  { %v2387_v25 = vrot.slane %v2371_v9, %v3626_v39  ;;  %v2421_v31 = vrot.slane %v2371_v9, %v3634_v43  ;;  %v2309_v9 = vmul.f32 %v2288_v13, %v5231_v7  ;;  %v2585_v10 = vrot.slane %v2574_v30, %v3626_v39 }
 0x41b   :  { %v2619_v15 = vrot.slane %v2574_v30, %v3634_v43  ;;  %v2275_v13 = vsel %vm54_vm0, %v2266_v54, %v5402_v23 }
 0x41c   :  { %v2405_v35 = vmul.f32 %v2387_v25, %v5235_v17  ;;  %v2439_v27 = vmul.f32 %v2421_v31, %v5249_v36  ;;  %v5455_v11 = vpop.permute.xlu1 %2365  ;;  %v5460_v59 = vpop.permute.xlu0 %2462  ;;  %v2349_v14 = vadd.f32 %v2343_v26, %v2309_v9  ;;  %v2606_v54 = vmul.f32 %v2585_v10, %v5243_v1 }
 0x41d   :  { %v2372_v56 = vsel %vm229_vm1, %v5455_v11, %v2356_v49  ;;  %v2724_v9 = vmul.f32 %v2706_v0, %v5283_v40  ;;  %v2676_v26 = vrot.slane %v5301_v21, %v3626_v39  ;;  %v2545_v10 = vadd.f32 %v2539_v41, %v2505_v50 }
 0x41e   :  { %v2445_v29 = vadd.f32 %v2439_v27, %v2405_v35  ;;  %v2383_v25 = vrot.slane %v2372_v56, %v3626_v39  ;;  %v2417_v31 = vrot.slane %v2372_v56, %v3634_v43  ;;  %v5993_v27 = vmov 7  }
 0x41f   :  { %3348 = vset.pattern.permute.xlu1 %v5993_v27  ;;  %v2345_v56 = vmul.f32 %v2330_v63, %v5233_v32  ;;  %v2718_v63 = vrot.slane %v5308_v22, %v3634_v43  ;;  %v2334_v27 = vrot.slane %v2275_v13, %v3634_v43  ;;  %v2690_v21 = vmul.f32 %v2672_v16, %v5247_v28 }
 0x420   :  { %v5474_v46 = vadd.f32 %v2445_v29, %v2350_v18  ;;  %v2404_v49 = vmul.f32 %v2383_v25, %v5235_v17  ;;  %v2438_v30 = vmul.f32 %v2417_v31, %v5249_v36  ;;  %v2360_v35 = vpop.permute.xlu1 %2359  ;;  %v5481_v34 = vpop.permute.xlu0 %2563  ;;  %v2640_v18 = vmul.f32 %v2619_v15, %v5253_v38 }
 0x421   :  { %v2370_v19 = vsel %vm229_vm1, %v2358_v62, %v2360_v35  ;;  %v2714_v31 = vrot.slane %v5278_v53, %v3634_v43  ;;  %v2351_v41 = vadd.f32 %v2345_v56, %v2311_v37  ;;  %v2691_v37 = vmul.f32 %v2676_v26, %v5247_v28 }
 0x422   :  { %v2444_v51 = vadd.f32 %v2438_v30, %v2404_v49  ;;  %v2391_v29 = vrot.slane %v2370_v19, %v3626_v39  ;;  %v2425_v25 = vrot.slane %v2370_v19, %v3634_v43  ;;  %v2300_v19 = vrot.slane %v2275_v13, %v3626_v39 }
 0x423   :  { %v2726_v13 = vmul.f32 %v2714_v31, %v5283_v40  ;;  %v5524_v31 = vmul.f32 %v2718_v63, %v5283_v40  ;;  %v2684_v26 = vrot.slane %v5308_v22, %v3626_v39 }
 0x424   :  { %v2450_v62 = vadd.f32 %v2444_v51, %v2349_v14  ;;  %v2406_v15 = vmul.f32 %v2391_v29, %v5235_v17  ;;  %v2440_v49 = vmul.f32 %v2425_v25, %v5249_v36  ;;  %v2459_v30 = vpop.permute.xlu1 %2458  ;;  %v5503_v0 = vpop.permute.xlu0 %2743  ;;  %v2646_v14 = vadd.f32 %v2640_v18, %v2606_v54 }
 0x425   :  { %v2722_v29 = vrot.slane %v5311_v60, %v3634_v43  ;;  %v2725_v25 = vmul.f32 %v2710_v52, %v5283_v40  ;;  %v2472_v23 = vsel %vm411_vm2, %v5406_v3, %v2459_v30  ;;  %v2312_v56 = vmul.f32 %v2300_v19, %v5231_v7 }
 0x426   :  { %v2551_v50 = vadd.f32 %v2545_v10, %v2450_v62  ;;  %v2446_v51 = vadd.f32 %v2440_v49, %v2406_v15  ;;  %v2346_v54 = vmul.f32 %v2334_v27, %v5233_v32  ;;  %v2304_v52 = vrot.slane %v2274_v55, %v3626_v39 }
 0x427   :  { %v5527_v3 = vadd.f32 %v2724_v9, %v2690_v21  ;;  %v2338_v62 = vrot.slane %v2274_v55, %v3634_v43  ;;  %v2488_v27 = vrot.slane %v2472_v23, %v3626_v39  ;;  %v2522_v15 = vrot.slane %v2472_v23, %v3634_v43 }
 0x428   :  { %v5512_v4 = vadd.f32 %v2446_v51, %v2351_v41  ;;  %v2362_v42 = vpop.permute.xlu1 %2361  ;;  %v2652_v16 = vadd.f32 %v2646_v14, %v2551_v50  ;;  %v2566_v18 = vpop.permute.xlu0 %2565  ;;  %v2692_v21 = vmul.f32 %v2680_v58, %v5247_v28  ;;  %v2352_v41 = vadd.f32 %v2346_v54, %v2312_v56 }
 0x429   :  { %v2369_v53 = vsel %vm229_vm1, %v2360_v35, %v2362_v42  ;;  %v2313_v55 = vmul.f32 %v2304_v52, %v5231_v7  ;;  %v2308_v14 = vrot.slane %v5421_v12, %v3626_v39  ;;  %v5547_v51 = vadd.f32 %v2725_v25, %v2691_v37 }
 0x42a   :  { %v2395_v10 = vrot.slane %v2369_v53, %v3626_v39  ;;  %v2429_v63 = vrot.slane %v2369_v53, %v3634_v43  ;;  %v5539_v9 = vadd.f32 %v5295_v48, %v2652_v16  ;;  %v2342_v23 = vrot.slane %v5421_v12, %v3634_v43 }
 0x42b   :  { %v2347_v16 = vmul.f32 %v2338_v62, %v5233_v32  ;;  %v2506_v56 = vmul.f32 %v2488_v27, %v5237_v45  ;;  %v2540_v54 = vmul.f32 %v2522_v15, %v5239_v2  ;;  %v2314_v49 = vmul.f32 %v2308_v14, %v5231_v7 }
 0x42c   :  { %v2407_v35 = vmul.f32 %v2395_v10, %v5235_v17  ;;  %v2461_v19 = vpop.permute.xlu1 %2460  ;;  %v5545_v50 = vpop.permute.xlu0 %2842  ;;  %v2441_v53 = vmul.f32 %v2429_v63, %v5249_v36  ;;  %v5571_v27 = vadd.f32 %v2726_v13, %v2692_v21  ;;  %v2348_v15 = vmul.f32 %v2342_v23, %v5233_v32 }
 0x42d   :  { %v2470_v48 = vsel %vm411_vm2, %v2461_v19, %v5460_v59  ;;  %v2471_v58 = vsel %vm411_vm2, %v2459_v30, %v2461_v19  ;;  %v2546_v7 = vadd.f32 %v2540_v54, %v2506_v56  ;;  %v5581_v14 = vsel %vm593_vm3, %v2566_v18, %v5435_v44 }
 0x42e   :  { %v2492_v25 = vrot.slane %v2471_v58, %v3626_v39  ;;  %v2447_v37 = vadd.f32 %v2441_v53, %v2407_v35  ;;  %v2496_v12 = vrot.slane %v2470_v48, %v3626_v39  ;;  %v2526_v52 = vrot.slane %v2471_v58, %v3634_v43 }
 0x42f   :  { %v2530_v10 = vrot.slane %v2470_v48, %v3634_v43  ;;  %v5576_v58 = vadd.f32 %v2347_v16, %v2313_v55  ;;  %v2570_v55 = vsel %vm593_vm3, %v5481_v34, %v2566_v18  ;;  %v2354_v54 = vadd.f32 %v2348_v15, %v2314_v49 }
 0x430   :  { %v2560_v63 = vpop.permute.xlu1 %2559  ;;  %v2507_v30 = vmul.f32 %v2492_v25, %v5237_v45  ;;  %v5566_v19 = vpop.permute.xlu0 %2846  ;;  %v2453_v35 = vadd.f32 %v2447_v37, %v2352_v41  ;;  %v2541_v53 = vmul.f32 %v2526_v52, %v5239_v2  ;;  %v2552_v18 = vadd.f32 %v2546_v7, %v5474_v46 }
 0x431   :  { %v2573_v62 = vsel %vm593_vm3, %v5416_v24, %v2560_v63  ;;  %v2508_v24 = vmul.f32 %v2496_v12, %v5237_v45  ;;  %v2542_v13 = vmul.f32 %v2530_v10, %v5239_v2 }
 0x432   :  { %v2589_v48 = vrot.slane %v2573_v62, %v3626_v39  ;;  %v2623_v25 = vrot.slane %v2573_v62, %v3634_v43  ;;  %v2547_v32 = vadd.f32 %v2541_v53, %v2507_v30  ;;  %v2601_v53 = vrot.slane %v2570_v55, %v3626_v39 }
 0x434   :  { %v2607_v21 = vmul.f32 %v2589_v48, %v5243_v1  ;;  %v2364_v41 = vpop.permute.xlu1 %2363  ;;  %v2641_v23 = vmul.f32 %v2623_v25, %v5253_v38  ;;  %v5591_v16 = vpop.permute.xlu0 %2943  ;;  %v2553_v37 = vadd.f32 %v2547_v32, %v5512_v4 }
 0x435   :  { %v2367_v44 = vsel %vm229_vm1, %v2364_v41, %v5455_v11  ;;  %v2368_v56 = vsel %vm229_vm1, %v2362_v42, %v2364_v41  ;;  %v2605_v11 = vrot.slane %v5581_v14, %v3626_v39  ;;  %v2548_v42 = vadd.f32 %v2542_v13, %v2508_v24 }
 0x436   :  { %v2399_v12 = vrot.slane %v2368_v56, %v3626_v39  ;;  %v2403_v52 = vrot.slane %v2367_v44, %v3626_v39  ;;  %v2647_v10 = vadd.f32 %v2641_v23, %v2607_v21  ;;  %v2433_v30 = vrot.slane %v2368_v56, %v3634_v43 }
 0x437   :  { %v2437_v62 = vrot.slane %v2367_v44, %v3634_v43  ;;  %v2635_v41 = vrot.slane %v2570_v55, %v3634_v43  ;;  %v2639_v56 = vrot.slane %v5581_v14, %v3634_v43 }
 0x438   :  { %v2409_v49 = vmul.f32 %v2403_v52, %v5235_v17  ;;  %v2562_v4 = vpop.permute.xlu1 %2561  ;;  %v2653_v15 = vadd.f32 %v2647_v10, %v2552_v18  ;;  %v2408_v48 = vmul.f32 %v2399_v12, %v5235_v17  ;;  %v5610_v46 = vpop.permute.xlu0 %2947  ;;  %v2442_v32 = vmul.f32 %v2433_v30, %v5249_v36 }
 0x439   :  { %v2443_v25 = vmul.f32 %v2437_v62, %v5249_v36  ;;  %v2571_v7 = vsel %vm593_vm3, %v2562_v4, %v5481_v34  ;;  %v2572_v21 = vsel %vm593_vm3, %v2560_v63, %v2562_v4  ;;  %v2554_v52 = vadd.f32 %v2548_v42, %v2453_v35 }
 0x43a   :  { %v2597_v24 = vrot.slane %v2571_v7, %v3626_v39  ;;  %v2631_v13 = vrot.slane %v2571_v7, %v3634_v43  ;;  %v2593_v23 = vrot.slane %v2572_v21, %v3626_v39  ;;  %v2627_v44 = vrot.slane %v2572_v21, %v3634_v43 }
 0x43b   :  { %v2449_v17 = vadd.f32 %v2443_v25, %v2409_v49  ;;  %v5628_v63 = vadd.f32 %v5527_v3, %v2653_v15  ;;  %v2448_v62 = vadd.f32 %v2442_v32, %v2408_v48  ;;  %v2610_v15 = vmul.f32 %v2601_v53, %v5243_v1 }
 0x43c   :  { %v2609_v34 = vmul.f32 %v2597_v24, %v5243_v1  ;;  %v2643_v36 = vmul.f32 %v2631_v13, %v5253_v38  ;;  %v2465_v12 = vpop.permute.xlu1 %2464  ;;  %v2608_v55 = vmul.f32 %v2593_v23, %v5243_v1  ;;  %v2642_v10 = vmul.f32 %v2627_v44, %v5253_v38  ;;  %v5632_v30 = vpop.permute.xlu0 %2850 }
 0x43d   :  { %v2455_v18 = vadd.f32 %v2449_v17, %v2354_v54  ;;  %v2468_v14 = vsel %vm411_vm2, %v2465_v12, %v5412_v5  ;;  %v2469_v4 = vsel %vm411_vm2, %v5460_v59, %v2465_v12  ;;  %v2644_v48 = vmul.f32 %v2635_v41, %v5253_v38 }
 0x43e   :  { %v2649_v49 = vadd.f32 %v2643_v36, %v2609_v34  ;;  %v2648_v3 = vadd.f32 %v2642_v10, %v2608_v55  ;;  %v2500_v35 = vrot.slane %v2469_v4, %v3626_v39  ;;  %v2504_v54 = vrot.slane %v2468_v14, %v3626_v39 }
 0x43f   :  { %v2534_v42 = vrot.slane %v2469_v4, %v3634_v43  ;;  %v2538_v7 = vrot.slane %v2468_v14, %v3634_v43  ;;  %v2611_v17 = vmul.f32 %v2605_v11, %v5243_v1  ;;  %v2645_v53 = vmul.f32 %v2639_v56, %v5253_v38 }
 0x440   :  { %v2655_v25 = vadd.f32 %v2649_v49, %v2554_v52  ;;  %v5646_v32 = vpop.permute.xlu1 %2741  ;;  %v2654_v5 = vadd.f32 %v2648_v3, %v2553_v37  ;;  %v2509_v21 = vmul.f32 %v2500_v35, %v5237_v45  ;;  %v2510_v59 = vmul.f32 %v2504_v54, %v5237_v45  ;;  %v5651_v13 = vpop.permute.xlu0 %3044 }
 0x441   :  { %v2543_v24 = vmul.f32 %v2534_v42, %v5239_v2  ;;  %v2544_v41 = vmul.f32 %v2538_v7, %v5239_v2  ;;  %v2454_v44 = vadd.f32 %v2448_v62, %v5576_v58  ;;  %v2693_v45 = vmul.f32 %v2684_v26, %v5247_v28 }
 0x442   :  { %v5657_v23 = vadd.f32 %v5571_v27, %v2655_v25  ;;  %v5661_v34 = vadd.f32 %v5547_v51, %v2654_v5  ;;  %v2728_v1 = vmul.f32 %v2722_v29, %v5283_v40  ;;  %v6174_v27 = vrot.slane %v5311_v60, %v3626_v39 }
 0x443   :  { %v2549_v37 = vadd.f32 %v2543_v24, %v2509_v21  ;;  %v2550_v2 = vadd.f32 %v2544_v41, %v2510_v59  ;;  %v2650_v11 = vadd.f32 %v2644_v48, %v2610_v15  ;;  %v2757_v22 = vsel %vm1058_vm4, %v5646_v32, %v5503_v0 }
 0x444   :  { %v2746_v38 = vpop.permute.xlu1 %2745  ;;  %v2694_v58 = vmul.f32 %v6174_v27, %v5247_v28  ;;  %v5679_v26 = vpop.permute.xlu0 %3048  ;;  %v2651_v56 = vadd.f32 %v2645_v53, %v2611_v17  ;;  %v2733_v40 = vadd.f32 %v5524_v31, %v2693_v45  ;;  %v2769_v52 = vrot.slane %v2757_v22, %v3626_v39 }
 0x445   :  { %v2555_v51 = vadd.f32 %v2549_v37, %v2454_v44  ;;  %v2556_v36 = vadd.f32 %v2550_v2, %v2455_v18  ;;  %v2803_v60 = vrot.slane %v2757_v22, %v3634_v43  ;;  %v2756_v49 = vsel %vm1058_vm4, %v5503_v0, %v2746_v38 }
 0x446   :  { %v2734_v55 = vadd.f32 %v2728_v1, %v2694_v58  ;;  %v2790_v18 = vmul.f32 %v2769_v52, %v5241_v61  ;;  %v2773_v35 = vrot.slane %v2756_v49, %v3626_v39  ;;  %v2807_v54 = vrot.slane %v2756_v49, %v3634_v43 }
 0x447   :  { %v2656_v12 = vadd.f32 %v2650_v11, %v2555_v51  ;;  %v2657_v29 = vadd.f32 %v2651_v56, %v2556_v36  ;;  %v2824_v4 = vmul.f32 %v2803_v60, %v5251_v8 }
 0x448   :  { %v2748_v28 = vpop.permute.xlu1 %2747  ;;  %v5684_v10 = vpop.permute.xlu0 %2951  ;;  %v2791_v5 = vmul.f32 %v2773_v35, %v5241_v61  ;;  %v2825_v59 = vmul.f32 %v2807_v54, %v5251_v8 }
 0x449   :  { %v5686_v62 = vadd.f32 %v2733_v40, %v2656_v12  ;;  %v5691_v14 = vadd.f32 %v2734_v55, %v2657_v29  ;;  %v2755_v31 = vsel %vm1058_vm4, %v2746_v38, %v2748_v28  ;;  %v2830_v0 = vadd.f32 %v2824_v4, %v2790_v18 }
 0x44a   :  { %v2777_v42 = vrot.slane %v2755_v31, %v3626_v39  ;;  %v2811_v15 = vrot.slane %v2755_v31, %v3634_v43  ;;  %v2831_v51 = vadd.f32 %v2825_v59, %v2791_v5 }
 0x44b   :  { %v5721_v45 = vadd.f32 %v2830_v0, %v5539_v9 }
 0x44c   :  { %v2845_v3 = vpop.permute.xlu1 %2844  ;;  %v2954_v48 = vpop.permute.xlu0 %2953  ;;  %v2792_v24 = vmul.f32 %v2777_v42, %v5241_v61  ;;  %v2826_v17 = vmul.f32 %v2811_v15, %v5251_v8 }
 0x44d   :  { %v2858_v25 = vsel %vm1240_vm5, %v5545_v50, %v2845_v3  ;;  %v2955_v21 = vsel %vm1422_vm7, %v5684_v10, %v2954_v48  ;;  %v2857_v53 = vsel %vm1240_vm5, %v2845_v3, %v5566_v19  ;;  %v2960_v41 = vsel %vm1422_vm7, %v2954_v48, %v5591_v16 }
 0x44e   :  { %v2870_v44 = vrot.slane %v2858_v25, %v3626_v39  ;;  %v2987_v1 = vrot.slane %v2955_v21, %v3626_v39  ;;  %v2874_v38 = vrot.slane %v2857_v53, %v3626_v39  ;;  %v2904_v27 = vrot.slane %v2858_v25, %v3634_v43 }
 0x44f   :  { %v2908_v58 = vrot.slane %v2857_v53, %v3634_v43  ;;  %v2832_v22 = vadd.f32 %v2826_v17, %v2792_v24  ;;  %v2991_v56 = vrot.slane %v2960_v41, %v3626_v39  ;;  %v3021_v36 = vrot.slane %v2955_v21, %v3634_v43 }
 0x450   :  { %v2750_v7 = vpop.permute.xlu1 %2749  ;;  %v3025_v12 = vrot.slane %v2960_v41, %v3634_v43  ;;  %v2891_v40 = vmul.f32 %v2870_v44, %v5245_v47  ;;  %v2996_v52 = vmul.f32 %v2987_v1, %v5388_v57  ;;  %v2892_v49 = vmul.f32 %v2874_v38, %v5245_v47 }
 0x451   :  { %v2754_v37 = vsel %vm1058_vm4, %v2748_v28, %v2750_v7  ;;  %v2925_v31 = vmul.f32 %v2904_v27, %v5384_v6  ;;  %v2926_v18 = vmul.f32 %v2908_v58, %v5384_v6  ;;  %v2997_v5 = vmul.f32 %v2991_v56, %v5388_v57 }
 0x452   :  { %v2781_v9 = vrot.slane %v2754_v37, %v3626_v39  ;;  %v2815_v29 = vrot.slane %v2754_v37, %v3634_v43  ;;  %v3030_v37 = vmul.f32 %v3021_v36, %v5392_v20  ;;  %v3031_v1 = vmul.f32 %v3025_v12, %v5392_v20 }
 0x453   :  { %v2932_v27 = vadd.f32 %v2926_v18, %v2892_v49 }
 0x454   :  { %v2849_v2 = vpop.permute.xlu1 %2848  ;;  %v2793_v3 = vmul.f32 %v2781_v9, %v5241_v61  ;;  %v2827_v15 = vmul.f32 %v2815_v29, %v5251_v8  ;;  %v5781_v49 = vadd.f32 %v3031_v1, %v2997_v5 }
 0x455   :  { %v2856_v11 = vsel %vm1240_vm5, %v5566_v19, %v2849_v2  ;;  %v2855_v19 = vsel %vm1240_vm5, %v2849_v2, %v5632_v30  ;;  %v2931_v2 = vadd.f32 %v2925_v31, %v2891_v40  ;;  %v2837_v40 = vadd.f32 %v2831_v51, %v5628_v63 }
 0x456   :  { %v2878_v60 = vrot.slane %v2856_v11, %v3626_v39  ;;  %v2912_v28 = vrot.slane %v2856_v11, %v3634_v43  ;;  %v2882_v48 = vrot.slane %v2855_v19, %v3626_v39  ;;  %v2916_v59 = vrot.slane %v2855_v19, %v3634_v43 }
 0x457   :  { %v2833_v58 = vadd.f32 %v2827_v15, %v2793_v3  ;;  %v2937_v18 = vadd.f32 %v2931_v2, %v5721_v45 }
 0x458   :  { %v2946_v55 = vpop.permute.xlu1 %2945  ;;  %v2893_v21 = vmul.f32 %v2878_v60, %v5245_v47  ;;  %v2894_v11 = vmul.f32 %v2882_v48, %v5245_v47  ;;  %v2928_v9 = vmul.f32 %v2916_v59, %v5384_v6 }
 0x459   :  { %v2958_v4 = vsel %vm1422_vm7, %v2946_v55, %v5610_v46  ;;  %v2959_v35 = vsel %vm1422_vm7, %v5591_v16, %v2946_v55  ;;  %v2927_v16 = vmul.f32 %v2912_v28, %v5384_v6  ;;  %v5779_v55 = vadd.f32 %v3030_v37, %v2996_v52  ;;  %v6176_v37 = vld [vmem:[#allocation44_spill] sm:$0xff] }
 0x45a   :  { %v2975_v54 = vrot.slane %v2958_v4, %v3626_v39  ;;  %v3009_v42 = vrot.slane %v2958_v4, %v3634_v43  ;;  %v2971_v0 = vrot.slane %v2959_v35, %v3626_v39  ;;  %v3005_v25 = vrot.slane %v2959_v35, %v3634_v43 }
 0x45b   :  { %v2933_v29 = vadd.f32 %v2927_v16, %v2893_v21  ;;  %v2938_v4 = vadd.f32 %v2932_v27, %v2837_v40  ;;  %v2839_v3 = vadd.f32 %v2833_v58, %v5657_v23 }
 0x45c   :  { %v2752_v24 = vpop.permute.xlu1 %2751  ;;  %v2992_v17 = vmul.f32 %v2971_v0, %v5388_v57  ;;  %v2993_v53 = vmul.f32 %v2975_v54, %v5388_v57  ;;  %v3026_v41 = vmul.f32 %v3005_v25, %v5392_v20  ;;  %v3027_v44 = vmul.f32 %v3009_v42, %v5392_v20 }
 0x45d   :  { %v2753_v38 = vsel %vm1058_vm4, %v2750_v7, %v2752_v24  ;;  %v2758_v56 = vsel %vm1058_vm4, %v2752_v24, %v5646_v32  ;;  %v2838_v7 = vadd.f32 %v2832_v22, %v5661_v34  ;;  %v2934_v34 = vadd.f32 %v2928_v9, %v2894_v11 }
 0x45e   :  { %v2785_v19 = vrot.slane %v2753_v38, %v3626_v39  ;;  %v2819_v36 = vrot.slane %v2753_v38, %v3634_v43  ;;  %v3032_v60 = vadd.f32 %v3026_v41, %v2992_v17  ;;  %v3033_v28 = vadd.f32 %v3027_v44, %v2993_v53  ;;  %v6175_v41 = vld [vmem:[#allocation27_spill] sm:$0xff] }
 0x45f   :  { %v2789_v32 = vrot.slane %v2758_v56, %v3626_v39  ;;  %v2823_v63 = vrot.slane %v2758_v56, %v3634_v43  ;;  %v5790_v51 = vadd.f32 %v2933_v29, %v2838_v7 }
 0x460   :  { %v2950_v12 = vpop.permute.xlu1 %2949  ;;  %v2794_v22 = vmul.f32 %v2785_v19, %v5241_v61  ;;  %v2828_v52 = vmul.f32 %v2819_v36, %v5251_v8  ;;  %v3038_v54 = vadd.f32 %v3032_v60, %v2937_v18  ;;  %v3039_v42 = vadd.f32 %v3033_v28, %v2938_v4 }
 0x461   :  { %v2957_v31 = vsel %vm1422_vm7, %v5610_v46, %v2950_v12  ;;  %v2956_v46 = vsel %vm1422_vm7, %v2950_v12, %v5684_v10  ;;  %v2795_v23 = vmul.f32 %v2789_v32, %v5241_v61  ;;  %v2829_v25 = vmul.f32 %v2823_v63, %v5251_v8 }
 0x462   :  { %v2979_v45 = vrot.slane %v2957_v31, %v3626_v39  ;;  %v3013_v15 = vrot.slane %v2957_v31, %v3634_v43  ;;  %v2834_v59 = vadd.f32 %v2828_v52, %v2794_v22  ;;  %v2983_v61 = vrot.slane %v2956_v46, %v3626_v39 }
 0x463   :  { %v3017_v16 = vrot.slane %v2956_v46, %v3634_v43  ;;  %v2835_v31 = vadd.f32 %v2829_v25, %v2795_v23  ;;  %v6177_v23 = vld [vmem:[#allocation19_spill] sm:$0xff]  ;;  %v6178_v25 = vld [vmem:[#allocation17_spill] sm:$0xff] }
 0x464   :  { %v3047_v35 = vpop.permute.xlu1 %3046  ;;  %v2994_v53 = vmul.f32 %v2979_v45, %v5388_v57  ;;  %v3028_v2 = vmul.f32 %v3013_v15, %v5392_v20  ;;  %v2995_v19 = vmul.f32 %v2983_v61, %v5388_v57 }
 0x465   :  { %v3059_v48 = vsel %vm1604_vm6, %v3047_v35, %v5679_v26  ;;  %v3060_v0 = vsel %vm1604_vm6, %v5651_v13, %v3047_v35  ;;  %v3029_v36 = vmul.f32 %v3017_v16, %v5392_v20 }
 0x466   :  { %v3072_v5 = vrot.slane %v3060_v0, %v3626_v39  ;;  %v3076_v10 = vrot.slane %v3059_v48, %v3626_v39  ;;  %v3106_v21 = vrot.slane %v3060_v0, %v3634_v43  ;;  %v3110_v24 = vrot.slane %v3059_v48, %v3634_v43 }
 0x467   :  { %v3034_v20 = vadd.f32 %v3028_v2, %v2994_v53  ;;  %v3035_v35 = vadd.f32 %v3029_v36, %v2995_v19  ;;  %v2840_v48 = vadd.f32 %v2834_v59, %v5686_v62  ;;  %v2841_v0 = vadd.f32 %v2835_v31, %v5691_v14 }
 0x468   :  { %v2853_v17 = vpop.permute.xlu1 %2852  ;;  %v3093_v44 = vmul.f32 %v3072_v5, %v6175_v41  ;;  %v3094_v8 = vmul.f32 %v3076_v10, %v6175_v41  ;;  %v3127_v1 = vmul.f32 %v3106_v21, %v6176_v37  ;;  %v3128_v38 = vmul.f32 %v3110_v24, %v6176_v37 }
 0x469   :  { %v2854_v27 = vsel %vm1240_vm5, %v5632_v30, %v2853_v17  ;;  %v2859_v58 = vsel %vm1240_vm5, %v2853_v17, %v5545_v50  ;;  %v5831_v30 = vpop.permute.xlu0 %3146  ;;  %v3040_v21 = vadd.f32 %v3034_v20, %v5790_v51  ;;  %v6180_v20 = vld [vmem:[#allocation34_spill] sm:$0xff] }
 0x46a   :  { %v3133_v11 = vadd.f32 %v3127_v1, %v3093_v44  ;;  %v2886_v56 = vrot.slane %v2854_v27, %v3626_v39  ;;  %v2890_v9 = vrot.slane %v2859_v58, %v3626_v39  ;;  %v2920_v29 = vrot.slane %v2854_v27, %v3634_v43 }
 0x46b   :  { %v3134_v12 = vadd.f32 %v3128_v38, %v3094_v8  ;;  %v2924_v40 = vrot.slane %v2859_v58, %v3634_v43 }
 0x46c   :  { %v3051_v7 = vpop.permute.xlu1 %3050  ;;  %v3139_v60 = vadd.f32 %v3133_v11, %v3038_v54  ;;  %v2895_v50 = vmul.f32 %v2886_v56, %v5245_v47  ;;  %v2896_v28 = vmul.f32 %v2890_v9, %v5245_v47  ;;  %v2929_v32 = vmul.f32 %v2920_v29, %v5384_v6 }
 0x46d   :  { %v3140_v18 = vadd.f32 %v3134_v12, %v3039_v42  ;;  %v2930_v4 = vmul.f32 %v2924_v40, %v5384_v6  ;;  %v3058_v57 = vsel %vm1604_vm6, %v5679_v26, %v3051_v7  ;;  %v2940_v6 = vadd.f32 %v2934_v34, %v2839_v3  ;;  %v6179_v40 = vld [vmem:[#allocation28_spill] sm:$0xff] }
 0x46e   :  { %v3080_v63 = vrot.slane %v3058_v57, %v3626_v39  ;;  %v3114_v22 = vrot.slane %v3058_v57, %v3634_v43  ;;  %v5843_v52 = vadd.f32 %v5831_v30, %v3139_v60  ;;  %v2935_v47 = vadd.f32 %v2929_v32, %v2895_v50 }
 0x46f   :  { %v2936_v54 = vadd.f32 %v2930_v4, %v2896_v28  ;;  %v5846_v46 = vadd.f32 %v5831_v30, %v3140_v18  ;;  %v3041_v16 = vadd.f32 %v3035_v35, %v2940_v6  ;;  %v6181_v6 = vld [vmem:[#allocation11_spill] sm:$0xff] }
 0x470   :  { %v3053_v42 = vpop.permute.xlu1 %3052  ;;  %v3095_v45 = vmul.f32 %v3080_v63, %v6175_v41  ;;  %v3129_v26 = vmul.f32 %v3114_v22, %v6176_v37  ;;  %v3155_v15 = vmul.f32 %v5843_v52, %v6177_v23  ;;  %v2941_v24 = vadd.f32 %v2935_v47, %v2840_v48 }
 0x471   :  { %v3156_v5 = vmul.f32 %v5846_v46, %v6178_v25  ;;  %v3057_v10 = vsel %vm1604_vm6, %v3051_v7, %v3053_v42  ;;  %v2942_v17 = vadd.f32 %v2936_v54, %v2841_v0 }
 0x472   :  { %v3135_v3 = vadd.f32 %v3129_v26, %v3095_v45  ;;  %v3084_v34 = vrot.slane %v3057_v10, %v3626_v39  ;;  %v3118_v61 = vrot.slane %v3057_v10, %v3634_v43  ;;  %v3162_v62 = vsel %vm3161_vm9, %v3155_v15, 0.0  ;;  %v6182_v26 = vld [vmem:[#allocation40_spill] sm:$0xff] }
 0x473   :  { %v3163_v38 = vsel %vm3161_vm9, %v3156_v5, 0.0  ;;  %v3176_v33 = vmul.f32 %v3155_v15, %v3155_v15  ;;  %v3042_v60 = vadd.f32 %v5779_v55, %v2941_v24 }
 0x474   :  { %v3055_v53 = vpop.permute.xlu1 %3054  ;;  %v3141_v14 = vadd.f32 %v3135_v3, %v3040_v21  ;;  %v3096_v59 = vmul.f32 %v3084_v34, %v6175_v41  ;;  %v3130_v44 = vmul.f32 %v3118_v61, %v6176_v37  ;;  %v3164_v4 = vadd.f32 %v3163_v38, %v3162_v62 }
 0x475   :  { %v3056_v8 = vsel %vm1604_vm6, %v3053_v42, %v3055_v53  ;;  %v3061_v51 = vsel %vm1604_vm6, %v3055_v53, %v5651_v13  ;;  %v3177_v13 = vmul.f32 %v3156_v5, %v3156_v5 }
 0x476   :  { %v3088_v1 = vrot.slane %v3056_v8, %v3626_v39  ;;  %v3122_v2 = vrot.slane %v3056_v8, %v3634_v43  ;;  %v5873_v27 = vadd.f32 %v5831_v30, %v3141_v14  ;;  %v3136_v58 = vadd.f32 %v3130_v44, %v3096_v59  ;;  %v3363_v14 = vld [vmem:[%s5935_s6] sm:$0xf] }
 0x477   :  { %v3092_v11 = vrot.slane %v3061_v51, %v3626_v39  ;;  %v3126_v56 = vrot.slane %v3061_v51, %v3634_v43  ;;  %v3043_v39 = vadd.f32 %v5781_v49, %v2942_v17  ;;  %v6183_v59 = vmov 7  }
 0x478   :  { %v3097_v9 = vmul.f32 %v3088_v1, %v6175_v41  ;;  %v3131_v29 = vmul.f32 %v3122_v2, %v6176_v37  ;;  %v3142_v19 = vadd.f32 %v3136_v58, %v3041_v16  ;;  %v3157_v7 = vmul.f32 %v5873_v27, %v6179_v40 }
 0x479   :  { %v3098_v36 = vmul.f32 %v3092_v11, %v6175_v41  ;;  %v3132_v12 = vmul.f32 %v3126_v56, %v6176_v37  ;;  %v3182_v41 = vsel %vm3161_vm9, %v3176_v33, 0.0  ;;  %v3183_v37 = vsel %vm3161_vm9, %v3177_v13, 0.0 }
 0x47a   :  { %v3137_v50 = vadd.f32 %v3131_v29, %v3097_v9  ;;  %v3152_v43 = vadd.f32 %v5831_v30, %v3142_v19  ;;  %v3165_v32 = vsel %vm3161_vm9, %v3157_v7, 0.0  ;;  %v3178_v31 = vmul.f32 %v3157_v7, %v3157_v7 }
 0x47b   :  { %v3138_v28 = vadd.f32 %v3132_v12, %v3098_v36  ;;  %v3166_v22 = vadd.f32 %v3165_v32, %v3164_v4  ;;  %v3184_v42 = vadd.f32 %v3183_v37, %v3182_v41 }
 0x47c   :  { %v3143_v18 = vadd.f32 %v3137_v50, %v3042_v60  ;;  %v3158_v63 = vmul.f32 %v3152_v43, %v6180_v20  ;;  %v3185_v49 = vsel %vm3161_vm9, %v3178_v31, 0.0 }
 0x47d   :  { %v3144_v57 = vadd.f32 %v3138_v28, %v3043_v39  ;;  %v3186_v0 = vadd.f32 %v3185_v49, %v3184_v42 }
 0x47e   :  { %v3153_v55 = vadd.f32 %v5831_v30, %v3143_v18  ;;  %v3167_v47 = vsel %vm3161_vm9, %v3158_v63, 0.0  ;;  %v3179_v54 = vmul.f32 %v3158_v63, %v3158_v63 }
 0x47f   :  { %v3154_v35 = vadd.f32 %v5831_v30, %v3144_v57  ;;  %v3168_v48 = vadd.f32 %v3167_v47, %v3166_v22 }
 0x480   :  { %v3159_v45 = vmul.f32 %v3153_v55, %v6181_v6  ;;  %v3187_v5 = vsel %vm3161_vm9, %v3179_v54, 0.0 }
 0x481   :  { %v3160_v15 = vmul.f32 %v3154_v35, %v6182_v26  ;;  %v3188_v61 = vadd.f32 %v3187_v5, %v3186_v0 }
 0x482   :  { %v3169_v10 = vsel %vm3161_vm9, %v3159_v45, 0.0  ;;  %v3180_v21 = vmul.f32 %v3159_v45, %v3159_v45 }
 0x483   :  { %v3170_v3 = vadd.f32 %v3169_v10, %v3168_v48  ;;  %v3181_v34 = vmul.f32 %v3160_v15, %v3160_v15  ;;  %v3171_v30 = vsel %vm3161_vm9, %v3160_v15, 0.0 }
 0x484   :  { %v3189_v16 = vsel %vm3161_vm9, %v3180_v21, 0.0 }
 0x485   :  { %v3172_v24 = vadd.f32 %v3171_v30, %v3170_v3  ;;  %v3190_v17 = vadd.f32 %v3189_v16, %v3188_v61  ;;  %v3191_v53 = vsel %vm3161_vm9, %v3181_v34, 0.0 }
 0x487   :  { %3173 = vadd.xlane.f32.xlu1 %v3172_v24  ;;  %v3192_v62 = vadd.f32 %v3191_v53, %v3190_v17 }
 0x489   :  { %3193 = vadd.xlane.f32.xlu0 %v3192_v62  ;;  %v3364_v62 = vld [vmem:[%s5933_s0] sm:$0xff] }
 0x498   :  { %3223 = vperm.xlu1 %3348, %v3363_v14  }
 0x49f   :  { %3213 = vperm.xlu0 %3347, %v3363_v14  }
 0x4a3   :  { %3349 = vset.pattern.permute.xlu0 %v6183_v59 }
 0x510   :  { %v3174_v44 = vpop.xlane.xlu1 %3173 }
 0x511   :  { %v3175_v8 = vmul.f32 0.001953125, %v3174_v44 }
 0x512   :  { %v3194_v51 = vpop.xlane.xlu0 %3193 }
 0x513   :  { %v3195_v1 = vmul.f32 0.001953125, %v3194_v51  ;;  %v3196_v2 = vmul.f32 %v3175_v8, %v3175_v8  ;;  %v3198_v11 = vsub.f32 %v5843_v52, %v3175_v8  ;;  %v3199_v56 = vsub.f32 %v5846_v46, %v3175_v8 }
 0x514   :  { %v3200_v9 = vsub.f32 %v5873_v27, %v3175_v8  ;;  %v3201_v29 = vsub.f32 %v3152_v43, %v3175_v8  ;;  %v3202_v19 = vsub.f32 %v3153_v55, %v3175_v8  ;;  %v3203_v36 = vsub.f32 %v3154_v35, %v3175_v8  ;;  %v3224_v32 = vpop.permute.xlu1 %3223 }
 0x515   :  { %v3197_v38 = vsub.f32 %v3195_v1, %v3196_v2 }
 0x517   :  { %v3204_v58 = vadd.f32 1e-05, %v3197_v38 }
 0x519   :  { %3359 = vrsqrt.f32 %v3204_v58 }
 0x51a   :  { %v3214_v13 = vpop.permute.xlu0 %3213 }
 0x526   :  { %v3360_v33 = vpop.eup %3359 }
 0x527   :  { %v3206_v12 = vmul.f32 %v3360_v33, %v3198_v11  ;;  %v3207_v7 = vmul.f32 %v3360_v33, %v3199_v56  ;;  %v3208_v60 = vmul.f32 %v3360_v33, %v3200_v9  ;;  %v3209_v39 = vmul.f32 %v3360_v33, %v3201_v29 }
 0x528   :  { %v3210_v50 = vmul.f32 %v3360_v33, %v3202_v19  ;;  %v3211_v28 = vmul.f32 %v3360_v33, %v3203_v36 }
 0x529   :  { %v3216_v31 = vmul.f32 %v3214_v13, %v3206_v12  ;;  %v3217_v18 = vmul.f32 %v3214_v13, %v3207_v7  ;;  %v3218_v4 = vmul.f32 %v3214_v13, %v3208_v60  ;;  %v3219_v52 = vmul.f32 %v3214_v13, %v3209_v39 }
 0x52a   :  { %v3220_v41 = vmul.f32 %v3214_v13, %v3210_v50  ;;  %v3221_v46 = vmul.f32 %v3214_v13, %v3211_v28 }
 0x52b   :  { %v3226_v37 = vadd.f32 %v3224_v32, %v3216_v31  ;;  %v3227_v27 = vadd.f32 %v3224_v32, %v3217_v18  ;;  %v3228_v43 = vadd.f32 %v3224_v32, %v3218_v4  ;;  %v3229_v57 = vadd.f32 %v3224_v32, %v3219_v52 }
 0x52c   :  { %v3230_v63 = vadd.f32 %v3224_v32, %v3220_v41  ;;  %v3231_v55 = vadd.f32 %v3224_v32, %v3221_v46 }
 0x52d   :  { %v3232_v22 = vmul.f32 0.2, %v3226_v37  ;;  %v3233_v49 = vmul.f32 0.2, %v3227_v27  ;;  %v3234_v35 = vmul.f32 0.2, %v3228_v43 }
 0x52e   :  { %v3235_v47 = vmul.f32 0.2, %v3229_v57  ;;  %v3236_v54 = vmul.f32 0.2, %v3230_v63  ;;  %v3237_v42 = vmul.f32 0.2, %v3231_v55 }
 0x52f   :  { %v3238_v45 = vmax.f32 %v3226_v37, %v3232_v22  ;;  %v3239_v15 = vmax.f32 %v3227_v27, %v3233_v49  ;;  %v3240_v48 = vmax.f32 %v3228_v43, %v3234_v35 }
 0x530   :  { %v3241_v0 = vmax.f32 %v3229_v57, %v3235_v47  ;;  %v3242_v5 = vmax.f32 %v3230_v63, %v3236_v54  ;;  %v3243_v10 = vmax.f32 %v3231_v55, %v3237_v42 }
 0x531   :  { %v3244_v21 = vmul.f32 %v3238_v45, %v6177_v23  ;;  %v3245_v3 = vmul.f32 %v3239_v15, %v6178_v25  ;;  %v3246_v34 = vmul.f32 %v3240_v48, %v6179_v40  ;;  %v3365_v23 = vld [vmem:[%s5933_s0 + $0x8] sm:$0xff]  ;;  %v3366_v40 = vld [vmem:[%s5933_s0 + $0x10] sm:$0xff] }
 0x532   :  { %v3247_v61 = vmul.f32 %v3241_v0, %v6180_v20  ;;  %v3248_v30 = vmul.f32 %v3242_v5, %v6181_v6  ;;  %v3249_v16 = vmul.f32 %v3243_v10, %v6182_v26 }
 0x533   :  { %v3256_v24 = vcombine.low %v3244_v21, %v3245_v3 }
 0x534   :  { %v3257_v17 = vcombine.low %v3246_v34, %v3247_v61  ;;  %v3258_v53 = vcombine.low %v3248_v30, %v3249_v16 }
 0x535   :  { %v3262_v14 = vadd.f32 %v3364_v62, %v3256_v24 }
 0x536   :  { %v3263_v25 = vadd.f32 %v3365_v23, %v3257_v17  ;;  %v3264_v20 = vadd.f32 %v3366_v40, %v3258_v53 }
 0x537   :  { %3265 = vst [vmem:[%s5939_s7] sm:$0xff] %v3262_v14 }
 0x538   :  { %3266 = vst [vmem:[%s5939_s7 + $0x8] sm:$0xff] %v3263_v25  ;;  %3267 = vst [vmem:[%s5939_s7 + $0x10] sm:$0xff] %v3264_v20 }

</bundles_post_ra>
